<compile_context>
chip_gen: v7x
topology: tpu7x:2x2x1
jax: 0.10.0
libtpu: 0.0.40
codegen_flags: <defaults>
</compile_context>

<pallas_src>
import math

import jax
import jax.numpy as jnp
from jax.experimental import pallas as pl
from jax.experimental.pallas import tpu as pltpu


_TM_CONV = 512   # row-tile cap for the conv im2col GEMMs
_TM_MLP = 256    # row-tile cap for the fused MLP (v5e 16 MiB scoped-VMEM safe)


def _round_up(x, m):
    return ((x + m - 1) // m) * m


def _pick_tm(m, tmax):
    """Row tile: multiple of 16 (bf16 packs 2 rows/sublane), <= tmax, and at
    least 2 grid steps whenever the problem is big enough (v7x megacore)."""
    m16 = _round_up(m, 16)
    if m16 <= 32:
        return m16
    return min(tmax, _round_up(m16 // 2, 16))


# ----------------------------------------------------------------------------
# Pallas kernels
# ----------------------------------------------------------------------------
def _conv_bias_relu_kernel(p_ref, w_ref, b_ref, o_ref):
    """im2col GEMM tile: [TM,K]x[K,OC] (bf16 -> f32 acc) + bias + ReLU (f32)."""
    z = jnp.dot(p_ref[...], w_ref[...], preferred_element_type=jnp.float32)
    o_ref[...] = jnp.maximum(z + b_ref[...], 0.0).astype(o_ref.dtype)


def _mlp_kernel(x_ref, w4_ref, b4_ref, wh_ref, bh_ref, o_ref):
    """Fused fc4(+ReLU) and head; the 512-wide hidden activation stays in VMEM."""
    h = jnp.dot(x_ref[...], w4_ref[...], preferred_element_type=jnp.float32)
    h = jnp.maximum(h + b4_ref[...], 0.0)
    # Hidden recast to bf16 for the head MXU GEMM (f32 accumulation kept).
    q = jnp.dot(h.astype(wh_ref.dtype), wh_ref[...],
                preferred_element_type=jnp.float32)
    o_ref[...] = q + bh_ref[...]


# ----------------------------------------------------------------------------
# Wrappers (plain-JAX glue: im2col, padding, pallas_call plumbing)
# ----------------------------------------------------------------------------
def _im2col_nhwc(x, kh, kw, stride):
    """NHWC [N,H,W,C] -> patches [N*OH*OW, KH*KW*C], features ordered (kh,kw,c)."""
    n, h, w, c = x.shape
    oh = (h - kh) // stride + 1
    ow = (w - kw) // stride + 1
    cols = []
    for ki in range(kh):
        for kj in range(kw):
            cols.append(
                x[:, ki:ki + stride * oh:stride, kj:kj + stride * ow:stride, :])
    p = jnp.stack(cols, axis=3)                      # [N, OH, OW, KH*KW, C]
    return p.reshape(n * oh * ow, kh * kw * c), (n, oh, ow)


def conv_relu(x_nhwc, w_gemm, b_row, *, kh, kw, stride):
    """Conv2d (VALID) + bias + ReLU.  NHWC bf16 in -> NHWC bf16 out.

    `w_gemm` is the pre-arranged [KH*KW*IC, OC] bf16 weight from
    prepare_params(); `b_row` is the [1, OC] f32 bias.
    """
    patches, (n, oh, ow) = _im2col_nhwc(x_nhwc, kh, kw, stride)
    m, k = patches.shape
    oc = w_gemm.shape[1]

    tm = _pick_tm(m, _TM_CONV)
    m_pad = _round_up(m, tm)
    if m_pad != m:
        patches = jnp.pad(patches, ((0, m_pad - m), (0, 0)))

    out = pl.pallas_call(
        _conv_bias_relu_kernel,
        out_shape=jax.ShapeDtypeStruct((m_pad, oc), jnp.bfloat16),
        grid=(m_pad // tm,),
        in_specs=[
            pl.BlockSpec((tm, k), lambda i: (i, 0)),
            pl.BlockSpec((k, oc), lambda i: (0, 0)),
            pl.BlockSpec((1, oc), lambda i: (0, 0)),
        ],
        out_specs=pl.BlockSpec((tm, oc), lambda i: (i, 0)),
        compiler_params=pltpu.CompilerParams(
            dimension_semantics=("parallel",)),
        cost_estimate=pl.CostEstimate(
            flops=2 * m_pad * k * oc,
            transcendentals=0,
            bytes_accessed=(m_pad * k + k * oc + m_pad * oc) * 2 + oc * 4),
    )(patches, w_gemm, b_row)
    return out[:m].reshape(n, oh, ow, oc)


def mlp_head(x, w4, b4, wh, bh):
    """Fused Linear(3136->512)+ReLU and Linear(512->A).  x: [N, 3136] -> [N, A]."""
    m, k = x.shape
    hdim = w4.shape[1]
    a = wh.shape[1]

    tm = _pick_tm(m, _TM_MLP)
    m_pad = _round_up(m, tm)
    if m_pad != m:
        x = jnp.pad(x, ((0, m_pad - m), (0, 0)))

    out = pl.pallas_call(
        _mlp_kernel,
        out_shape=jax.ShapeDtypeStruct((m_pad, a), jnp.float32),
        grid=(m_pad // tm,),
        in_specs=[
            pl.BlockSpec((tm, k), lambda i: (i, 0)),
            pl.BlockSpec((k, hdim), lambda i: (0, 0)),
            pl.BlockSpec((1, hdim), lambda i: (0, 0)),
            pl.BlockSpec((hdim, a), lambda i: (0, 0)),
            pl.BlockSpec((1, a), lambda i: (0, 0)),
        ],
        out_specs=pl.BlockSpec((tm, a), lambda i: (i, 0)),
        compiler_params=pltpu.CompilerParams(
            dimension_semantics=("parallel",)),
        cost_estimate=pl.CostEstimate(
            flops=2 * m_pad * (k * hdim + hdim * a),
            transcendentals=0,
            bytes_accessed=(m_pad * k + k * hdim + hdim * a) * 2
                           + (hdim + a + m_pad * a) * 4),
    )(x, w4, b4, wh, bh)
    return out[:m]


# ----------------------------------------------------------------------------
# Module: parameters (torch layout), one-time kernel-layout prep, forward
# ----------------------------------------------------------------------------
def init_params(key, in_channels=4, n_actions=14):
    """Deterministic init mirroring the PyTorch module's layer shapes (torch layout)."""
    ks = jax.random.split(key, 10)

    def _uniform(k, shape, fan_in):
        bound = 1.0 / math.sqrt(fan_in)
        return jax.random.uniform(k, shape, jnp.float32, -bound, bound)

    p = {}
    p["w1"] = _uniform(ks[0], (32, in_channels, 8, 8), in_channels * 8 * 8)
    p["b1"] = _uniform(ks[1], (32,), in_channels * 8 * 8)
    p["w2"] = _uniform(ks[2], (64, 32, 4, 4), 32 * 4 * 4)
    p["b2"] = _uniform(ks[3], (64,), 32 * 4 * 4)
    p["w3"] = _uniform(ks[4], (64, 64, 3, 3), 64 * 3 * 3)
    p["b3"] = _uniform(ks[5], (64,), 64 * 3 * 3)
    p["fc4_w"] = _uniform(ks[6], (512, 7 * 7 * 64), 7 * 7 * 64)
    p["fc4_b"] = _uniform(ks[7], (512,), 7 * 7 * 64)
    p["head_w"] = _uniform(ks[8], (n_actions, 512), 512)
    p["head_b"] = _uniform(ks[9], (n_actions,), 512)
    return p


def prepare_params(params):
    """One-time conversion of torch-layout params into kernel-ready arrays.

    Hoists every reshape/transpose/cast (and the 1/255 input scale, folded
    into w1) out of the per-call forward pass.
    """
    def conv_w(w, scale=None):
        oc, ic, kh, kw = w.shape
        wf = w if scale is None else w * scale
        # OIHW -> [KH*KW*IC, OC], rows ordered (kh, kw, ic) to match im2col.
        return wf.transpose(2, 3, 1, 0).reshape(kh * kw * ic, oc).astype(jnp.bfloat16)

    oc3, oh, ow = 64, 7, 7
    # torch fc4 expects an NCHW flatten; permute its columns once to NHWC order.
    fc4_w_nhwc = (params["fc4_w"].reshape(-1, oc3, oh, ow)
                  .transpose(0, 2, 3, 1).reshape(-1, oh * ow * oc3))

    return {
        "w1": conv_w(params["w1"], 1.0 / 255.0),      # 1/255 folded into w1
        "b1": params["b1"].reshape(1, -1).astype(jnp.float32),
        "w2": conv_w(params["w2"]),
        "b2": params["b2"].reshape(1, -1).astype(jnp.float32),
        "w3": conv_w(params["w3"]),
        "b3": params["b3"].reshape(1, -1).astype(jnp.float32),
        "fc4_w": fc4_w_nhwc.T.astype(jnp.bfloat16),   # [3136, 512]
        "fc4_b": params["fc4_b"].reshape(1, -1).astype(jnp.float32),
        "head_w": params["head_w"].T.astype(jnp.bfloat16),   # [512, A]
        "head_b": params["head_b"].reshape(1, -1).astype(jnp.float32),
    }


def dqn_forward(x, prep):
    """x: uint8/float NCHW [N, C, 84, 84] -> Q-values [N, n_actions] (float32)."""
    # Single fused pass: NCHW -> NHWC transpose + cast to bf16 (1/255 is in w1).
    x = jnp.transpose(x, (0, 2, 3, 1)).astype(jnp.bfloat16)
    x = conv_relu(x, prep["w1"], prep["b1"], kh=8, kw=8, stride=4)  # [N,20,20,32]
    x = conv_relu(x, prep["w2"], prep["b2"], kh=4, kw=4, stride=2)  # [N, 9, 9,64]
    x = conv_relu(x, prep["w3"], prep["b3"], kh=3, kw=3, stride=1)  # [N, 7, 7,64]
    n = x.shape[0]
    x = x.reshape(n, -1)                                            # NHWC flatten
    return mlp_head(x, prep["fc4_w"], prep["fc4_b"],
                    prep["head_w"], prep["head_b"])


# ----------------------------------------------------------------------------
# Pure-JAX reference (f32, torch-layout params) for a correctness cross-check
# ----------------------------------------------------------------------------
def _reference_forward(x, params):
    x = x.astype(jnp.float32) / 255.0

    def conv(y, w, b, s):
        y = jax.lax.conv_general_dilated(
            y, w, window_strides=(s, s), padding="VALID",
            dimension_numbers=("NCHW", "OIHW", "NCHW"))
        return jax.nn.relu(y + b[None, :, None, None])

    x = conv(x, params["w1"], params["b1"], 4)
    x = conv(x, params["w2"], params["b2"], 2)
    x = conv(x, params["w3"], params["b3"], 1)
    x = x.reshape(x.shape[0], -1)                            # NCHW flatten
    x = jax.nn.relu(x @ params["fc4_w"].T + params["fc4_b"])
    return x @ params["head_w"].T + params["head_b"]


if __name__ == "__main__":
    key = jax.random.PRNGKey(0)
    pkey, xkey = jax.random.split(key)
    params = init_params(pkey, in_channels=4, n_actions=14)
    prep = prepare_params(params)          # one-time weight prep (outside jit)

    # Batch of 2 Atari-style frames; spatial must be 84x84 so the conv stack
    # produces the 7*7*64 features fc4 expects.
    x = jax.random.randint(xkey, (2, 4, 84, 84), 0, 256,
                           dtype=jnp.int32).astype(jnp.uint8)

    out = jax.jit(dqn_forward)(x, prep)
    out = jax.block_until_ready(out)

    assert out.shape == (2, 14) and out.dtype == jnp.float32
    ref = _reference_forward(x, params)
    assert bool(jnp.all(jnp.isfinite(out)))
    # bf16 matmul inputs with f32 accumulation -> loose tolerance vs f32 reference.
    assert bool(jnp.allclose(out, ref, rtol=5e-2, atol=5e-2)), (
        f"max abs diff {float(jnp.max(jnp.abs(out - ref)))}")
    print("KERNEL_OK")
</pallas_src>

<mosaic_0001>
module attributes {stable_mosaic.version = 11 : i64} {
  func.func @_conv_bias_relu_kernel(%arg0: i32, %arg1: memref<400x256xbf16, #tpu.memory_space<vmem>>, %arg2: memref<256x32xbf16, #tpu.memory_space<vmem>>, %arg3: memref<1x32xf32, #tpu.memory_space<vmem>>, %arg4: memref<400x32xbf16, #tpu.memory_space<vmem>>) attributes {dimension_semantics = [#tpu.dimension_semantics<parallel>], iteration_bounds = array<i64: 2>, scalar_prefetch = 0 : i64, scratch_operands = 0 : i64, tpu.core_type = #tpu.core_type<tc>, window_params = [{transform_indices = @transform_0, window_bounds = array<i64: 400, 256>}, {pipeline_mode = #tpu.pipeline_mode<synchronous>, transform_indices = @transform_1, window_bounds = array<i64: 256, 32>}, {pipeline_mode = #tpu.pipeline_mode<synchronous>, transform_indices = @transform_2, window_bounds = array<i64: 1, 32>}, {transform_indices = @transform_3, window_bounds = array<i64: 400, 32>}]} {
    %c0 = arith.constant 0 : index
    %c0_0 = arith.constant 0 : index
    %0 = vector.load %arg1[%c0, %c0_0] : memref<400x256xbf16, #tpu.memory_space<vmem>>, vector<400x256xbf16>
    %c0_1 = arith.constant 0 : index
    %c0_2 = arith.constant 0 : index
    %1 = vector.load %arg2[%c0_1, %c0_2] : memref<256x32xbf16, #tpu.memory_space<vmem>>, vector<256x32xbf16>
    %cst = arith.constant dense<0.000000e+00> : vector<400x32xf32>
    %2 = tpu.matmul %0, %1, %cst {dimension_numbers = #tpu.dot_dimension_numbers<[1], [0], [0], [1], [0, 0, 1, 1], [], []>} : vector<400x256xbf16>, vector<256x32xbf16>, vector<400x32xf32> -> vector<400x32xf32>
    %c0_3 = arith.constant 0 : index
    %c0_4 = arith.constant 0 : index
    %3 = vector.load %arg3[%c0_3, %c0_4] : memref<1x32xf32, #tpu.memory_space<vmem>>, vector<1x32xf32>
    %4 = vector.broadcast %3 : vector<1x32xf32> to vector<400x32xf32>
    %5 = arith.addf %2, %4 : vector<400x32xf32>
    %cst_5 = arith.constant 0.000000e+00 : f32
    %6 = vector.broadcast %cst_5 : f32 to vector<400x32xf32>
    %7 = arith.maximumf %5, %6 : vector<400x32xf32>
    %8 = arith.truncf %7 : vector<400x32xf32> to vector<400x32xbf16>
    %c0_6 = arith.constant 0 : index
    %c0_7 = arith.constant 0 : index
    %9 = vector.load %arg4[%c0_6, %c0_7] : memref<400x32xbf16, #tpu.memory_space<vmem>>, vector<400x32xbf16>
    tpu.vector_store %arg4[%c0_6, %c0_7], %8 {strides = array<i32>} : memref<400x32xbf16, #tpu.memory_space<vmem>>, vector<400x32xbf16>,
    return
  }
  func.func @transform_0(%arg0: i32) -> (i32, i32) {
    %c0_i32 = arith.constant 0 : i32
    %c0_i32_0 = arith.constant 0 : i32
    return %arg0, %c0_i32 : i32, i32
  }
  func.func @transform_1(%arg0: i32) -> (i32, i32) {
    %c0_i32 = arith.constant 0 : i32
    %c0_i32_0 = arith.constant 0 : i32
    %c0_i32_1 = arith.constant 0 : i32
    return %c0_i32, %c0_i32_0 : i32, i32
  }
  func.func @transform_2(%arg0: i32) -> (i32, i32) {
    %c0_i32 = arith.constant 0 : i32
    %c0_i32_0 = arith.constant 0 : i32
    %c0_i32_1 = arith.constant 0 : i32
    return %c0_i32, %c0_i32_0 : i32, i32
  }
  func.func @transform_3(%arg0: i32) -> (i32, i32) {
    %c0_i32 = arith.constant 0 : i32
    %c0_i32_0 = arith.constant 0 : i32
    return %arg0, %c0_i32 : i32, i32
  }
}

module attributes {stable_mosaic.version = 11 : i64} {
  func.func @_conv_bias_relu_kernel(%arg0: i32, %arg1: memref<96x512xbf16, #tpu.memory_space<vmem>>, %arg2: memref<512x64xbf16, #tpu.memory_space<vmem>>, %arg3: memref<1x64xf32, #tpu.memory_space<vmem>>, %arg4: memref<96x64xbf16, #tpu.memory_space<vmem>>) attributes {dimension_semantics = [#tpu.dimension_semantics<parallel>], iteration_bounds = array<i64: 2>, scalar_prefetch = 0 : i64, scratch_operands = 0 : i64, tpu.core_type = #tpu.core_type<tc>, window_params = [{transform_indices = @transform_0, window_bounds = array<i64: 96, 512>}, {pipeline_mode = #tpu.pipeline_mode<synchronous>, transform_indices = @transform_1, window_bounds = array<i64: 512, 64>}, {pipeline_mode = #tpu.pipeline_mode<synchronous>, transform_indices = @transform_2, window_bounds = array<i64: 1, 64>}, {transform_indices = @transform_3, window_bounds = array<i64: 96, 64>}]} {
    %c0 = arith.constant 0 : index
    %c0_0 = arith.constant 0 : index
    %0 = vector.load %arg1[%c0, %c0_0] : memref<96x512xbf16, #tpu.memory_space<vmem>>, vector<96x512xbf16>
    %c0_1 = arith.constant 0 : index
    %c0_2 = arith.constant 0 : index
    %1 = vector.load %arg2[%c0_1, %c0_2] : memref<512x64xbf16, #tpu.memory_space<vmem>>, vector<512x64xbf16>
    %cst = arith.constant dense<0.000000e+00> : vector<96x64xf32>
    %2 = tpu.matmul %0, %1, %cst {dimension_numbers = #tpu.dot_dimension_numbers<[1], [0], [0], [1], [0, 0, 1, 1], [], []>} : vector<96x512xbf16>, vector<512x64xbf16>, vector<96x64xf32> -> vector<96x64xf32>
    %c0_3 = arith.constant 0 : index
    %c0_4 = arith.constant 0 : index
    %3 = vector.load %arg3[%c0_3, %c0_4] : memref<1x64xf32, #tpu.memory_space<vmem>>, vector<1x64xf32>
    %4 = vector.broadcast %3 : vector<1x64xf32> to vector<96x64xf32>
    %5 = arith.addf %2, %4 : vector<96x64xf32>
    %cst_5 = arith.constant 0.000000e+00 : f32
    %6 = vector.broadcast %cst_5 : f32 to vector<96x64xf32>
    %7 = arith.maximumf %5, %6 : vector<96x64xf32>
    %8 = arith.truncf %7 : vector<96x64xf32> to vector<96x64xbf16>
    %c0_6 = arith.constant 0 : index
    %c0_7 = arith.constant 0 : index
    %9 = vector.load %arg4[%c0_6, %c0_7] : memref<96x64xbf16, #tpu.memory_space<vmem>>, vector<96x64xbf16>
    tpu.vector_store %arg4[%c0_6, %c0_7], %8 {strides = array<i32>} : memref<96x64xbf16, #tpu.memory_space<vmem>>, vector<96x64xbf16>,
    return
  }
  func.func @transform_0(%arg0: i32) -> (i32, i32) {
    %c0_i32 = arith.constant 0 : i32
    %c0_i32_0 = arith.constant 0 : i32
    return %arg0, %c0_i32 : i32, i32
  }
  func.func @transform_1(%arg0: i32) -> (i32, i32) {
    %c0_i32 = arith.constant 0 : i32
    %c0_i32_0 = arith.constant 0 : i32
    %c0_i32_1 = arith.constant 0 : i32
    return %c0_i32, %c0_i32_0 : i32, i32
  }
  func.func @transform_2(%arg0: i32) -> (i32, i32) {
    %c0_i32 = arith.constant 0 : i32
    %c0_i32_0 = arith.constant 0 : i32
    %c0_i32_1 = arith.constant 0 : i32
    return %c0_i32, %c0_i32_0 : i32, i32
  }
  func.func @transform_3(%arg0: i32) -> (i32, i32) {
    %c0_i32 = arith.constant 0 : i32
    %c0_i32_0 = arith.constant 0 : i32
    return %arg0, %c0_i32 : i32, i32
  }
}

module attributes {stable_mosaic.version = 11 : i64} {
  func.func @_conv_bias_relu_kernel(%arg0: i32, %arg1: memref<64x576xbf16, #tpu.memory_space<vmem>>, %arg2: memref<576x64xbf16, #tpu.memory_space<vmem>>, %arg3: memref<1x64xf32, #tpu.memory_space<vmem>>, %arg4: memref<64x64xbf16, #tpu.memory_space<vmem>>) attributes {dimension_semantics = [#tpu.dimension_semantics<parallel>], iteration_bounds = array<i64: 2>, scalar_prefetch = 0 : i64, scratch_operands = 0 : i64, tpu.core_type = #tpu.core_type<tc>, window_params = [{transform_indices = @transform_0, window_bounds = array<i64: 64, 576>}, {pipeline_mode = #tpu.pipeline_mode<synchronous>, transform_indices = @transform_1, window_bounds = array<i64: 576, 64>}, {pipeline_mode = #tpu.pipeline_mode<synchronous>, transform_indices = @transform_2, window_bounds = array<i64: 1, 64>}, {transform_indices = @transform_3, window_bounds = array<i64: 64, 64>}]} {
    %c0 = arith.constant 0 : index
    %c0_0 = arith.constant 0 : index
    %0 = vector.load %arg1[%c0, %c0_0] : memref<64x576xbf16, #tpu.memory_space<vmem>>, vector<64x576xbf16>
    %c0_1 = arith.constant 0 : index
    %c0_2 = arith.constant 0 : index
    %1 = vector.load %arg2[%c0_1, %c0_2] : memref<576x64xbf16, #tpu.memory_space<vmem>>, vector<576x64xbf16>
    %cst = arith.constant dense<0.000000e+00> : vector<64x64xf32>
    %2 = tpu.matmul %0, %1, %cst {dimension_numbers = #tpu.dot_dimension_numbers<[1], [0], [0], [1], [0, 0, 1, 1], [], []>} : vector<64x576xbf16>, vector<576x64xbf16>, vector<64x64xf32> -> vector<64x64xf32>
    %c0_3 = arith.constant 0 : index
    %c0_4 = arith.constant 0 : index
    %3 = vector.load %arg3[%c0_3, %c0_4] : memref<1x64xf32, #tpu.memory_space<vmem>>, vector<1x64xf32>
    %4 = vector.broadcast %3 : vector<1x64xf32> to vector<64x64xf32>
    %5 = arith.addf %2, %4 : vector<64x64xf32>
    %cst_5 = arith.constant 0.000000e+00 : f32
    %6 = vector.broadcast %cst_5 : f32 to vector<64x64xf32>
    %7 = arith.maximumf %5, %6 : vector<64x64xf32>
    %8 = arith.truncf %7 : vector<64x64xf32> to vector<64x64xbf16>
    %c0_6 = arith.constant 0 : index
    %c0_7 = arith.constant 0 : index
    %9 = vector.load %arg4[%c0_6, %c0_7] : memref<64x64xbf16, #tpu.memory_space<vmem>>, vector<64x64xbf16>
    tpu.vector_store %arg4[%c0_6, %c0_7], %8 {strides = array<i32>} : memref<64x64xbf16, #tpu.memory_space<vmem>>, vector<64x64xbf16>,
    return
  }
  func.func @transform_0(%arg0: i32) -> (i32, i32) {
    %c0_i32 = arith.constant 0 : i32
    %c0_i32_0 = arith.constant 0 : i32
    return %arg0, %c0_i32 : i32, i32
  }
  func.func @transform_1(%arg0: i32) -> (i32, i32) {
    %c0_i32 = arith.constant 0 : i32
    %c0_i32_0 = arith.constant 0 : i32
    %c0_i32_1 = arith.constant 0 : i32
    return %c0_i32, %c0_i32_0 : i32, i32
  }
  func.func @transform_2(%arg0: i32) -> (i32, i32) {
    %c0_i32 = arith.constant 0 : i32
    %c0_i32_0 = arith.constant 0 : i32
    %c0_i32_1 = arith.constant 0 : i32
    return %c0_i32, %c0_i32_0 : i32, i32
  }
  func.func @transform_3(%arg0: i32) -> (i32, i32) {
    %c0_i32 = arith.constant 0 : i32
    %c0_i32_0 = arith.constant 0 : i32
    return %arg0, %c0_i32 : i32, i32
  }
}

module attributes {stable_mosaic.version = 11 : i64} {
  func.func @_mlp_kernel(%arg0: i32, %arg1: memref<16x3136xbf16, #tpu.memory_space<vmem>>, %arg2: memref<3136x512xbf16, #tpu.memory_space<vmem>>, %arg3: memref<1x512xf32, #tpu.memory_space<vmem>>, %arg4: memref<512x14xbf16, #tpu.memory_space<vmem>>, %arg5: memref<1x14xf32, #tpu.memory_space<vmem>>, %arg6: memref<16x14xf32, #tpu.memory_space<vmem>>) attributes {dimension_semantics = [#tpu.dimension_semantics<parallel>], iteration_bounds = array<i64: 1>, scalar_prefetch = 0 : i64, scratch_operands = 0 : i64, tpu.core_type = #tpu.core_type<tc>, window_params = [{transform_indices = @transform_0, window_bounds = array<i64: 16, 3136>}, {pipeline_mode = #tpu.pipeline_mode<synchronous>, transform_indices = @transform_1, window_bounds = array<i64: 3136, 512>}, {pipeline_mode = #tpu.pipeline_mode<synchronous>, transform_indices = @transform_2, window_bounds = array<i64: 1, 512>}, {pipeline_mode = #tpu.pipeline_mode<synchronous>, transform_indices = @transform_3, window_bounds = array<i64: 512, 14>}, {pipeline_mode = #tpu.pipeline_mode<synchronous>, transform_indices = @transform_4, window_bounds = array<i64: 1, 14>}, {transform_indices = @transform_5, window_bounds = array<i64: 16, 14>}]} {
    %c0 = arith.constant 0 : index
    %c0_0 = arith.constant 0 : index
    %0 = vector.load %arg1[%c0, %c0_0] : memref<16x3136xbf16, #tpu.memory_space<vmem>>, vector<16x3136xbf16>
    %c0_1 = arith.constant 0 : index
    %c0_2 = arith.constant 0 : index
    %1 = vector.load %arg2[%c0_1, %c0_2] : memref<3136x512xbf16, #tpu.memory_space<vmem>>, vector<3136x512xbf16>
    %cst = arith.constant dense<0.000000e+00> : vector<16x512xf32>
    %2 = tpu.matmul %0, %1, %cst {dimension_numbers = #tpu.dot_dimension_numbers<[1], [0], [0], [1], [0, 0, 1, 1], [], []>} : vector<16x3136xbf16>, vector<3136x512xbf16>, vector<16x512xf32> -> vector<16x512xf32>
    %c0_3 = arith.constant 0 : index
    %c0_4 = arith.constant 0 : index
    %3 = vector.load %arg3[%c0_3, %c0_4] : memref<1x512xf32, #tpu.memory_space<vmem>>, vector<1x512xf32>
    %4 = vector.broadcast %3 : vector<1x512xf32> to vector<16x512xf32>
    %5 = arith.addf %2, %4 : vector<16x512xf32>
    %cst_5 = arith.constant 0.000000e+00 : f32
    %6 = vector.broadcast %cst_5 : f32 to vector<16x512xf32>
    %7 = arith.maximumf %5, %6 : vector<16x512xf32>
    %8 = arith.truncf %7 : vector<16x512xf32> to vector<16x512xbf16>
    %c0_6 = arith.constant 0 : index
    %c0_7 = arith.constant 0 : index
    %9 = vector.load %arg4[%c0_6, %c0_7] : memref<512x14xbf16, #tpu.memory_space<vmem>>, vector<512x14xbf16>
    %cst_8 = arith.constant dense<0.000000e+00> : vector<16x14xf32>
    %10 = tpu.matmul %8, %9, %cst_8 {dimension_numbers = #tpu.dot_dimension_numbers<[1], [0], [0], [1], [0, 0, 1, 1], [], []>} : vector<16x512xbf16>, vector<512x14xbf16>, vector<16x14xf32> -> vector<16x14xf32>
    %c0_9 = arith.constant 0 : index
    %c0_10 = arith.constant 0 : index
    %11 = vector.load %arg5[%c0_9, %c0_10] : memref<1x14xf32, #tpu.memory_space<vmem>>, vector<1x14xf32>
    %12 = vector.broadcast %11 : vector<1x14xf32> to vector<16x14xf32>
    %13 = arith.addf %10, %12 : vector<16x14xf32>
    %c0_11 = arith.constant 0 : index
    %c0_12 = arith.constant 0 : index
    %14 = vector.load %arg6[%c0_11, %c0_12] : memref<16x14xf32, #tpu.memory_space<vmem>>, vector<16x14xf32>
    tpu.vector_store %arg6[%c0_11, %c0_12], %13 {strides = array<i32>} : memref<16x14xf32, #tpu.memory_space<vmem>>, vector<16x14xf32>,
    return
  }
  func.func @transform_0(%arg0: i32) -> (i32, i32) {
    %c0_i32 = arith.constant 0 : i32
    %c0_i32_0 = arith.constant 0 : i32
    return %arg0, %c0_i32 : i32, i32
  }
  func.func @transform_1(%arg0: i32) -> (i32, i32) {
    %c0_i32 = arith.constant 0 : i32
    %c0_i32_0 = arith.constant 0 : i32
    %c0_i32_1 = arith.constant 0 : i32
    return %c0_i32, %c0_i32_0 : i32, i32
  }
  func.func @transform_2(%arg0: i32) -> (i32, i32) {
    %c0_i32 = arith.constant 0 : i32
    %c0_i32_0 = arith.constant 0 : i32
    %c0_i32_1 = arith.constant 0 : i32
    return %c0_i32, %c0_i32_0 : i32, i32
  }
  func.func @transform_3(%arg0: i32) -> (i32, i32) {
    %c0_i32 = arith.constant 0 : i32
    %c0_i32_0 = arith.constant 0 : i32
    %c0_i32_1 = arith.constant 0 : i32
    return %c0_i32, %c0_i32_0 : i32, i32
  }
  func.func @transform_4(%arg0: i32) -> (i32, i32) {
    %c0_i32 = arith.constant 0 : i32
    %c0_i32_0 = arith.constant 0 : i32
    %c0_i32_1 = arith.constant 0 : i32
    return %c0_i32, %c0_i32_0 : i32, i32
  }
  func.func @transform_5(%arg0: i32) -> (i32, i32) {
    %c0_i32 = arith.constant 0 : i32
    %c0_i32_0 = arith.constant 0 : i32
    return %arg0, %c0_i32 : i32, i32
  }
}

</mosaic_0001>

<bundles_post_ra>
// kernel: dqn_forward.4
= control target key start
LH: loop header
LB: loop body
LE: loop exit
PB: predicated region body
PF: predicated region fallthrough
CT: control target
= control target key end

     0   :  { %s1542_s12 = smov 0   ;;  %s1852_s0 = inlined_call_operand.vmem [shape: bf16[800,256], index: 0, kind: input, shape index: {}]   ;;  %s1853_s1 = inlined_call_operand.vmem [shape: bf16[256,32], index: 1, kind: input, shape index: {}]   ;;  %s1854_s2 = inlined_call_operand.vmem [shape: f32[1,32], index: 2, kind: input, shape index: {}]   ;;  %s1855_s3 = inlined_call_operand.vmem [shape: bf16[800,32], index: 3, kind: output, shape index: {}]  }
   0x1 LB: > { %s1203_s13 = sadd.s32 4294967295, %s1519_s12   ;;  %p1207_p0 = scmp.ge.s32.totalorder %s1519_s12, 1  ;;  %s1519_s12 = sphi %s1542_s12, %s13_s12  }
   0x2   : > { %p139_p1 = scmp.lt.s32.totalorder %s1519_s12, 3 }
   0x4   : > { %p140_p2 = pnand %p1207_p0, %p139_p1 }
   0x5   : > { %v1422_v0 = vld [vmem:[%s1853_s1] sm:$0xff] (!%p140_p2)   ;;  %v1521_v1 = vmov (!%p140_p2), 0   ;;  %s164_s16 = smul.u32 (!%p140_p2), 50, %s1203_s13  ;;  %v1423_v2 = vld [vmem:[%s1853_s1 + $0x8] sm:$0xff] (!%p140_p2)   ;;  %v1424_v3 = vld [vmem:[%s1853_s1 + $0x10] sm:$0xff] (!%p140_p2)   ;;  %vm1096_vm0 = vcmask (!%p140_p2), 257024  }
   0x6   : > { %143 = sbr.rel (%p140_p2) target bundleno = 387 (0x183), region = 32  ;;  %613 = vmatprep.subr.bf16.mxu0 (!%p140_p2), %v1521_v1  ;;  %1381 = vmatprep.subr.bf16.mxu1 (!%p140_p2), %v1521_v1  ;;  %v1425_v4 = vld [vmem:[%s1853_s1 + $0x18] sm:$0xff] (!%p140_p2)   ;;  %v1426_v5 = vld [vmem:[%s1853_s1 + $0x20] sm:$0xff] (!%p140_p2)   ;;  %v1427_v7 = vld [vmem:[%s1853_s1 + $0x28] sm:$0xff] (!%p140_p2)  }
   0x7   : > { %614 = vmatpush1.bf16.msra.mxu0 (!%p140_p2), %v1422_v0  ;;  %1397 = vmatpush1.bf16.msra.mxu1 (!%p140_p2), %v1422_v0  ;;  %p165_p3 = scmp.lt.s32.totalorder (!%p140_p2), %s164_s16, 99  ;;  %v1428_v9 = vld [vmem:[%s1853_s1 + $0x30] sm:$0xff] (!%p140_p2)   ;;  %v1429_v10 = vld [vmem:[%s1853_s1 + $0x38] sm:$0xff] (!%p140_p2)   ;;  %v1430_v11 = vld [vmem:[%s1853_s1 + $0x40] sm:$0xff] (!%p140_p2)  }
   0x8   : > { %615 = vmatprep.subr.bf16.mxu0 (!%p140_p2), %v1521_v1  ;;  %1382 = vmatprep.subr.bf16.mxu1 (!%p140_p2), %v1521_v1  ;;  %v1431_v12 = vld [vmem:[%s1853_s1 + $0x48] sm:$0xff] (!%p140_p2)   ;;  %v1432_v13 = vld [vmem:[%s1853_s1 + $0x50] sm:$0xff] (!%p140_p2)   ;;  %v1433_v14 = vld [vmem:[%s1853_s1 + $0x58] sm:$0xff] (!%p140_p2)  }
   0x9   : > { %v1434_v15 = vld [vmem:[%s1853_s1 + $0x60] sm:$0xff] (!%p140_p2)   ;;  %v1435_v16 = vld [vmem:[%s1853_s1 + $0x68] sm:$0xff] (!%p140_p2)   ;;  %v1436_v17 = vld [vmem:[%s1853_s1 + $0x70] sm:$0xff] (!%p140_p2)  }
   0xa   : > { %v1437_v18 = vld [vmem:[%s1853_s1 + $0x78] sm:$0xff] (!%p140_p2)  }
   0xb   : > { %616 = vmatpush1.bf16.msra.mxu0 (!%p140_p2), %v1423_v2  ;;  %1398 = vmatpush1.bf16.msra.mxu1 (!%p140_p2), %v1423_v2 }
   0xc   : > { %617 = vmatprep.subr.bf16.mxu0 (!%p140_p2), %v1521_v1  ;;  %1383 = vmatprep.subr.bf16.mxu1 (!%p140_p2), %v1521_v1 }
   0xd   : > { %s1857_s16 = smov (!%p165_p3, %s164_s16), 99 }
   0xe   : > { %s1330_s23 = sshll.u32 %s1857_s16, 3  ;;  %s1210_s29 = sshll.u32 %s1857_s16, 2 }
   0xf   : > { %618 = vmatpush1.bf16.msra.mxu0 %v1424_v3  ;;  %1399 = vmatpush1.bf16.msra.mxu1 %v1424_v3  ;;  %s1579_s28 = scalar_lea.vmem %s1852_s0, %s1330_s23  ;;  %v1691_v3 = vld [vmem:[%s1854_s2] ss:$0 sm:$0xff]  ;;  %s1701_s16 = scalar_lea.vmem %s1855_s3, %s1210_s29 }
  0x10   : > { %619 = vmatprep.subr.bf16.mxu0 %v1521_v1  ;;  %1384 = vmatprep.subr.bf16.mxu1 %v1521_v1  ;;  %v1440_v6 = vld [vmem:[%s1579_s28 + $0x4] ss:$8 sps:$4 sm:$0xff]   ;;  %v1443_v8 = vld [vmem:[%s1579_s28 + $0xd4] ss:$8 sps:$4 sm:$0xff]   ;;  %v1438_v19 = vld [vmem:[%s1579_s28] ss:$8 sps:$4 sm:$0xff]  }
  0x11   : > { %645 = vmatprep.mubr.bf16.mxu0 %v1440_v6  ;;  %749 = vmatprep.mubr.bf16.mxu1 %v1443_v8  ;;  %v1441_v20 = vld [vmem:[%s1579_s28 + $0xd0] ss:$8 sps:$4 sm:$0xff]   ;;  %v1444_v21 = vld [vmem:[%s1579_s28 + $0x14] ss:$8 sps:$4 sm:$0xff]   ;;  %v1447_v22 = vld [vmem:[%s1579_s28 + $0xe4] ss:$8 sps:$4 sm:$0xff]  }
  0x12   : > { %v1446_v23 = vld [vmem:[%s1579_s28 + $0x10] ss:$8 sps:$4 sm:$0xff]   ;;  %v1449_v24 = vld [vmem:[%s1579_s28 + $0xe0] ss:$8 sps:$4 sm:$0xff]   ;;  %v1450_v25 = vld [vmem:[%s1579_s28 + $0x24] ss:$8 sps:$4 sm:$0xff]  }
  0x13   : > { %620 = vmatpush1.bf16.msra.mxu0 %v1425_v4  ;;  %1400 = vmatpush1.bf16.msra.mxu1 %v1425_v4  ;;  %v1453_v26 = vld [vmem:[%s1579_s28 + $0xf4] ss:$8 sps:$4 sm:$0xff]   ;;  %v1452_v27 = vld [vmem:[%s1579_s28 + $0x20] ss:$8 sps:$4 sm:$0xff]   ;;  %v1455_v28 = vld [vmem:[%s1579_s28 + $0xf0] ss:$8 sps:$4 sm:$0xff]  }
  0x14   : > { %621 = vmatprep.subr.bf16.mxu0 %v1521_v1  ;;  %1385 = vmatprep.subr.bf16.mxu1 %v1521_v1  ;;  %v1456_v29 = vld [vmem:[%s1579_s28 + $0x34] ss:$8 sps:$4 sm:$0xff]   ;;  %v1459_v30 = vld [vmem:[%s1579_s28 + $0x104] ss:$8 sps:$4 sm:$0xff]   ;;  %v1458_v31 = vld [vmem:[%s1579_s28 + $0x30] ss:$8 sps:$4 sm:$0xff]  }
  0x15   : > { %v1461_v32 = vld [vmem:[%s1579_s28 + $0x100] ss:$8 sps:$4 sm:$0xff]   ;;  %v1462_v33 = vld [vmem:[%s1579_s28 + $0x44] ss:$8 sps:$4 sm:$0xff]   ;;  %v1465_v34 = vld [vmem:[%s1579_s28 + $0x114] ss:$8 sps:$4 sm:$0xff]  }
  0x16   : > { %v1464_v35 = vld [vmem:[%s1579_s28 + $0x40] ss:$8 sps:$4 sm:$0xff]   ;;  %v1467_v36 = vld [vmem:[%s1579_s28 + $0x110] ss:$8 sps:$4 sm:$0xff]   ;;  %v1468_v37 = vld [vmem:[%s1579_s28 + $0x54] ss:$8 sps:$4 sm:$0xff]  }
  0x17   : > { %622 = vmatpush1.bf16.msra.mxu0 %v1426_v5  ;;  %1401 = vmatpush1.bf16.msra.mxu1 %v1426_v5  ;;  %v1471_v38 = vld [vmem:[%s1579_s28 + $0x124] ss:$8 sps:$4 sm:$0xff]   ;;  %v1470_v39 = vld [vmem:[%s1579_s28 + $0x50] ss:$8 sps:$4 sm:$0xff]   ;;  %v1473_v40 = vld [vmem:[%s1579_s28 + $0x120] ss:$8 sps:$4 sm:$0xff]  }
  0x18   : > { %623 = vmatprep.subr.bf16.mxu0 %v1521_v1  ;;  %1386 = vmatprep.subr.bf16.mxu1 %v1521_v1  ;;  %v1474_v41 = vld [vmem:[%s1579_s28 + $0x64] ss:$8 sps:$4 sm:$0xff]   ;;  %v1477_v42 = vld [vmem:[%s1579_s28 + $0x134] ss:$8 sps:$4 sm:$0xff]   ;;  %v1476_v43 = vld [vmem:[%s1579_s28 + $0x60] ss:$8 sps:$4 sm:$0xff]  }
  0x19   : > { %v1479_v44 = vld [vmem:[%s1579_s28 + $0x130] ss:$8 sps:$4 sm:$0xff]   ;;  %v1480_v45 = vld [vmem:[%s1579_s28 + $0x74] ss:$8 sps:$4 sm:$0xff]   ;;  %v1483_v46 = vld [vmem:[%s1579_s28 + $0x144] ss:$8 sps:$4 sm:$0xff]  }
  0x1a   : > { %v1482_v47 = vld [vmem:[%s1579_s28 + $0x70] ss:$8 sps:$4 sm:$0xff]   ;;  %v1485_v48 = vld [vmem:[%s1579_s28 + $0x140] ss:$8 sps:$4 sm:$0xff]   ;;  %v1486_v49 = vld [vmem:[%s1579_s28 + $0x84] ss:$8 sps:$4 sm:$0xff]  }
  0x1b   : > { %624 = vmatpush1.bf16.msra.mxu0 %v1427_v7  ;;  %1402 = vmatpush1.bf16.msra.mxu1 %v1427_v7  ;;  %v1489_v50 = vld [vmem:[%s1579_s28 + $0x154] ss:$8 sps:$4 sm:$0xff]   ;;  %v1488_v51 = vld [vmem:[%s1579_s28 + $0x80] ss:$8 sps:$4 sm:$0xff]   ;;  %v1491_v52 = vld [vmem:[%s1579_s28 + $0x150] ss:$8 sps:$4 sm:$0xff]  }
  0x1c   : > { %625 = vmatprep.subr.bf16.mxu0 %v1521_v1  ;;  %1387 = vmatprep.subr.bf16.mxu1 %v1521_v1  ;;  %v1492_v53 = vld [vmem:[%s1579_s28 + $0x94] ss:$8 sps:$4 sm:$0xff]   ;;  %v1495_v54 = vld [vmem:[%s1579_s28 + $0x164] ss:$8 sps:$4 sm:$0xff]   ;;  %v1494_v55 = vld [vmem:[%s1579_s28 + $0x90] ss:$8 sps:$4 sm:$0xff]  }
  0x1d   : > { %v1497_v56 = vld [vmem:[%s1579_s28 + $0x160] ss:$8 sps:$4 sm:$0xff]   ;;  %v1498_v57 = vld [vmem:[%s1579_s28 + $0xa4] ss:$8 sps:$4 sm:$0xff]   ;;  %v1501_v58 = vld [vmem:[%s1579_s28 + $0x174] ss:$8 sps:$4 sm:$0xff]  }
  0x1e   : > { %v1500_v59 = vld [vmem:[%s1579_s28 + $0xa0] ss:$8 sps:$4 sm:$0xff]   ;;  %v1503_v60 = vld [vmem:[%s1579_s28 + $0x170] ss:$8 sps:$4 sm:$0xff]   ;;  %v1504_v61 = vld [vmem:[%s1579_s28 + $0xb4] ss:$8 sps:$4 sm:$0xff]  }
  0x1f   : > { %626 = vmatpush1.bf16.msra.mxu0 %v1428_v9  ;;  %1403 = vmatpush1.bf16.msra.mxu1 %v1428_v9  ;;  %v1507_v62 = vld [vmem:[%s1579_s28 + $0x184] ss:$8 sps:$4 sm:$0xff]   ;;  %v1506_v63 = vld [vmem:[%s1579_s28 + $0xb0] ss:$8 sps:$4 sm:$0xff]   ;;  %v1509_v0 = vld [vmem:[%s1579_s28 + $0x180] ss:$8 sps:$4 sm:$0xff]  }
  0x20   : > { %627 = vmatprep.subr.bf16.mxu0 %v1521_v1  ;;  %1388 = vmatprep.subr.bf16.mxu1 %v1521_v1  ;;  %v1512_v2 = vld [vmem:[%s1579_s28 + $0xc0] ss:$8 sps:$4 sm:$0xff]  }
  0x23   : > { %628 = vmatpush1.bf16.msra.mxu0 %v1429_v10  ;;  %1404 = vmatpush1.bf16.msra.mxu1 %v1429_v10 }
  0x24   : > { %629 = vmatprep.subr.bf16.mxu0 %v1521_v1  ;;  %1389 = vmatprep.subr.bf16.mxu1 %v1521_v1 }
  0x27   : > { %630 = vmatpush1.bf16.msra.mxu0 %v1430_v11  ;;  %1405 = vmatpush1.bf16.msra.mxu1 %v1430_v11 }
  0x28   : > { %631 = vmatprep.subr.bf16.mxu0 %v1521_v1  ;;  %1390 = vmatprep.subr.bf16.mxu1 %v1521_v1 }
  0x2b   : > { %632 = vmatpush1.bf16.msra.mxu0 %v1431_v12  ;;  %1406 = vmatpush1.bf16.msra.mxu1 %v1431_v12 }
  0x2c   : > { %633 = vmatprep.subr.bf16.mxu0 %v1521_v1  ;;  %1391 = vmatprep.subr.bf16.mxu1 %v1521_v1 }
  0x2f   : > { %634 = vmatpush1.bf16.msra.mxu0 %v1432_v13  ;;  %1407 = vmatpush1.bf16.msra.mxu1 %v1432_v13 }
  0x30   : > { %635 = vmatprep.subr.bf16.mxu0 %v1521_v1  ;;  %1392 = vmatprep.subr.bf16.mxu1 %v1521_v1 }
  0x33   : > { %636 = vmatpush1.bf16.msra.mxu0 %v1433_v14  ;;  %1408 = vmatpush1.bf16.msra.mxu1 %v1433_v14 }
  0x34   : > { %637 = vmatprep.subr.bf16.mxu0 %v1521_v1  ;;  %1393 = vmatprep.subr.bf16.mxu1 %v1521_v1 }
  0x37   : > { %638 = vmatpush1.bf16.msra.mxu0 %v1434_v15  ;;  %1409 = vmatpush1.bf16.msra.mxu1 %v1434_v15 }
  0x38   : > { %639 = vmatprep.subr.bf16.mxu0 %v1521_v1  ;;  %1394 = vmatprep.subr.bf16.mxu1 %v1521_v1 }
  0x3b   : > { %640 = vmatpush1.bf16.msra.mxu0 %v1435_v16  ;;  %1410 = vmatpush1.bf16.msra.mxu1 %v1435_v16 }
  0x3c   : > { %641 = vmatprep.subr.bf16.mxu0 %v1521_v1  ;;  %1395 = vmatprep.subr.bf16.mxu1 %v1521_v1 }
  0x3f   : > { %642 = vmatpush1.bf16.msra.mxu0 %v1436_v17  ;;  %1411 = vmatpush1.bf16.msra.mxu1 %v1436_v17 }
  0x40   : > { %643 = vmatprep.subr.bf16.mxu0 %v1521_v1  ;;  %1396 = vmatprep.subr.bf16.mxu1 %v1521_v1  ;;  %v1510_v1 = vld [vmem:[%s1579_s28 + $0xc4] ss:$8 sps:$4 sm:$0xff]  }
  0x43   : > { %644 = vmatpush1.bf16.msra.mxu0 %v1437_v18  ;;  %1412 = vmatpush1.bf16.msra.mxu1 %v1437_v18 }
  0x46   : > { %646 = vmatmul.mubr.bf16.vlgmr.msra.gmra.mrb[0].mxu0 %v1438_v19  ;;  %750 = vmatmul.mubr.bf16.vlgmr.msra.gmra.mrb[0].mxu1 %v1441_v20 }
  0x47   : > { %653 = vmatprep.mubr.bf16.mxu0 %v1444_v21  ;;  %757 = vmatprep.mubr.bf16.mxu1 %v1447_v22 }
  0x4e   : > { %654 = vmatmul.mubr.bf16.gmra.mrb[4].mxu0 %v1446_v23  ;;  %758 = vmatmul.mubr.bf16.gmra.mrb[4].mxu1 %v1449_v24 }
  0x4f   : > { %661 = vmatprep.mubr.bf16.mxu0 %v1450_v25  ;;  %765 = vmatprep.mubr.bf16.mxu1 %v1453_v26 }
  0x56   : > { %662 = vmatmul.mubr.bf16.gmra.mrb[8].mxu0 %v1452_v27  ;;  %766 = vmatmul.mubr.bf16.gmra.mrb[8].mxu1 %v1455_v28 }
  0x57   : > { %669 = vmatprep.mubr.bf16.mxu0 %v1456_v29  ;;  %773 = vmatprep.mubr.bf16.mxu1 %v1459_v30 }
  0x5e   : > { %670 = vmatmul.mubr.bf16.gmra.mrb[12].mxu0 %v1458_v31  ;;  %774 = vmatmul.mubr.bf16.gmra.mrb[12].mxu1 %v1461_v32 }
  0x5f   : > { %677 = vmatprep.mubr.bf16.mxu0 %v1462_v33  ;;  %781 = vmatprep.mubr.bf16.mxu1 %v1465_v34 }
  0x66   : > { %678 = vmatmul.mubr.bf16.gmra.mrb[16].mxu0 %v1464_v35  ;;  %782 = vmatmul.mubr.bf16.gmra.mrb[16].mxu1 %v1467_v36 }
  0x67   : > { %685 = vmatprep.mubr.bf16.mxu0 %v1468_v37  ;;  %789 = vmatprep.mubr.bf16.mxu1 %v1471_v38 }
  0x6e   : > { %686 = vmatmul.mubr.bf16.gmra.mrb[20].mxu0 %v1470_v39  ;;  %790 = vmatmul.mubr.bf16.gmra.mrb[20].mxu1 %v1473_v40 }
  0x6f   : > { %693 = vmatprep.mubr.bf16.mxu0 %v1474_v41  ;;  %797 = vmatprep.mubr.bf16.mxu1 %v1477_v42 }
  0x76   : > { %694 = vmatmul.mubr.bf16.gmra.mrb[24].mxu0 %v1476_v43  ;;  %798 = vmatmul.mubr.bf16.gmra.mrb[24].mxu1 %v1479_v44 }
  0x77   : > { %701 = vmatprep.mubr.bf16.mxu0 %v1480_v45  ;;  %805 = vmatprep.mubr.bf16.mxu1 %v1483_v46 }
  0x7e   : > { %702 = vmatmul.mubr.bf16.gmra.mrb[28].mxu0 %v1482_v47  ;;  %806 = vmatmul.mubr.bf16.gmra.mrb[28].mxu1 %v1485_v48 }
  0x7f   : > { %709 = vmatprep.mubr.bf16.mxu0 %v1486_v49  ;;  %813 = vmatprep.mubr.bf16.mxu1 %v1489_v50 }
  0x86   : > { %710 = vmatmul.mubr.bf16.gmra.mrb[32].mxu0 %v1488_v51  ;;  %814 = vmatmul.mubr.bf16.gmra.mrb[32].mxu1 %v1491_v52 }
  0x87   : > { %717 = vmatprep.mubr.bf16.mxu0 %v1492_v53  ;;  %821 = vmatprep.mubr.bf16.mxu1 %v1495_v54 }
  0x8e   : > { %718 = vmatmul.mubr.bf16.gmra.mrb[36].mxu0 %v1494_v55  ;;  %822 = vmatmul.mubr.bf16.gmra.mrb[36].mxu1 %v1497_v56 }
  0x8f   : > { %725 = vmatprep.mubr.bf16.mxu0 %v1498_v57  ;;  %829 = vmatprep.mubr.bf16.mxu1 %v1501_v58 }
  0x96   : > { %726 = vmatmul.mubr.bf16.gmra.mrb[40].mxu0 %v1500_v59  ;;  %830 = vmatmul.mubr.bf16.gmra.mrb[40].mxu1 %v1503_v60 }
  0x97   : > { %733 = vmatprep.mubr.bf16.mxu0 %v1504_v61  ;;  %837 = vmatprep.mubr.bf16.mxu1 %v1507_v62 }
  0x9e   : > { %734 = vmatmul.mubr.bf16.gmra.mrb[44].mxu0 %v1506_v63  ;;  %838 = vmatmul.mubr.bf16.gmra.mrb[44].mxu1 %v1509_v0 }
  0x9f   : > { %741 = vmatprep.mubr.bf16.mxu0 %v1510_v1 }
  0xa6   : > { %742 = vmatmul.mubr.bf16.gmra.mrb[48].mxu0 %v1512_v2 }
 0x119   : > { %v647_v4 = vpop.f32.mrb[0].mxu0  ;;  %v751_v5 = vpop.f32.mrb[0].mxu1 }
 0x11a   : > { %v648_v6 = vadd.f32 %v1691_v3, %v647_v4  ;;  %v649_v7 = vpop.f32.mrb[1].mxu0  ;;  %v752_v8 = vadd.f32 %v1691_v3, %v751_v5  ;;  %v753_v9 = vpop.f32.mrb[1].mxu1 }
 0x11b   : > { %v650_v10 = vpop.f32.mrb[2].mxu0  ;;  %v754_v11 = vpop.f32.mrb[2].mxu1 }
 0x11c   : > { %v846_v12 = vmax.f32 %v648_v6, 0.0  ;;  %v651_v13 = vadd.f32 %v1691_v3, %v650_v10  ;;  %v652_v14 = vpop.f32.mrb[3].mxu0  ;;  %v872_v15 = vmax.f32 %v752_v8, 0.0  ;;  %v755_v16 = vadd.f32 %v1691_v3, %v754_v11  ;;  %v756_v17 = vpop.f32.mrb[3].mxu1 }
 0x11e   : > { %v1331_v18 = vpack.c.bf16 %v846_v12, %v846_v12  ;;  %v847_v19 = vmax.f32 %v651_v13, 0.0  ;;  %v1357_v20 = vpack.c.bf16 %v872_v15, %v872_v15  ;;  %v873_v21 = vmax.f32 %v755_v16, 0.0 }
 0x120   : > { %1097 = vst.msk [vmem:[%s1701_s16] sm:$0xf] %vm1096_vm0, %v1331_v18  ;;  %v1332_v22 = vpack.c.bf16 %v847_v19, %v847_v19  ;;  %1123 = vst.msk [vmem:[%s1701_s16 + $0x68] sm:$0xf] %vm1096_vm0, %v1357_v20  ;;  %v1358_v23 = vpack.c.bf16 %v873_v21, %v873_v21 }
 0x121   : > { %v655_v24 = vpop.f32.mrb[4].mxu0  ;;  %v759_v25 = vpop.f32.mrb[4].mxu1 }
 0x122   : > { %1098 = vst.msk [vmem:[%s1701_s16 + $0x4] sm:$0xf] %vm1096_vm0, %v1332_v22  ;;  %1124 = vst.msk [vmem:[%s1701_s16 + $0x6c] sm:$0xf] %vm1096_vm0, %v1358_v23  ;;  %v656_v26 = vadd.f32 %v1691_v3, %v655_v24  ;;  %v657_v27 = vpop.f32.mrb[5].mxu0  ;;  %v760_v28 = vadd.f32 %v1691_v3, %v759_v25  ;;  %v761_v29 = vpop.f32.mrb[5].mxu1 }
 0x123   : > { %v658_v30 = vpop.f32.mrb[6].mxu0  ;;  %v762_v31 = vpop.f32.mrb[6].mxu1 }
 0x124   : > { %v848_v32 = vmax.f32 %v656_v26, 0.0  ;;  %v659_v33 = vadd.f32 %v1691_v3, %v658_v30  ;;  %v660_v34 = vpop.f32.mrb[7].mxu0  ;;  %v874_v35 = vmax.f32 %v760_v28, 0.0  ;;  %v763_v36 = vadd.f32 %v1691_v3, %v762_v31  ;;  %v764_v37 = vpop.f32.mrb[7].mxu1 }
 0x126   : > { %v1333_v38 = vpack.c.bf16 %v848_v32, %v848_v32  ;;  %v849_v39 = vmax.f32 %v659_v33, 0.0  ;;  %v1359_v40 = vpack.c.bf16 %v874_v35, %v874_v35  ;;  %v875_v41 = vmax.f32 %v763_v36, 0.0 }
 0x128   : > { %1099 = vst.msk [vmem:[%s1701_s16 + $0x8] sm:$0xf] %vm1096_vm0, %v1333_v38  ;;  %v1334_v42 = vpack.c.bf16 %v849_v39, %v849_v39  ;;  %1125 = vst.msk [vmem:[%s1701_s16 + $0x70] sm:$0xf] %vm1096_vm0, %v1359_v40  ;;  %v1360_v43 = vpack.c.bf16 %v875_v41, %v875_v41 }
 0x129   : > { %v663_v44 = vpop.f32.mrb[8].mxu0  ;;  %v767_v45 = vpop.f32.mrb[8].mxu1 }
 0x12a   : > { %1100 = vst.msk [vmem:[%s1701_s16 + $0xc] sm:$0xf] %vm1096_vm0, %v1334_v42  ;;  %1126 = vst.msk [vmem:[%s1701_s16 + $0x74] sm:$0xf] %vm1096_vm0, %v1360_v43  ;;  %v664_v46 = vadd.f32 %v1691_v3, %v663_v44  ;;  %v665_v47 = vpop.f32.mrb[9].mxu0  ;;  %v768_v48 = vadd.f32 %v1691_v3, %v767_v45  ;;  %v769_v49 = vpop.f32.mrb[9].mxu1 }
 0x12b   : > { %v666_v50 = vpop.f32.mrb[10].mxu0  ;;  %v770_v51 = vpop.f32.mrb[10].mxu1 }
 0x12c   : > { %v850_v52 = vmax.f32 %v664_v46, 0.0  ;;  %v667_v53 = vadd.f32 %v1691_v3, %v666_v50  ;;  %v668_v54 = vpop.f32.mrb[11].mxu0  ;;  %v876_v55 = vmax.f32 %v768_v48, 0.0  ;;  %v771_v56 = vadd.f32 %v1691_v3, %v770_v51  ;;  %v772_v57 = vpop.f32.mrb[11].mxu1 }
 0x12e   : > { %v1335_v58 = vpack.c.bf16 %v850_v52, %v850_v52  ;;  %v851_v59 = vmax.f32 %v667_v53, 0.0  ;;  %v1361_v60 = vpack.c.bf16 %v876_v55, %v876_v55  ;;  %v877_v61 = vmax.f32 %v771_v56, 0.0 }
 0x130   : > { %1101 = vst.msk [vmem:[%s1701_s16 + $0x10] sm:$0xf] %vm1096_vm0, %v1335_v58  ;;  %v1336_v62 = vpack.c.bf16 %v851_v59, %v851_v59  ;;  %1127 = vst.msk [vmem:[%s1701_s16 + $0x78] sm:$0xf] %vm1096_vm0, %v1361_v60  ;;  %v1362_v63 = vpack.c.bf16 %v877_v61, %v877_v61 }
 0x131   : > { %v671_v0 = vpop.f32.mrb[12].mxu0  ;;  %v775_v1 = vpop.f32.mrb[12].mxu1 }
 0x132   : > { %1102 = vst.msk [vmem:[%s1701_s16 + $0x14] sm:$0xf] %vm1096_vm0, %v1336_v62  ;;  %1128 = vst.msk [vmem:[%s1701_s16 + $0x7c] sm:$0xf] %vm1096_vm0, %v1362_v63  ;;  %v672_v2 = vadd.f32 %v1691_v3, %v671_v0  ;;  %v673_v4 = vpop.f32.mrb[13].mxu0  ;;  %v776_v5 = vadd.f32 %v1691_v3, %v775_v1  ;;  %v777_v6 = vpop.f32.mrb[13].mxu1 }
 0x133   : > { %v674_v7 = vpop.f32.mrb[14].mxu0  ;;  %v778_v8 = vpop.f32.mrb[14].mxu1 }
 0x134   : > { %v852_v9 = vmax.f32 %v672_v2, 0.0  ;;  %v675_v10 = vadd.f32 %v1691_v3, %v674_v7  ;;  %v676_v11 = vpop.f32.mrb[15].mxu0  ;;  %v878_v12 = vmax.f32 %v776_v5, 0.0  ;;  %v779_v13 = vadd.f32 %v1691_v3, %v778_v8  ;;  %v780_v14 = vpop.f32.mrb[15].mxu1 }
 0x136   : > { %v1337_v15 = vpack.c.bf16 %v852_v9, %v852_v9  ;;  %v853_v16 = vmax.f32 %v675_v10, 0.0  ;;  %v1363_v17 = vpack.c.bf16 %v878_v12, %v878_v12  ;;  %v879_v18 = vmax.f32 %v779_v13, 0.0 }
 0x138   : > { %1103 = vst.msk [vmem:[%s1701_s16 + $0x18] sm:$0xf] %vm1096_vm0, %v1337_v15  ;;  %v1338_v19 = vpack.c.bf16 %v853_v16, %v853_v16  ;;  %1129 = vst.msk [vmem:[%s1701_s16 + $0x80] sm:$0xf] %vm1096_vm0, %v1363_v17  ;;  %v1364_v20 = vpack.c.bf16 %v879_v18, %v879_v18 }
 0x139   : > { %v679_v21 = vpop.f32.mrb[16].mxu0  ;;  %v783_v22 = vpop.f32.mrb[16].mxu1 }
 0x13a   : > { %1104 = vst.msk [vmem:[%s1701_s16 + $0x1c] sm:$0xf] %vm1096_vm0, %v1338_v19  ;;  %1130 = vst.msk [vmem:[%s1701_s16 + $0x84] sm:$0xf] %vm1096_vm0, %v1364_v20  ;;  %v680_v23 = vadd.f32 %v1691_v3, %v679_v21  ;;  %v681_v24 = vpop.f32.mrb[17].mxu0  ;;  %v784_v25 = vadd.f32 %v1691_v3, %v783_v22  ;;  %v785_v26 = vpop.f32.mrb[17].mxu1 }
 0x13b   : > { %v682_v27 = vpop.f32.mrb[18].mxu0  ;;  %v786_v28 = vpop.f32.mrb[18].mxu1 }
 0x13c   : > { %v854_v29 = vmax.f32 %v680_v23, 0.0  ;;  %v683_v30 = vadd.f32 %v1691_v3, %v682_v27  ;;  %v684_v31 = vpop.f32.mrb[19].mxu0  ;;  %v880_v32 = vmax.f32 %v784_v25, 0.0  ;;  %v787_v33 = vadd.f32 %v1691_v3, %v786_v28  ;;  %v788_v34 = vpop.f32.mrb[19].mxu1 }
 0x13e   : > { %v1339_v35 = vpack.c.bf16 %v854_v29, %v854_v29  ;;  %v855_v36 = vmax.f32 %v683_v30, 0.0  ;;  %v1365_v37 = vpack.c.bf16 %v880_v32, %v880_v32  ;;  %v881_v38 = vmax.f32 %v787_v33, 0.0 }
 0x140   : > { %1105 = vst.msk [vmem:[%s1701_s16 + $0x20] sm:$0xf] %vm1096_vm0, %v1339_v35  ;;  %v1340_v39 = vpack.c.bf16 %v855_v36, %v855_v36  ;;  %1131 = vst.msk [vmem:[%s1701_s16 + $0x88] sm:$0xf] %vm1096_vm0, %v1365_v37  ;;  %v1366_v40 = vpack.c.bf16 %v881_v38, %v881_v38 }
 0x141   : > { %v687_v41 = vpop.f32.mrb[20].mxu0  ;;  %v791_v42 = vpop.f32.mrb[20].mxu1 }
 0x142   : > { %1106 = vst.msk [vmem:[%s1701_s16 + $0x24] sm:$0xf] %vm1096_vm0, %v1340_v39  ;;  %1132 = vst.msk [vmem:[%s1701_s16 + $0x8c] sm:$0xf] %vm1096_vm0, %v1366_v40  ;;  %v688_v43 = vadd.f32 %v1691_v3, %v687_v41  ;;  %v689_v44 = vpop.f32.mrb[21].mxu0  ;;  %v792_v45 = vadd.f32 %v1691_v3, %v791_v42  ;;  %v793_v46 = vpop.f32.mrb[21].mxu1 }
 0x143   : > { %v690_v47 = vpop.f32.mrb[22].mxu0  ;;  %v794_v48 = vpop.f32.mrb[22].mxu1 }
 0x144   : > { %v856_v49 = vmax.f32 %v688_v43, 0.0  ;;  %v691_v50 = vadd.f32 %v1691_v3, %v690_v47  ;;  %v692_v51 = vpop.f32.mrb[23].mxu0  ;;  %v882_v52 = vmax.f32 %v792_v45, 0.0  ;;  %v795_v53 = vadd.f32 %v1691_v3, %v794_v48  ;;  %v796_v54 = vpop.f32.mrb[23].mxu1 }
 0x146   : > { %v1341_v55 = vpack.c.bf16 %v856_v49, %v856_v49  ;;  %v857_v56 = vmax.f32 %v691_v50, 0.0  ;;  %v1367_v57 = vpack.c.bf16 %v882_v52, %v882_v52  ;;  %v883_v58 = vmax.f32 %v795_v53, 0.0 }
 0x148   : > { %1107 = vst.msk [vmem:[%s1701_s16 + $0x28] sm:$0xf] %vm1096_vm0, %v1341_v55  ;;  %v1342_v59 = vpack.c.bf16 %v857_v56, %v857_v56  ;;  %1133 = vst.msk [vmem:[%s1701_s16 + $0x90] sm:$0xf] %vm1096_vm0, %v1367_v57  ;;  %v1368_v60 = vpack.c.bf16 %v883_v58, %v883_v58 }
 0x149   : > { %v695_v61 = vpop.f32.mrb[24].mxu0  ;;  %v799_v62 = vpop.f32.mrb[24].mxu1 }
 0x14a   : > { %1108 = vst.msk [vmem:[%s1701_s16 + $0x2c] sm:$0xf] %vm1096_vm0, %v1342_v59  ;;  %1134 = vst.msk [vmem:[%s1701_s16 + $0x94] sm:$0xf] %vm1096_vm0, %v1368_v60  ;;  %v696_v63 = vadd.f32 %v1691_v3, %v695_v61  ;;  %v697_v0 = vpop.f32.mrb[25].mxu0  ;;  %v800_v1 = vadd.f32 %v1691_v3, %v799_v62  ;;  %v801_v2 = vpop.f32.mrb[25].mxu1 }
 0x14b   : > { %v698_v4 = vpop.f32.mrb[26].mxu0  ;;  %v802_v5 = vpop.f32.mrb[26].mxu1 }
 0x14c   : > { %v858_v6 = vmax.f32 %v696_v63, 0.0  ;;  %v699_v7 = vadd.f32 %v1691_v3, %v698_v4  ;;  %v700_v8 = vpop.f32.mrb[27].mxu0  ;;  %v884_v9 = vmax.f32 %v800_v1, 0.0  ;;  %v803_v10 = vadd.f32 %v1691_v3, %v802_v5  ;;  %v804_v11 = vpop.f32.mrb[27].mxu1 }
 0x14e   : > { %v1343_v12 = vpack.c.bf16 %v858_v6, %v858_v6  ;;  %v859_v13 = vmax.f32 %v699_v7, 0.0  ;;  %v1369_v14 = vpack.c.bf16 %v884_v9, %v884_v9  ;;  %v885_v15 = vmax.f32 %v803_v10, 0.0 }
 0x150   : > { %1109 = vst.msk [vmem:[%s1701_s16 + $0x30] sm:$0xf] %vm1096_vm0, %v1343_v12  ;;  %v1344_v16 = vpack.c.bf16 %v859_v13, %v859_v13  ;;  %1135 = vst.msk [vmem:[%s1701_s16 + $0x98] sm:$0xf] %vm1096_vm0, %v1369_v14  ;;  %v1370_v17 = vpack.c.bf16 %v885_v15, %v885_v15 }
 0x151   : > { %v703_v18 = vpop.f32.mrb[28].mxu0  ;;  %v807_v19 = vpop.f32.mrb[28].mxu1 }
 0x152   : > { %1110 = vst.msk [vmem:[%s1701_s16 + $0x34] sm:$0xf] %vm1096_vm0, %v1344_v16  ;;  %1136 = vst.msk [vmem:[%s1701_s16 + $0x9c] sm:$0xf] %vm1096_vm0, %v1370_v17  ;;  %v704_v20 = vadd.f32 %v1691_v3, %v703_v18  ;;  %v705_v21 = vpop.f32.mrb[29].mxu0  ;;  %v808_v22 = vadd.f32 %v1691_v3, %v807_v19  ;;  %v809_v23 = vpop.f32.mrb[29].mxu1 }
 0x153   : > { %v706_v24 = vpop.f32.mrb[30].mxu0  ;;  %v810_v25 = vpop.f32.mrb[30].mxu1 }
 0x154   : > { %v860_v26 = vmax.f32 %v704_v20, 0.0  ;;  %v707_v27 = vadd.f32 %v1691_v3, %v706_v24  ;;  %v708_v28 = vpop.f32.mrb[31].mxu0  ;;  %v886_v29 = vmax.f32 %v808_v22, 0.0  ;;  %v811_v30 = vadd.f32 %v1691_v3, %v810_v25  ;;  %v812_v31 = vpop.f32.mrb[31].mxu1 }
 0x156   : > { %v1345_v32 = vpack.c.bf16 %v860_v26, %v860_v26  ;;  %v861_v33 = vmax.f32 %v707_v27, 0.0  ;;  %v1371_v34 = vpack.c.bf16 %v886_v29, %v886_v29  ;;  %v887_v35 = vmax.f32 %v811_v30, 0.0 }
 0x158   : > { %1111 = vst.msk [vmem:[%s1701_s16 + $0x38] sm:$0xf] %vm1096_vm0, %v1345_v32  ;;  %v1346_v36 = vpack.c.bf16 %v861_v33, %v861_v33  ;;  %1137 = vst.msk [vmem:[%s1701_s16 + $0xa0] sm:$0xf] %vm1096_vm0, %v1371_v34  ;;  %v1372_v37 = vpack.c.bf16 %v887_v35, %v887_v35 }
 0x159   : > { %v711_v38 = vpop.f32.mrb[32].mxu0  ;;  %v815_v39 = vpop.f32.mrb[32].mxu1 }
 0x15a   : > { %1112 = vst.msk [vmem:[%s1701_s16 + $0x3c] sm:$0xf] %vm1096_vm0, %v1346_v36  ;;  %1138 = vst.msk [vmem:[%s1701_s16 + $0xa4] sm:$0xf] %vm1096_vm0, %v1372_v37  ;;  %v712_v40 = vadd.f32 %v1691_v3, %v711_v38  ;;  %v713_v41 = vpop.f32.mrb[33].mxu0  ;;  %v816_v42 = vadd.f32 %v1691_v3, %v815_v39  ;;  %v817_v43 = vpop.f32.mrb[33].mxu1 }
 0x15b   : > { %v714_v44 = vpop.f32.mrb[34].mxu0  ;;  %v818_v45 = vpop.f32.mrb[34].mxu1 }
 0x15c   : > { %v862_v46 = vmax.f32 %v712_v40, 0.0  ;;  %v715_v47 = vadd.f32 %v1691_v3, %v714_v44  ;;  %v716_v48 = vpop.f32.mrb[35].mxu0  ;;  %v888_v49 = vmax.f32 %v816_v42, 0.0  ;;  %v819_v50 = vadd.f32 %v1691_v3, %v818_v45  ;;  %v820_v51 = vpop.f32.mrb[35].mxu1 }
 0x15e   : > { %v1347_v52 = vpack.c.bf16 %v862_v46, %v862_v46  ;;  %v863_v53 = vmax.f32 %v715_v47, 0.0  ;;  %v1373_v54 = vpack.c.bf16 %v888_v49, %v888_v49  ;;  %v889_v55 = vmax.f32 %v819_v50, 0.0 }
 0x160   : > { %1113 = vst.msk [vmem:[%s1701_s16 + $0x40] sm:$0xf] %vm1096_vm0, %v1347_v52  ;;  %v1348_v56 = vpack.c.bf16 %v863_v53, %v863_v53  ;;  %1139 = vst.msk [vmem:[%s1701_s16 + $0xa8] sm:$0xf] %vm1096_vm0, %v1373_v54  ;;  %v1374_v57 = vpack.c.bf16 %v889_v55, %v889_v55 }
 0x161   : > { %v719_v58 = vpop.f32.mrb[36].mxu0  ;;  %v823_v59 = vpop.f32.mrb[36].mxu1 }
 0x162   : > { %1114 = vst.msk [vmem:[%s1701_s16 + $0x44] sm:$0xf] %vm1096_vm0, %v1348_v56  ;;  %1140 = vst.msk [vmem:[%s1701_s16 + $0xac] sm:$0xf] %vm1096_vm0, %v1374_v57  ;;  %v720_v60 = vadd.f32 %v1691_v3, %v719_v58  ;;  %v721_v61 = vpop.f32.mrb[37].mxu0  ;;  %v824_v62 = vadd.f32 %v1691_v3, %v823_v59  ;;  %v825_v63 = vpop.f32.mrb[37].mxu1 }
 0x163   : > { %v722_v0 = vpop.f32.mrb[38].mxu0  ;;  %v826_v1 = vpop.f32.mrb[38].mxu1 }
 0x164   : > { %v864_v2 = vmax.f32 %v720_v60, 0.0  ;;  %v723_v4 = vadd.f32 %v1691_v3, %v722_v0  ;;  %v724_v5 = vpop.f32.mrb[39].mxu0  ;;  %v890_v6 = vmax.f32 %v824_v62, 0.0  ;;  %v827_v7 = vadd.f32 %v1691_v3, %v826_v1  ;;  %v828_v8 = vpop.f32.mrb[39].mxu1 }
 0x166   : > { %v1349_v9 = vpack.c.bf16 %v864_v2, %v864_v2  ;;  %v865_v10 = vmax.f32 %v723_v4, 0.0  ;;  %v1375_v11 = vpack.c.bf16 %v890_v6, %v890_v6  ;;  %v891_v12 = vmax.f32 %v827_v7, 0.0 }
 0x168   : > { %1115 = vst.msk [vmem:[%s1701_s16 + $0x48] sm:$0xf] %vm1096_vm0, %v1349_v9  ;;  %v1350_v13 = vpack.c.bf16 %v865_v10, %v865_v10  ;;  %1141 = vst.msk [vmem:[%s1701_s16 + $0xb0] sm:$0xf] %vm1096_vm0, %v1375_v11  ;;  %v1376_v14 = vpack.c.bf16 %v891_v12, %v891_v12 }
 0x169   : > { %v727_v15 = vpop.f32.mrb[40].mxu0  ;;  %v831_v16 = vpop.f32.mrb[40].mxu1 }
 0x16a   : > { %1116 = vst.msk [vmem:[%s1701_s16 + $0x4c] sm:$0xf] %vm1096_vm0, %v1350_v13  ;;  %1142 = vst.msk [vmem:[%s1701_s16 + $0xb4] sm:$0xf] %vm1096_vm0, %v1376_v14  ;;  %v728_v17 = vadd.f32 %v1691_v3, %v727_v15  ;;  %v729_v18 = vpop.f32.mrb[41].mxu0  ;;  %v832_v19 = vadd.f32 %v1691_v3, %v831_v16  ;;  %v833_v20 = vpop.f32.mrb[41].mxu1 }
 0x16b   : > { %v730_v21 = vpop.f32.mrb[42].mxu0  ;;  %v834_v22 = vpop.f32.mrb[42].mxu1 }
 0x16c   : > { %v866_v23 = vmax.f32 %v728_v17, 0.0  ;;  %v731_v24 = vadd.f32 %v1691_v3, %v730_v21  ;;  %v732_v25 = vpop.f32.mrb[43].mxu0  ;;  %v892_v26 = vmax.f32 %v832_v19, 0.0  ;;  %v835_v27 = vadd.f32 %v1691_v3, %v834_v22  ;;  %v836_v28 = vpop.f32.mrb[43].mxu1 }
 0x16e   : > { %v1351_v29 = vpack.c.bf16 %v866_v23, %v866_v23  ;;  %v867_v30 = vmax.f32 %v731_v24, 0.0  ;;  %v1377_v31 = vpack.c.bf16 %v892_v26, %v892_v26  ;;  %v893_v32 = vmax.f32 %v835_v27, 0.0 }
 0x170   : > { %1117 = vst.msk [vmem:[%s1701_s16 + $0x50] sm:$0xf] %vm1096_vm0, %v1351_v29  ;;  %v1352_v33 = vpack.c.bf16 %v867_v30, %v867_v30  ;;  %1143 = vst.msk [vmem:[%s1701_s16 + $0xb8] sm:$0xf] %vm1096_vm0, %v1377_v31  ;;  %v1378_v34 = vpack.c.bf16 %v893_v32, %v893_v32 }
 0x171   : > { %v735_v35 = vpop.f32.mrb[44].mxu0  ;;  %v839_v36 = vpop.f32.mrb[44].mxu1 }
 0x172   : > { %1118 = vst.msk [vmem:[%s1701_s16 + $0x54] sm:$0xf] %vm1096_vm0, %v1352_v33  ;;  %1144 = vst.msk [vmem:[%s1701_s16 + $0xbc] sm:$0xf] %vm1096_vm0, %v1378_v34  ;;  %v736_v37 = vadd.f32 %v1691_v3, %v735_v35  ;;  %v737_v38 = vpop.f32.mrb[45].mxu0  ;;  %v840_v39 = vadd.f32 %v1691_v3, %v839_v36  ;;  %v841_v40 = vpop.f32.mrb[45].mxu1 }
 0x173   : > { %v738_v41 = vpop.f32.mrb[46].mxu0  ;;  %v842_v42 = vpop.f32.mrb[46].mxu1 }
 0x174   : > { %v868_v43 = vmax.f32 %v736_v37, 0.0  ;;  %v739_v44 = vadd.f32 %v1691_v3, %v738_v41  ;;  %v740_v45 = vpop.f32.mrb[47].mxu0  ;;  %v894_v46 = vmax.f32 %v840_v39, 0.0  ;;  %v843_v47 = vadd.f32 %v1691_v3, %v842_v42  ;;  %v844_v48 = vpop.f32.mrb[47].mxu1 }
 0x176   : > { %v1353_v49 = vpack.c.bf16 %v868_v43, %v868_v43  ;;  %v869_v50 = vmax.f32 %v739_v44, 0.0  ;;  %v1379_v51 = vpack.c.bf16 %v894_v46, %v894_v46  ;;  %v895_v52 = vmax.f32 %v843_v47, 0.0 }
 0x178   : > { %1119 = vst.msk [vmem:[%s1701_s16 + $0x58] sm:$0xf] %vm1096_vm0, %v1353_v49  ;;  %v1354_v53 = vpack.c.bf16 %v869_v50, %v869_v50  ;;  %1145 = vst.msk [vmem:[%s1701_s16 + $0xc0] sm:$0xf] %vm1096_vm0, %v1379_v51  ;;  %v1380_v54 = vpack.c.bf16 %v895_v52, %v895_v52 }
 0x179   : > { %v743_v55 = vpop.f32.mrb[48].mxu0 }
 0x17a   : > { %1120 = vst.msk [vmem:[%s1701_s16 + $0x5c] sm:$0xf] %vm1096_vm0, %v1354_v53  ;;  %1146 = vst.msk [vmem:[%s1701_s16 + $0xc4] sm:$0xf] %vm1096_vm0, %v1380_v54  ;;  %v744_v56 = vadd.f32 %v1691_v3, %v743_v55  ;;  %v745_v57 = vpop.f32.mrb[49].mxu0 }
 0x17b   : > { %v746_v58 = vpop.f32.mrb[50].mxu0 }
 0x17c   : > { %v870_v59 = vmax.f32 %v744_v56, 0.0  ;;  %v747_v60 = vadd.f32 %v1691_v3, %v746_v58  ;;  %v748_v61 = vpop.f32.mrb[51].mxu0 }
 0x17e   : > { %v1355_v62 = vpack.c.bf16 %v870_v59, %v870_v59  ;;  %v871_v63 = vmax.f32 %v747_v60, 0.0 }
 0x180   : > { %1121 = vst.msk [vmem:[%s1701_s16 + $0x60] sm:$0xf] %vm1096_vm0, %v1355_v62  ;;  %v1356_v0 = vpack.c.bf16 %v871_v63, %v871_v63 }
 0x182   : > { %1122 = vst.msk [vmem:[%s1701_s16 + $0x64] sm:$0xf] %vm1096_vm0, %v1356_v0 }
 0x183 PF: > { %s13_s12 = sadd.s32 1, %s1519_s12  }
 0x184   : > { %p10_p4 = scmp.ge.s32.totalorder %s13_s12, 4  }
 0x186   :  { %12 = sbr.rel (!%p10_p4) target bundleno = 1 (0x1), region = 62 }

// kernel: dqn_forward.5
= control target key start
LH: loop header
LB: loop body
LE: loop exit
PB: predicated region body
PF: predicated region fallthrough
CT: control target
= control target key end

     0   :  { %s1176_s12 = smov 0   ;;  %s1364_s0 = inlined_call_operand.vmem [shape: bf16[192,512], index: 0, kind: input, shape index: {}]   ;;  %s1365_s1 = inlined_call_operand.vmem [shape: bf16[512,64], index: 1, kind: input, shape index: {}]   ;;  %s1366_s2 = inlined_call_operand.vmem [shape: f32[1,64], index: 2, kind: input, shape index: {}]   ;;  %s1367_s3 = inlined_call_operand.vmem [shape: bf16[192,64], index: 3, kind: output, shape index: {}]  }
   0x1 LB: > { %s876_s13 = sadd.s32 4294967295, %s1154_s12   ;;  %p880_p0 = scmp.ge.s32.totalorder %s1154_s12, 1  ;;  %s1154_s12 = sphi %s1176_s12, %s13_s12  }
   0x2   : > { %p139_p1 = scmp.lt.s32.totalorder %s1154_s12, 3 }
   0x4   : > { %p140_p2 = pnand %p880_p0, %p139_p1 }
   0x5   : > { %v1080_v0 = vld [vmem:[%s1365_s1 + $0x40] sm:$0xff] (!%p140_p2)   ;;  %v1084_v4 = vld [vmem:[%s1365_s1 + $0x48] sm:$0xff] (!%p140_p2)   ;;  %v1088_v8 = vld [vmem:[%s1365_s1 + $0x50] sm:$0xff] (!%p140_p2)   ;;  %s164_s19 = smul.u32 (!%p140_p2), 12, %s876_s13  ;;  %vm807_vm0 = vcmask (!%p140_p2), 519168  }
   0x6   : > { %143 = sbr.rel (%p140_p2) target bundleno = 305 (0x131), region = 32  ;;  %v1081_v1 = vld [vmem:[%s1365_s1 + $0xc0] sm:$0xff] (!%p140_p2)   ;;  %968 = vmatprep.subr.bf16.mxu0 (!%p140_p2), %v1080_v0  ;;  %v1085_v5 = vld [vmem:[%s1365_s1 + $0xc8] sm:$0xff] (!%p140_p2)   ;;  %v1089_v9 = vld [vmem:[%s1365_s1 + $0xd0] sm:$0xff] (!%p140_p2)  }
   0x7   : > { %v1082_v2 = vld [vmem:[%s1365_s1] sm:$0xff] (!%p140_p2)   ;;  %1020 = vmatprep.subr.bf16.mxu1 (!%p140_p2), %v1081_v1  ;;  %v1086_v6 = vld [vmem:[%s1365_s1 + $0x8] sm:$0xff] (!%p140_p2)   ;;  %v1090_v10 = vld [vmem:[%s1365_s1 + $0x10] sm:$0xff] (!%p140_p2)   ;;  %p165_p3 = scmp.lt.s32.totalorder (!%p140_p2), %s164_s19, 23 }
   0x8   : > { %v1083_v3 = vld [vmem:[%s1365_s1 + $0x80] sm:$0xff] (!%p140_p2)   ;;  %969 = vmatpush3.bf16.msra.mxu0 (!%p140_p2), %v1082_v2  ;;  %v1087_v7 = vld [vmem:[%s1365_s1 + $0x88] sm:$0xff] (!%p140_p2)   ;;  %v1091_v11 = vld [vmem:[%s1365_s1 + $0x90] sm:$0xff] (!%p140_p2)  }
   0x9   : > { %1021 = vmatpush3.bf16.msra.mxu1 (!%p140_p2), %v1083_v3  ;;  %970 = vmatprep.subr.bf16.mxu0 (!%p140_p2), %v1084_v4  ;;  %v1092_v12 = vld [vmem:[%s1365_s1 + $0x58] sm:$0xff] (!%p140_p2)   ;;  %v1096_v16 = vld [vmem:[%s1365_s1 + $0x60] sm:$0xff] (!%p140_p2)   ;;  %v1100_v20 = vld [vmem:[%s1365_s1 + $0x68] sm:$0xff] (!%p140_p2)  }
   0xa   : > { %1022 = vmatprep.subr.bf16.mxu1 (!%p140_p2), %v1085_v5  ;;  %v1093_v13 = vld [vmem:[%s1365_s1 + $0xd8] sm:$0xff] (!%p140_p2)   ;;  %v1097_v17 = vld [vmem:[%s1365_s1 + $0xe0] sm:$0xff] (!%p140_p2)   ;;  %v1101_v21 = vld [vmem:[%s1365_s1 + $0xe8] sm:$0xff] (!%p140_p2)  }
   0xb   : > { %v1094_v14 = vld [vmem:[%s1365_s1 + $0x18] sm:$0xff] (!%p140_p2)   ;;  %v1098_v18 = vld [vmem:[%s1365_s1 + $0x20] sm:$0xff] (!%p140_p2)   ;;  %v1102_v22 = vld [vmem:[%s1365_s1 + $0x28] sm:$0xff] (!%p140_p2)  }
   0xc   : > { %971 = vmatpush3.bf16.msra.mxu0 (!%p140_p2), %v1086_v6  ;;  %v1095_v15 = vld [vmem:[%s1365_s1 + $0x98] sm:$0xff] (!%p140_p2)   ;;  %v1099_v19 = vld [vmem:[%s1365_s1 + $0xa0] sm:$0xff] (!%p140_p2)   ;;  %v1103_v23 = vld [vmem:[%s1365_s1 + $0xa8] sm:$0xff] (!%p140_p2)  }
   0xd   : > { %1023 = vmatpush3.bf16.msra.mxu1 %v1087_v7  ;;  %972 = vmatprep.subr.bf16.mxu0 %v1088_v8  ;;  %s1369_s19 = smov (!%p165_p3, %s164_s19), 23  ;;  %v1104_v24 = vld [vmem:[%s1365_s1 + $0x70] sm:$0xff]   ;;  %v1108_v28 = vld [vmem:[%s1365_s1 + $0x78] sm:$0xff]   ;;  %v1317_v58 = vld [vmem:[%s1366_s2] ss:$0 sm:$0xff] }
   0xe   : > { %1024 = vmatprep.subr.bf16.mxu1 %v1089_v9  ;;  %v1105_v25 = vld [vmem:[%s1365_s1 + $0xf0] sm:$0xff]   ;;  %s955_s18 = sshll.u32 %s1369_s19, 4  ;;  %v1109_v29 = vld [vmem:[%s1365_s1 + $0xf8] sm:$0xff]   ;;  %s883_s7 = sshll.u32 %s1369_s19, 2 }
   0xf   : > { %v1106_v26 = vld [vmem:[%s1365_s1 + $0x30] sm:$0xff]   ;;  %s1282_s13 = scalar_lea.vmem %s1364_s0, %s955_s18  ;;  %v1110_v30 = vld [vmem:[%s1365_s1 + $0x38] sm:$0xff]   ;;  %s1325_s10 = scalar_lea.vmem %s1367_s3, %s883_s7 }
  0x10   : > { %973 = vmatpush3.bf16.msra.mxu0 %v1090_v10  ;;  %v1107_v27 = vld [vmem:[%s1365_s1 + $0xb0] sm:$0xff]   ;;  %v1111_v31 = vld [vmem:[%s1365_s1 + $0xb8] sm:$0xff]  }
  0x11   : > { %1025 = vmatpush3.bf16.msra.mxu1 %v1091_v11  ;;  %974 = vmatprep.subr.bf16.mxu0 %v1092_v12  ;;  %v1112_v32 = vld [vmem:[%s1282_s13] ss:$16 sps:$4 sm:$0xff]   ;;  %v1114_v33 = vld [vmem:[%s1282_s13 + $0x4] ss:$16 sps:$4 sm:$0xff]   ;;  %v1115_v34 = vld [vmem:[%s1282_s13 + $0x8] ss:$16 sps:$4 sm:$0xff]  }
  0x12   : > { %1026 = vmatprep.subr.bf16.mxu1 %v1093_v13  ;;  %v1117_v35 = vld [vmem:[%s1282_s13 + $0xc] ss:$16 sps:$4 sm:$0xff]   ;;  %617 = vmatprep.mubr.bf16.mxu0 %v1114_v33  ;;  %v1118_v36 = vld [vmem:[%s1282_s13 + $0x24] ss:$16 sps:$4 sm:$0xff]   ;;  %v1122_v38 = vld [vmem:[%s1282_s13 + $0x20] ss:$16 sps:$4 sm:$0xff]  }
  0x13   : > { %698 = vmatprep.mubr.bf16.mxu1 %v1117_v35  ;;  %v1120_v37 = vld [vmem:[%s1282_s13 + $0x2c] ss:$16 sps:$4 sm:$0xff]   ;;  %v1123_v39 = vld [vmem:[%s1282_s13 + $0x28] ss:$16 sps:$4 sm:$0xff]   ;;  %v1124_v40 = vld [vmem:[%s1282_s13 + $0x44] ss:$16 sps:$4 sm:$0xff]  }
  0x14   : > { %975 = vmatpush3.bf16.msra.mxu0 %v1094_v14  ;;  %v1126_v41 = vld [vmem:[%s1282_s13 + $0x4c] ss:$16 sps:$4 sm:$0xff]   ;;  %v1128_v42 = vld [vmem:[%s1282_s13 + $0x40] ss:$16 sps:$4 sm:$0xff]   ;;  %v1129_v43 = vld [vmem:[%s1282_s13 + $0x48] ss:$16 sps:$4 sm:$0xff]  }
  0x15   : > { %1027 = vmatpush3.bf16.msra.mxu1 %v1095_v15  ;;  %976 = vmatprep.subr.bf16.mxu0 %v1096_v16  ;;  %v1130_v44 = vld [vmem:[%s1282_s13 + $0x64] ss:$16 sps:$4 sm:$0xff]   ;;  %v1132_v45 = vld [vmem:[%s1282_s13 + $0x6c] ss:$16 sps:$4 sm:$0xff]   ;;  %v1134_v46 = vld [vmem:[%s1282_s13 + $0x60] ss:$16 sps:$4 sm:$0xff]  }
  0x16   : > { %1028 = vmatprep.subr.bf16.mxu1 %v1097_v17  ;;  %v1135_v47 = vld [vmem:[%s1282_s13 + $0x68] ss:$16 sps:$4 sm:$0xff]   ;;  %v1136_v48 = vld [vmem:[%s1282_s13 + $0x84] ss:$16 sps:$4 sm:$0xff]   ;;  %v1138_v49 = vld [vmem:[%s1282_s13 + $0x8c] ss:$16 sps:$4 sm:$0xff]  }
  0x17   : > { %v1140_v50 = vld [vmem:[%s1282_s13 + $0x80] ss:$16 sps:$4 sm:$0xff]   ;;  %v1141_v51 = vld [vmem:[%s1282_s13 + $0x88] ss:$16 sps:$4 sm:$0xff]   ;;  %v1142_v52 = vld [vmem:[%s1282_s13 + $0xa4] ss:$16 sps:$4 sm:$0xff]  }
  0x18   : > { %977 = vmatpush3.bf16.msra.mxu0 %v1098_v18  ;;  %v1144_v53 = vld [vmem:[%s1282_s13 + $0xac] ss:$16 sps:$4 sm:$0xff]   ;;  %v1146_v54 = vld [vmem:[%s1282_s13 + $0xa0] ss:$16 sps:$4 sm:$0xff]   ;;  %v1147_v55 = vld [vmem:[%s1282_s13 + $0xa8] ss:$16 sps:$4 sm:$0xff]  }
  0x19   : > { %1029 = vmatpush3.bf16.msra.mxu1 %v1099_v19  ;;  %978 = vmatprep.subr.bf16.mxu0 %v1100_v20 }
  0x1a   : > { %1030 = vmatprep.subr.bf16.mxu1 %v1101_v21 }
  0x1c   : > { %979 = vmatpush3.bf16.msra.mxu0 %v1102_v22 }
  0x1d   : > { %1031 = vmatpush3.bf16.msra.mxu1 %v1103_v23  ;;  %980 = vmatprep.subr.bf16.mxu0 %v1104_v24 }
  0x1e   : > { %1032 = vmatprep.subr.bf16.mxu1 %v1105_v25 }
  0x20   : > { %981 = vmatpush3.bf16.msra.mxu0 %v1106_v26 }
  0x21   : > { %1033 = vmatpush3.bf16.msra.mxu1 %v1107_v27  ;;  %982 = vmatprep.subr.bf16.mxu0 %v1108_v28 }
  0x22   : > { %1034 = vmatprep.subr.bf16.mxu1 %v1109_v29 }
  0x24   : > { %983 = vmatpush3.bf16.msra.mxu0 %v1110_v30 }
  0x25   : > { %1035 = vmatpush3.bf16.msra.mxu1 %v1111_v31 }
  0x27   : > { %618 = vmatmul.mubr.bf16.vlgmr.msra.gmra.mrb[0].mxu0 %v1112_v32 }
  0x28   : > { %699 = vmatmul.mubr.bf16.vlgmr.msra.gmra.mrb[0].mxu1 %v1115_v34  ;;  %625 = vmatprep.mubr.bf16.mxu0 %v1118_v36 }
  0x29   : > { %706 = vmatprep.mubr.bf16.mxu1 %v1120_v37 }
  0x2f   : > { %626 = vmatmul.mubr.bf16.gmra.mrb[4].mxu0 %v1122_v38 }
  0x30   : > { %707 = vmatmul.mubr.bf16.gmra.mrb[4].mxu1 %v1123_v39  ;;  %633 = vmatprep.mubr.bf16.mxu0 %v1124_v40 }
  0x31   : > { %714 = vmatprep.mubr.bf16.mxu1 %v1126_v41 }
  0x37   : > { %634 = vmatmul.mubr.bf16.gmra.mrb[8].mxu0 %v1128_v42 }
  0x38   : > { %715 = vmatmul.mubr.bf16.gmra.mrb[8].mxu1 %v1129_v43  ;;  %641 = vmatprep.mubr.bf16.mxu0 %v1130_v44 }
  0x39   : > { %722 = vmatprep.mubr.bf16.mxu1 %v1132_v45 }
  0x3f   : > { %642 = vmatmul.mubr.bf16.gmra.mrb[12].mxu0 %v1134_v46 }
  0x40   : > { %723 = vmatmul.mubr.bf16.gmra.mrb[12].mxu1 %v1135_v47  ;;  %649 = vmatprep.mubr.bf16.mxu0 %v1136_v48 }
  0x41   : > { %730 = vmatprep.mubr.bf16.mxu1 %v1138_v49 }
  0x47   : > { %650 = vmatmul.mubr.bf16.gmra.mrb[16].mxu0 %v1140_v50 }
  0x48   : > { %731 = vmatmul.mubr.bf16.gmra.mrb[16].mxu1 %v1141_v51  ;;  %657 = vmatprep.mubr.bf16.mxu0 %v1142_v52 }
  0x49   : > { %738 = vmatprep.mubr.bf16.mxu1 %v1144_v53 }
  0x4f   : > { %658 = vmatmul.mubr.bf16.gmra.mrb[20].mxu0 %v1146_v54 }
  0x50   : > { %739 = vmatmul.mubr.bf16.gmra.mrb[20].mxu1 %v1147_v55 }
  0xfa   : > { %v984_v56 = vpop.f32.mrb[0].mxu0 }
  0xfb   : > { %v1036_v57 = vpop.f32.mrb[0].mxu1  ;;  %v985_v59 = vpop.f32.mrb[1].mxu0 }
  0xfc   : > { %v986_v60 = vadd.f32 %v985_v59, %v984_v56  ;;  %v1037_v61 = vpop.f32.mrb[1].mxu1  ;;  %v987_v62 = vpop.f32.mrb[2].mxu0 }
  0xfd   : > { %v1038_v63 = vadd.f32 %v1037_v61, %v1036_v57  ;;  %v1039_v0 = vpop.f32.mrb[2].mxu1  ;;  %v988_v1 = vpop.f32.mrb[3].mxu0 }
  0xfe   : > { %v620_v2 = vadd.f32 %v986_v60, %v1317_v58  ;;  %v989_v3 = vadd.f32 %v988_v1, %v987_v62  ;;  %v1040_v4 = vpop.f32.mrb[3].mxu1 }
  0xff   : > { %v1041_v5 = vadd.f32 %v1040_v4, %v1039_v0 }
 0x100   : > { %v701_v6 = vadd.f32 %v1038_v63, %v620_v2  ;;  %v623_v7 = vadd.f32 %v989_v3, %v1317_v58 }
 0x102   : > { %v747_v8 = vmax.f32 %v701_v6, 0.0  ;;  %v704_v9 = vadd.f32 %v1041_v5, %v623_v7  ;;  %v990_v10 = vpop.f32.mrb[4].mxu0 }
 0x103   : > { %v1042_v11 = vpop.f32.mrb[4].mxu1  ;;  %v991_v12 = vpop.f32.mrb[5].mxu0 }
 0x104   : > { %v956_v13 = vpack.c.bf16 %v747_v8, %v747_v8  ;;  %v748_v14 = vmax.f32 %v704_v9, 0.0  ;;  %v992_v15 = vadd.f32 %v991_v12, %v990_v10  ;;  %v1043_v16 = vpop.f32.mrb[5].mxu1  ;;  %v993_v17 = vpop.f32.mrb[6].mxu0 }
 0x105   : > { %v1044_v18 = vadd.f32 %v1043_v16, %v1042_v11  ;;  %v1045_v19 = vpop.f32.mrb[6].mxu1  ;;  %v994_v20 = vpop.f32.mrb[7].mxu0 }
 0x106   : > { %808 = vst.msk [vmem:[%s1325_s10] sm:$0xf] %vm807_vm0, %v956_v13  ;;  %v957_v21 = vpack.c.bf16 %v748_v14, %v748_v14  ;;  %v628_v22 = vadd.f32 %v992_v15, %v1317_v58  ;;  %v995_v23 = vadd.f32 %v994_v20, %v993_v17  ;;  %v1046_v24 = vpop.f32.mrb[7].mxu1 }
 0x107   : > { %v1047_v25 = vadd.f32 %v1046_v24, %v1045_v19 }
 0x108   : > { %809 = vst.msk [vmem:[%s1325_s10 + $0x4] sm:$0xf] %vm807_vm0, %v957_v21  ;;  %v709_v26 = vadd.f32 %v1044_v18, %v628_v22  ;;  %v631_v27 = vadd.f32 %v995_v23, %v1317_v58 }
 0x10a   : > { %v749_v28 = vmax.f32 %v709_v26, 0.0  ;;  %v712_v29 = vadd.f32 %v1047_v25, %v631_v27  ;;  %v996_v30 = vpop.f32.mrb[8].mxu0 }
 0x10b   : > { %v1048_v31 = vpop.f32.mrb[8].mxu1  ;;  %v997_v32 = vpop.f32.mrb[9].mxu0 }
 0x10c   : > { %v958_v33 = vpack.c.bf16 %v749_v28, %v749_v28  ;;  %v750_v34 = vmax.f32 %v712_v29, 0.0  ;;  %v998_v35 = vadd.f32 %v997_v32, %v996_v30  ;;  %v1049_v36 = vpop.f32.mrb[9].mxu1  ;;  %v999_v37 = vpop.f32.mrb[10].mxu0 }
 0x10d   : > { %v1050_v38 = vadd.f32 %v1049_v36, %v1048_v31  ;;  %v1051_v39 = vpop.f32.mrb[10].mxu1  ;;  %v1000_v40 = vpop.f32.mrb[11].mxu0 }
 0x10e   : > { %810 = vst.msk [vmem:[%s1325_s10 + $0x8] sm:$0xf] %vm807_vm0, %v958_v33  ;;  %v959_v41 = vpack.c.bf16 %v750_v34, %v750_v34  ;;  %v636_v42 = vadd.f32 %v998_v35, %v1317_v58  ;;  %v1001_v43 = vadd.f32 %v1000_v40, %v999_v37  ;;  %v1052_v44 = vpop.f32.mrb[11].mxu1 }
 0x10f   : > { %v1053_v45 = vadd.f32 %v1052_v44, %v1051_v39 }
 0x110   : > { %811 = vst.msk [vmem:[%s1325_s10 + $0xc] sm:$0xf] %vm807_vm0, %v959_v41  ;;  %v717_v46 = vadd.f32 %v1050_v38, %v636_v42  ;;  %v639_v47 = vadd.f32 %v1001_v43, %v1317_v58 }
 0x112   : > { %v751_v48 = vmax.f32 %v717_v46, 0.0  ;;  %v720_v49 = vadd.f32 %v1053_v45, %v639_v47  ;;  %v1002_v50 = vpop.f32.mrb[12].mxu0 }
 0x113   : > { %v1054_v51 = vpop.f32.mrb[12].mxu1  ;;  %v1003_v52 = vpop.f32.mrb[13].mxu0 }
 0x114   : > { %v960_v53 = vpack.c.bf16 %v751_v48, %v751_v48  ;;  %v752_v54 = vmax.f32 %v720_v49, 0.0  ;;  %v1004_v55 = vadd.f32 %v1003_v52, %v1002_v50  ;;  %v1055_v56 = vpop.f32.mrb[13].mxu1  ;;  %v1005_v57 = vpop.f32.mrb[14].mxu0 }
 0x115   : > { %v1056_v59 = vadd.f32 %v1055_v56, %v1054_v51  ;;  %v1057_v60 = vpop.f32.mrb[14].mxu1  ;;  %v1006_v61 = vpop.f32.mrb[15].mxu0 }
 0x116   : > { %812 = vst.msk [vmem:[%s1325_s10 + $0x10] sm:$0xf] %vm807_vm0, %v960_v53  ;;  %v961_v62 = vpack.c.bf16 %v752_v54, %v752_v54  ;;  %v644_v63 = vadd.f32 %v1004_v55, %v1317_v58  ;;  %v1007_v0 = vadd.f32 %v1006_v61, %v1005_v57  ;;  %v1058_v1 = vpop.f32.mrb[15].mxu1 }
 0x117   : > { %v1059_v2 = vadd.f32 %v1058_v1, %v1057_v60 }
 0x118   : > { %813 = vst.msk [vmem:[%s1325_s10 + $0x14] sm:$0xf] %vm807_vm0, %v961_v62  ;;  %v725_v3 = vadd.f32 %v1056_v59, %v644_v63  ;;  %v647_v4 = vadd.f32 %v1007_v0, %v1317_v58 }
 0x11a   : > { %v753_v5 = vmax.f32 %v725_v3, 0.0  ;;  %v728_v6 = vadd.f32 %v1059_v2, %v647_v4  ;;  %v1008_v7 = vpop.f32.mrb[16].mxu0 }
 0x11b   : > { %v1060_v8 = vpop.f32.mrb[16].mxu1  ;;  %v1009_v9 = vpop.f32.mrb[17].mxu0 }
 0x11c   : > { %v962_v10 = vpack.c.bf16 %v753_v5, %v753_v5  ;;  %v754_v11 = vmax.f32 %v728_v6, 0.0  ;;  %v1010_v12 = vadd.f32 %v1009_v9, %v1008_v7  ;;  %v1061_v13 = vpop.f32.mrb[17].mxu1  ;;  %v1011_v14 = vpop.f32.mrb[18].mxu0 }
 0x11d   : > { %v1062_v15 = vadd.f32 %v1061_v13, %v1060_v8  ;;  %v1063_v16 = vpop.f32.mrb[18].mxu1  ;;  %v1012_v17 = vpop.f32.mrb[19].mxu0 }
 0x11e   : > { %814 = vst.msk [vmem:[%s1325_s10 + $0x18] sm:$0xf] %vm807_vm0, %v962_v10  ;;  %v963_v18 = vpack.c.bf16 %v754_v11, %v754_v11  ;;  %v652_v19 = vadd.f32 %v1010_v12, %v1317_v58  ;;  %v1013_v20 = vadd.f32 %v1012_v17, %v1011_v14  ;;  %v1064_v21 = vpop.f32.mrb[19].mxu1 }
 0x11f   : > { %v1065_v22 = vadd.f32 %v1064_v21, %v1063_v16 }
 0x120   : > { %815 = vst.msk [vmem:[%s1325_s10 + $0x1c] sm:$0xf] %vm807_vm0, %v963_v18  ;;  %v733_v23 = vadd.f32 %v1062_v15, %v652_v19  ;;  %v655_v24 = vadd.f32 %v1013_v20, %v1317_v58 }
 0x122   : > { %v755_v25 = vmax.f32 %v733_v23, 0.0  ;;  %v736_v26 = vadd.f32 %v1065_v22, %v655_v24  ;;  %v1014_v27 = vpop.f32.mrb[20].mxu0 }
 0x123   : > { %v1066_v28 = vpop.f32.mrb[20].mxu1  ;;  %v1015_v29 = vpop.f32.mrb[21].mxu0 }
 0x124   : > { %v964_v30 = vpack.c.bf16 %v755_v25, %v755_v25  ;;  %v756_v31 = vmax.f32 %v736_v26, 0.0  ;;  %v1016_v32 = vadd.f32 %v1015_v29, %v1014_v27  ;;  %v1067_v33 = vpop.f32.mrb[21].mxu1  ;;  %v1017_v34 = vpop.f32.mrb[22].mxu0 }
 0x125   : > { %v1068_v35 = vadd.f32 %v1067_v33, %v1066_v28  ;;  %v1069_v36 = vpop.f32.mrb[22].mxu1  ;;  %v1018_v37 = vpop.f32.mrb[23].mxu0 }
 0x126   : > { %816 = vst.msk [vmem:[%s1325_s10 + $0x20] sm:$0xf] %vm807_vm0, %v964_v30  ;;  %v965_v38 = vpack.c.bf16 %v756_v31, %v756_v31  ;;  %v660_v39 = vadd.f32 %v1016_v32, %v1317_v58  ;;  %v1019_v40 = vadd.f32 %v1018_v37, %v1017_v34  ;;  %v1070_v41 = vpop.f32.mrb[23].mxu1 }
 0x127   : > { %v1071_v42 = vadd.f32 %v1070_v41, %v1069_v36 }
 0x128   : > { %817 = vst.msk [vmem:[%s1325_s10 + $0x24] sm:$0xf] %vm807_vm0, %v965_v38  ;;  %v741_v43 = vadd.f32 %v1068_v35, %v660_v39  ;;  %v663_v44 = vadd.f32 %v1019_v40, %v1317_v58 }
 0x12a   : > { %v757_v45 = vmax.f32 %v741_v43, 0.0  ;;  %v744_v46 = vadd.f32 %v1071_v42, %v663_v44 }
 0x12c   : > { %v966_v47 = vpack.c.bf16 %v757_v45, %v757_v45  ;;  %v758_v48 = vmax.f32 %v744_v46, 0.0 }
 0x12e   : > { %818 = vst.msk [vmem:[%s1325_s10 + $0x28] sm:$0xf] %vm807_vm0, %v966_v47  ;;  %v967_v49 = vpack.c.bf16 %v758_v48, %v758_v48 }
 0x130   : > { %819 = vst.msk [vmem:[%s1325_s10 + $0x2c] sm:$0xf] %vm807_vm0, %v967_v49 }
 0x131 PF: > { %s13_s12 = sadd.s32 1, %s1154_s12  }
 0x132   : > { %p10_p4 = scmp.ge.s32.totalorder %s13_s12, 4  }
 0x134   :  { %12 = sbr.rel (!%p10_p4) target bundleno = 1 (0x1), region = 62 }

// kernel: dqn_forward.6
= control target key start
LH: loop header
LB: loop body
LE: loop exit
PB: predicated region body
PF: predicated region fallthrough
CT: control target
= control target key end

     0   :  { %s1211_s12 = smov 0   ;;  %s1378_s0 = inlined_call_operand.vmem [shape: bf16[128,576], index: 0, kind: input, shape index: {}]   ;;  %s1379_s1 = inlined_call_operand.vmem [shape: bf16[576,64], index: 1, kind: input, shape index: {}]   ;;  %s1380_s2 = inlined_call_operand.vmem [shape: f32[1,64], index: 2, kind: input, shape index: {}]   ;;  %s1381_s3 = inlined_call_operand.vmem [shape: bf16[128,64], index: 3, kind: output, shape index: {}]  }
   0x1 LB: > { %s910_s13 = sadd.s32 4294967295, %s1189_s12   ;;  %p914_p0 = scmp.ge.s32.totalorder %s1189_s12, 1  ;;  %s1189_s12 = sphi %s1211_s12, %s13_s12  }
   0x2   : > { %p139_p1 = scmp.lt.s32.totalorder %s1189_s12, 3 }
   0x4   : > { %p140_p2 = pnand %p914_p0, %p139_p1 }
   0x5   : > { %v1119_v0 = vld [vmem:[%s1379_s1 + $0x40] sm:$0xff] (!%p140_p2)   ;;  %v1123_v4 = vld [vmem:[%s1379_s1 + $0x48] sm:$0xff] (!%p140_p2)   ;;  %v1127_v8 = vld [vmem:[%s1379_s1 + $0x50] sm:$0xff] (!%p140_p2)   ;;  %s915_s19 = sshll.u32 (!%p140_p2), %s910_s13, 3  ;;  %vm597_vm0 = vcmask (!%p140_p2), 523264   ;;  %vm845_vm1 = vcmask (!%p140_p2), 519168  }
   0x6   : > { %143 = sbr.rel (%p140_p2) target bundleno = 294 (0x126), region = 32  ;;  %v1120_v1 = vld [vmem:[%s1379_s1 + $0xc0] sm:$0xff] (!%p140_p2)   ;;  %998 = vmatprep.subr.bf16.mxu0 (!%p140_p2), %v1119_v0  ;;  %v1124_v5 = vld [vmem:[%s1379_s1 + $0xc8] sm:$0xff] (!%p140_p2)   ;;  %v1128_v9 = vld [vmem:[%s1379_s1 + $0xd0] sm:$0xff] (!%p140_p2)   ;;  %p165_p3 = scmp.lt.s32.totalorder (!%p140_p2), %s915_s19, 15 }
   0x7   : > { %v1121_v2 = vld [vmem:[%s1379_s1] sm:$0xff] (!%p140_p2)   ;;  %1038 = vmatprep.subr.bf16.mxu1 (!%p140_p2), %v1120_v1  ;;  %v1125_v6 = vld [vmem:[%s1379_s1 + $0x8] sm:$0xff] (!%p140_p2)   ;;  %v1129_v10 = vld [vmem:[%s1379_s1 + $0x10] sm:$0xff] (!%p140_p2)  }
   0x8   : > { %v1122_v3 = vld [vmem:[%s1379_s1 + $0x80] sm:$0xff] (!%p140_p2)   ;;  %999 = vmatpush3.bf16.msra.mxu0 (!%p140_p2), %v1121_v2  ;;  %v1126_v7 = vld [vmem:[%s1379_s1 + $0x88] sm:$0xff] (!%p140_p2)   ;;  %v1130_v11 = vld [vmem:[%s1379_s1 + $0x90] sm:$0xff] (!%p140_p2)  }
   0x9   : > { %1039 = vmatpush3.bf16.msra.mxu1 (!%p140_p2), %v1122_v3  ;;  %1000 = vmatprep.subr.bf16.mxu0 (!%p140_p2), %v1123_v4  ;;  %v1131_v12 = vld [vmem:[%s1379_s1 + $0x58] sm:$0xff] (!%p140_p2)   ;;  %v1135_v16 = vld [vmem:[%s1379_s1 + $0x60] sm:$0xff] (!%p140_p2)   ;;  %v1139_v20 = vld [vmem:[%s1379_s1 + $0x68] sm:$0xff] (!%p140_p2)  }
   0xa   : > { %1040 = vmatprep.subr.bf16.mxu1 (!%p140_p2), %v1124_v5  ;;  %v1132_v13 = vld [vmem:[%s1379_s1 + $0xd8] sm:$0xff] (!%p140_p2)   ;;  %v1136_v17 = vld [vmem:[%s1379_s1 + $0xe0] sm:$0xff] (!%p140_p2)   ;;  %v1140_v21 = vld [vmem:[%s1379_s1 + $0xe8] sm:$0xff] (!%p140_p2)  }
   0xb   : > { %v1133_v14 = vld [vmem:[%s1379_s1 + $0x18] sm:$0xff] (!%p140_p2)   ;;  %v1137_v18 = vld [vmem:[%s1379_s1 + $0x20] sm:$0xff] (!%p140_p2)   ;;  %v1141_v22 = vld [vmem:[%s1379_s1 + $0x28] sm:$0xff] (!%p140_p2)  }
   0xc   : > { %1001 = vmatpush3.bf16.msra.mxu0 (!%p140_p2), %v1125_v6  ;;  %v1134_v15 = vld [vmem:[%s1379_s1 + $0x98] sm:$0xff] (!%p140_p2)   ;;  %v1138_v19 = vld [vmem:[%s1379_s1 + $0xa0] sm:$0xff] (!%p140_p2)   ;;  %v1142_v23 = vld [vmem:[%s1379_s1 + $0xa8] sm:$0xff] (!%p140_p2)  }
   0xd   : > { %1041 = vmatpush3.bf16.msra.mxu1 %v1126_v7  ;;  %1002 = vmatprep.subr.bf16.mxu0 %v1127_v8  ;;  %s1383_s19 = smov (!%p165_p3, %s915_s19), 15  ;;  %v1143_v24 = vld [vmem:[%s1379_s1 + $0x70] sm:$0xff]   ;;  %v1147_v28 = vld [vmem:[%s1379_s1 + $0x78] sm:$0xff]   ;;  %v1157_v36 = vld [vmem:[%s1379_s1 + $0x100] sm:$0xff]  }
   0xe   : > { %1042 = vmatprep.subr.bf16.mxu1 %v1128_v9  ;;  %v1144_v25 = vld [vmem:[%s1379_s1 + $0xf0] sm:$0xff]   ;;  %s1110_s16 = smul.u32 20, %s1383_s19  ;;  %v1148_v29 = vld [vmem:[%s1379_s1 + $0xf8] sm:$0xff]   ;;  %v1164_v39 = vld [vmem:[%s1379_s1 + $0x108] sm:$0xff]   ;;  %s918_s17 = sshll.u32 %s1383_s19, 2 }
   0xf   : > { %v1145_v26 = vld [vmem:[%s1379_s1 + $0x30] sm:$0xff]   ;;  %v1149_v30 = vld [vmem:[%s1379_s1 + $0x38] sm:$0xff]   ;;  %v919_v58 = vld [vmem:[%s1380_s2] ss:$0 sm:$0xff]  ;;  %s175_s21 = scalar_lea.vmem %s1381_s3, %s918_s17 }
  0x10   : > { %1003 = vmatpush3.bf16.msra.mxu0 %v1129_v10  ;;  %v1146_v27 = vld [vmem:[%s1379_s1 + $0xb0] sm:$0xff]   ;;  %s1317_s13 = scalar_lea.vmem %s1378_s0, %s1110_s16  ;;  %v1150_v31 = vld [vmem:[%s1379_s1 + $0xb8] sm:$0xff]  }
  0x11   : > { %1043 = vmatpush3.bf16.msra.mxu1 %v1130_v11  ;;  %1004 = vmatprep.subr.bf16.mxu0 %v1131_v12  ;;  %v1151_v32 = vld [vmem:[%s1317_s13] ss:$20 sps:$4 sm:$0xff]   ;;  %v1153_v33 = vld [vmem:[%s1317_s13 + $0x4] ss:$20 sps:$4 sm:$0xff]   ;;  %v1154_v34 = vld [vmem:[%s1317_s13 + $0x8] ss:$20 sps:$4 sm:$0xff]  }
  0x12   : > { %1044 = vmatprep.subr.bf16.mxu1 %v1132_v13  ;;  %v1156_v35 = vld [vmem:[%s1317_s13 + $0xc] ss:$20 sps:$4 sm:$0xff]   ;;  %642 = vmatprep.mubr.bf16.mxu0 %v1153_v33  ;;  %v1160_v38 = vld [vmem:[%s1317_s13 + $0x34] ss:$20 sps:$4 sm:$0xff]   ;;  %v1163_v41 = vld [vmem:[%s1317_s13 + $0x30] ss:$20 sps:$4 sm:$0xff]  }
  0x13   : > { %707 = vmatprep.mubr.bf16.mxu1 %v1156_v35  ;;  %v1158_v37 = vld [vmem:[%s1317_s13 + $0x2c] ss:$20 sps:$4 sm:$0xff]   ;;  %v1162_v40 = vld [vmem:[%s1317_s13 + $0x28] ss:$20 sps:$4 sm:$0xff]   ;;  %v1171_v44 = vld [vmem:[%s1379_s1 + $0x110] sm:$0xff]  }
  0x14   : > { %1005 = vmatpush3.bf16.msra.mxu0 %v1133_v14  ;;  %v1165_v42 = vld [vmem:[%s1317_s13 + $0x54] ss:$20 sps:$4 sm:$0xff]   ;;  %v1167_v43 = vld [vmem:[%s1317_s13 + $0x5c] ss:$20 sps:$4 sm:$0xff]   ;;  %v1170_v47 = vld [vmem:[%s1317_s13 + $0x58] ss:$20 sps:$4 sm:$0xff]  }
  0x15   : > { %1045 = vmatpush3.bf16.msra.mxu1 %v1134_v15  ;;  %1006 = vmatprep.subr.bf16.mxu0 %v1135_v16  ;;  %v1178_v45 = vld [vmem:[%s1379_s1 + $0x118] sm:$0xff]   ;;  %v1169_v46 = vld [vmem:[%s1317_s13 + $0x50] ss:$20 sps:$4 sm:$0xff]   ;;  %v1177_v51 = vld [vmem:[%s1317_s13 + $0x80] ss:$20 sps:$4 sm:$0xff]  }
  0x16   : > { %1046 = vmatprep.subr.bf16.mxu1 %v1136_v17  ;;  %v1172_v48 = vld [vmem:[%s1317_s13 + $0x7c] ss:$20 sps:$4 sm:$0xff]   ;;  %v1174_v49 = vld [vmem:[%s1317_s13 + $0x84] ss:$20 sps:$4 sm:$0xff]   ;;  %v1180_v53 = vld [vmem:[%s1317_s13 + $0x60] ss:$20 sps:$4 sm:$0xff]  }
  0x17   : > { %v1176_v50 = vld [vmem:[%s1317_s13 + $0x78] ss:$20 sps:$4 sm:$0xff]   ;;  %v1179_v52 = vld [vmem:[%s1317_s13 + $0x10] ss:$20 sps:$4 sm:$0xff]   ;;  %v1182_v55 = vld [vmem:[%s1317_s13 + $0x88] ss:$20 sps:$4 sm:$0xff]  }
  0x18   : > { %1007 = vmatpush3.bf16.msra.mxu0 %v1137_v18  ;;  %v1181_v54 = vld [vmem:[%s1317_s13 + $0x38] ss:$20 sps:$4 sm:$0xff]  }
  0x19   : > { %1047 = vmatpush3.bf16.msra.mxu1 %v1138_v19  ;;  %1008 = vmatprep.subr.bf16.mxu0 %v1139_v20 }
  0x1a   : > { %1048 = vmatprep.subr.bf16.mxu1 %v1140_v21 }
  0x1c   : > { %1009 = vmatpush3.bf16.msra.mxu0 %v1141_v22 }
  0x1d   : > { %1049 = vmatpush3.bf16.msra.mxu1 %v1142_v23  ;;  %1010 = vmatprep.subr.bf16.mxu0 %v1143_v24 }
  0x1e   : > { %1050 = vmatprep.subr.bf16.mxu1 %v1144_v25 }
  0x20   : > { %1011 = vmatpush3.bf16.msra.mxu0 %v1145_v26 }
  0x21   : > { %1051 = vmatpush3.bf16.msra.mxu1 %v1146_v27  ;;  %1012 = vmatprep.subr.bf16.mxu0 %v1147_v28 }
  0x22   : > { %1052 = vmatprep.subr.bf16.mxu1 %v1148_v29 }
  0x24   : > { %1013 = vmatpush3.bf16.msra.mxu0 %v1149_v30 }
  0x25   : > { %1053 = vmatpush3.bf16.msra.mxu1 %v1150_v31  ;;  %1086 = vmatprep.subr.bf16.mxu0 %v1157_v36 }
  0x26   : > { %1102 = vmatprep.subr.bf16.mxu1 %v1157_v36 }
  0x27   : > { %643 = vmatmul.mubr.bf16.vlgmr.msra.gmra.mrb[0].mxu0 %v1151_v32 }
  0x28   : > { %708 = vmatmul.mubr.bf16.vlgmr.msra.gmra.mrb[0].mxu1 %v1154_v34  ;;  %1087 = vmatpush3.bf16.msra.mxu0 %v1157_v36 }
  0x29   : > { %1106 = vmatpush3.bf16.msra.mxu1 %v1157_v36  ;;  %650 = vmatprep.mubr.bf16.mxu0 %v1158_v37 }
  0x2a   : > { %715 = vmatprep.mubr.bf16.mxu1 %v1160_v38  ;;  %1088 = vmatprep.subr.bf16.mxu0 %v1164_v39 }
  0x2b   : > { %1103 = vmatprep.subr.bf16.mxu1 %v1164_v39 }
  0x2c   : > { %1089 = vmatpush3.bf16.msra.mxu0 %v1164_v39 }
  0x2d   : > { %1107 = vmatpush3.bf16.msra.mxu1 %v1164_v39  ;;  %1090 = vmatprep.subr.bf16.mxu0 %v1171_v44 }
  0x2e   : > { %1104 = vmatprep.subr.bf16.mxu1 %v1171_v44 }
  0x2f   : > { %651 = vmatmul.mubr.bf16.gmra.mrb[4].mxu0 %v1162_v40 }
  0x30   : > { %716 = vmatmul.mubr.bf16.gmra.mrb[4].mxu1 %v1163_v41  ;;  %658 = vmatprep.mubr.bf16.mxu0 %v1165_v42 }
  0x31   : > { %723 = vmatprep.mubr.bf16.mxu1 %v1167_v43  ;;  %1091 = vmatpush3.bf16.msra.mxu0 %v1171_v44 }
  0x32   : > { %1108 = vmatpush3.bf16.msra.mxu1 %v1171_v44  ;;  %1092 = vmatprep.subr.bf16.mxu0 %v1178_v45 }
  0x33   : > { %1105 = vmatprep.subr.bf16.mxu1 %v1178_v45 }
  0x35   : > { %1093 = vmatpush3.bf16.msra.mxu0 %v1178_v45 }
  0x36   : > { %1109 = vmatpush3.bf16.msra.mxu1 %v1178_v45 }
  0x37   : > { %659 = vmatmul.mubr.bf16.gmra.mrb[8].mxu0 %v1169_v46 }
  0x38   : > { %724 = vmatmul.mubr.bf16.gmra.mrb[8].mxu1 %v1170_v47  ;;  %666 = vmatprep.mubr.bf16.mxu0 %v1172_v48 }
  0x39   : > { %731 = vmatprep.mubr.bf16.mxu1 %v1174_v49 }
  0x3f   : > { %667 = vmatmul.mubr.bf16.gmra.mrb[12].mxu0 %v1176_v50 }
  0x40   : > { %732 = vmatmul.mubr.bf16.gmra.mrb[12].mxu1 %v1177_v51  ;;  %1094 = vmatprep.mubr.msk.bf16.mxu0 %vm597_vm0, %v1179_v52 }
  0x41   : > { %1098 = vmatprep.mubr.msk.bf16.mxu1 %vm597_vm0, %v1180_v53 }
  0x47   : > { %1095 = vmatmul.mubr.msk.bf16.vlgmr.msra.gmra.mrb[16].mxu0 %vm597_vm0, %v1181_v54 }
  0x48   : > { %1099 = vmatmul.mubr.msk.bf16.vlgmr.msra.gmra.mrb[16].mxu1 %vm597_vm0, %v1182_v55 }
  0xfa   : > { %v1014_v56 = vpop.f32.mrb[0].mxu0 }
  0xfb   : > { %v1054_v57 = vpop.f32.mrb[0].mxu1  ;;  %v1015_v59 = vpop.f32.mrb[1].mxu0 }
  0xfc   : > { %v1016_v60 = vadd.f32 %v1015_v59, %v1014_v56  ;;  %v1055_v61 = vpop.f32.mrb[1].mxu1  ;;  %v1017_v62 = vpop.f32.mrb[2].mxu0 }
  0xfd   : > { %v1056_v63 = vadd.f32 %v1055_v61, %v1054_v57  ;;  %v1057_v0 = vpop.f32.mrb[2].mxu1  ;;  %v1018_v1 = vpop.f32.mrb[3].mxu0 }
  0xfe   : > { %v645_v2 = vadd.f32 %v1016_v60, %v919_v58  ;;  %v1019_v3 = vadd.f32 %v1018_v1, %v1017_v62  ;;  %v1058_v4 = vpop.f32.mrb[3].mxu1 }
  0xff   : > { %v1059_v5 = vadd.f32 %v1058_v4, %v1057_v0 }
 0x100   : > { %v648_v6 = vadd.f32 %v1019_v3, %v919_v58  ;;  %v710_v7 = vadd.f32 %v1056_v63, %v645_v2 }
 0x102   : > { %v1020_v8 = vpop.f32.mrb[4].mxu0  ;;  %v1360_v9 = vadd.f32 %v1059_v5, %v648_v6 }
 0x103   : > { %v1060_v10 = vpop.f32.mrb[4].mxu1  ;;  %v1021_v11 = vpop.f32.mrb[5].mxu0 }
 0x104   : > { %v1022_v12 = vadd.f32 %v1021_v11, %v1020_v8  ;;  %v1061_v13 = vpop.f32.mrb[5].mxu1  ;;  %v1023_v14 = vpop.f32.mrb[6].mxu0 }
 0x105   : > { %v1062_v15 = vadd.f32 %v1061_v13, %v1060_v10  ;;  %v1063_v16 = vpop.f32.mrb[6].mxu1  ;;  %v1024_v17 = vpop.f32.mrb[7].mxu0 }
 0x106   : > { %v653_v18 = vadd.f32 %v1022_v12, %v919_v58  ;;  %v1025_v19 = vadd.f32 %v1024_v17, %v1023_v14  ;;  %v1064_v20 = vpop.f32.mrb[7].mxu1 }
 0x107   : > { %v1065_v21 = vadd.f32 %v1064_v20, %v1063_v16 }
 0x108   : > { %v656_v22 = vadd.f32 %v1025_v19, %v919_v58  ;;  %v718_v23 = vadd.f32 %v1062_v15, %v653_v18 }
 0x10a   : > { %v1026_v24 = vpop.f32.mrb[8].mxu0  ;;  %v721_v25 = vadd.f32 %v1065_v21, %v656_v22 }
 0x10b   : > { %v1066_v26 = vpop.f32.mrb[8].mxu1  ;;  %v1027_v27 = vpop.f32.mrb[9].mxu0 }
 0x10c   : > { %v1028_v28 = vadd.f32 %v1027_v27, %v1026_v24  ;;  %v1067_v29 = vpop.f32.mrb[9].mxu1  ;;  %v1029_v30 = vpop.f32.mrb[10].mxu0 }
 0x10d   : > { %v1068_v31 = vadd.f32 %v1067_v29, %v1066_v26  ;;  %v1069_v32 = vpop.f32.mrb[10].mxu1  ;;  %v1030_v33 = vpop.f32.mrb[11].mxu0 }
 0x10e   : > { %v661_v34 = vadd.f32 %v1028_v28, %v919_v58  ;;  %v1031_v35 = vadd.f32 %v1030_v33, %v1029_v30  ;;  %v1070_v36 = vpop.f32.mrb[11].mxu1 }
 0x10f   : > { %v1071_v37 = vadd.f32 %v1070_v36, %v1069_v32 }
 0x110   : > { %v664_v38 = vadd.f32 %v1031_v35, %v919_v58  ;;  %v726_v39 = vadd.f32 %v1068_v31, %v661_v34 }
 0x112   : > { %v1032_v40 = vpop.f32.mrb[12].mxu0  ;;  %v729_v41 = vadd.f32 %v1071_v37, %v664_v38 }
 0x113   : > { %v1072_v42 = vpop.f32.mrb[12].mxu1  ;;  %v1033_v43 = vpop.f32.mrb[13].mxu0 }
 0x114   : > { %v1034_v44 = vadd.f32 %v1033_v43, %v1032_v40  ;;  %v1073_v45 = vpop.f32.mrb[13].mxu1  ;;  %v1035_v46 = vpop.f32.mrb[14].mxu0 }
 0x115   : > { %v1074_v47 = vadd.f32 %v1073_v45, %v1072_v42  ;;  %v1075_v48 = vpop.f32.mrb[14].mxu1  ;;  %v1036_v49 = vpop.f32.mrb[15].mxu0 }
 0x116   : > { %v669_v50 = vadd.f32 %v1034_v44, %v919_v58  ;;  %v1037_v51 = vadd.f32 %v1036_v49, %v1035_v46  ;;  %v1076_v52 = vpop.f32.mrb[15].mxu1 }
 0x117   : > { %v1077_v53 = vadd.f32 %v1076_v52, %v1075_v48 }
 0x118   : > { %v672_v54 = vadd.f32 %v1037_v51, %v919_v58  ;;  %v734_v55 = vadd.f32 %v1074_v47, %v669_v50 }
 0x11a   : > { %v1096_v56 = vpop.f32.mrb[16].mxu0  ;;  %v737_v57 = vadd.f32 %v1077_v53, %v672_v54 }
 0x11b   : > { %v783_v59 = vadd.f32 %v1096_v56, %v718_v23  ;;  %v1100_v60 = vpop.f32.mrb[16].mxu1  ;;  %v774_v61 = vpop.f32.mrb[17].mxu0 }
 0x11c   : > { %v799_v62 = vadd.f32 %v1100_v60, %v734_v55  ;;  %v775_v63 = vadd.f32 %v774_v61, %v710_v7  ;;  %v790_v0 = vpop.f32.mrb[17].mxu1  ;;  %v1097_v1 = vpop.f32.mrb[18].mxu0 }
 0x11d   : > { %v807_v2 = vmax.f32 %v783_v59, 0.0  ;;  %v791_v3 = vadd.f32 %v790_v0, %v726_v39  ;;  %v786_v4 = vadd.f32 %v1097_v1, %v721_v25  ;;  %v1101_v5 = vpop.f32.mrb[18].mxu1  ;;  %v777_v6 = vpop.f32.mrb[19].mxu0 }
 0x11e   : > { %v811_v58 = vmax.f32 %v799_v62, 0.0  ;;  %v805_v8 = vmax.f32 %v775_v63, 0.0  ;;  %v802_v10 = vadd.f32 %v1101_v5, %v737_v57  ;;  %v778_v11 = vadd.f32 %v777_v6, %v1360_v9  ;;  %v793_v12 = vpop.f32.mrb[19].mxu1 }
 0x11f   : > { %v992_v13 = vpack.c.bf16 %v807_v2, %v807_v2  ;;  %v809_v7 = vmax.f32 %v791_v3, 0.0  ;;  %v808_v14 = vmax.f32 %v786_v4, 0.0  ;;  %v794_v15 = vadd.f32 %v793_v12, %v729_v41 }
 0x120   : > { %v996_v16 = vpack.c.bf16 %v811_v58, %v811_v58  ;;  %v990_v17 = vpack.c.bf16 %v805_v8, %v805_v8  ;;  %v812_v18 = vmax.f32 %v802_v10, 0.0  ;;  %v806_v19 = vmax.f32 %v778_v11, 0.0 }
 0x121   : > { %848 = vst.msk [vmem:[%s175_s21 + $0x8] sm:$0xf] %vm845_vm1, %v992_v13  ;;  %v994_v20 = vpack.c.bf16 %v809_v7, %v809_v7  ;;  %v993_v21 = vpack.c.bf16 %v808_v14, %v808_v14  ;;  %v810_v22 = vmax.f32 %v794_v15, 0.0 }
 0x122   : > { %852 = vst.msk [vmem:[%s175_s21 + $0x18] sm:$0xf] %vm845_vm1, %v996_v16  ;;  %846 = vst.msk [vmem:[%s175_s21] sm:$0xf] %vm845_vm1, %v990_v17  ;;  %v997_v23 = vpack.c.bf16 %v812_v18, %v812_v18  ;;  %v991_v9 = vpack.c.bf16 %v806_v19, %v806_v19 }
 0x123   : > { %850 = vst.msk [vmem:[%s175_s21 + $0x10] sm:$0xf] %vm845_vm1, %v994_v20  ;;  %849 = vst.msk [vmem:[%s175_s21 + $0xc] sm:$0xf] %vm845_vm1, %v993_v21  ;;  %v995_v24 = vpack.c.bf16 %v810_v22, %v810_v22 }
 0x124   : > { %853 = vst.msk [vmem:[%s175_s21 + $0x1c] sm:$0xf] %vm845_vm1, %v997_v23  ;;  %847 = vst.msk [vmem:[%s175_s21 + $0x4] sm:$0xf] %vm845_vm1, %v991_v9 }
 0x125   : > { %851 = vst.msk [vmem:[%s175_s21 + $0x14] sm:$0xf] %vm845_vm1, %v995_v24 }
 0x126 PF: > { %s13_s12 = sadd.s32 1, %s1189_s12  }
 0x127   : > { %p10_p4 = scmp.ge.s32.totalorder %s13_s12, 4  }
 0x129   :  { %12 = sbr.rel (!%p10_p4) target bundleno = 1 (0x1), region = 62 }

// kernel: dqn_forward.7
= control target key start
LH: loop header
LB: loop body
LE: loop exit
PB: predicated region body
PF: predicated region fallthrough
CT: control target
= control target key end

     0   :  { %vm4898_vm0 = vcmask 523264   ;;  %vm6377_vm1 = vcmask 113664   ;;  %s11188_s1 = inlined_call_operand.vmem [shape: bf16[3136,512], index: 1, kind: input, shape index: {}]   ;;  %s11189_s0 = inlined_call_operand.vmem [shape: bf16[16,3136], index: 0, kind: input, shape index: {}]   ;;  %s11190_s3 = inlined_call_operand.vmem [shape: bf16[512,14], index: 3, kind: input, shape index: {}]   ;;  %s11191_s2 = inlined_call_operand.vmem [shape: f32[1,512], index: 2, kind: input, shape index: {}]   ;;  %s11192_s4 = inlined_call_operand.vmem [shape: f32[1,14], index: 4, kind: input, shape index: {}]   ;;  %s11193_s5 = inlined_call_operand.vmem [shape: f32[16,14], index: 5, kind: output, shape index: {}]  }
   0x1   :  { %v7377_v0 = vld [vmem:[%s11188_s1 + $0x4] ss:$16 sps:$4 sm:$0xff]   ;;  %v7379_v1 = vld [vmem:[%s11188_s1 + $0xc] ss:$16 sps:$4 sm:$0xff]   ;;  %v7381_v2 = vld [vmem:[%s11188_s1] ss:$16 sps:$4 sm:$0xff]  }
   0x2   :  { %4902 = vmatprep.subr.bf16.mxu0 %v7377_v0  ;;  %v7382_v3 = vld [vmem:[%s11188_s1 + $0x8] ss:$16 sps:$4 sm:$0xff]   ;;  %5461 = vmatprep.subr.bf16.mxu1 %v7379_v1  ;;  %v7383_v4 = vld [vmem:[%s11188_s1 + $0x24] ss:$16 sps:$4 sm:$0xff]   ;;  %v7385_v5 = vld [vmem:[%s11188_s1 + $0x2c] ss:$16 sps:$4 sm:$0xff]  }
   0x3   :  { %4903 = vmatpush1.bf16.msra.mxu0 %v7381_v2  ;;  %5462 = vmatpush1.bf16.msra.mxu1 %v7382_v3  ;;  %v7387_v6 = vld [vmem:[%s11188_s1 + $0x20] ss:$16 sps:$4 sm:$0xff]   ;;  %v7388_v7 = vld [vmem:[%s11188_s1 + $0x28] ss:$16 sps:$4 sm:$0xff]   ;;  %v7389_v8 = vld [vmem:[%s11188_s1 + $0x44] ss:$16 sps:$4 sm:$0xff]  }
   0x4   :  { %4904 = vmatprep.subr.bf16.mxu0 %v7383_v4  ;;  %5463 = vmatprep.subr.bf16.mxu1 %v7385_v5  ;;  %v7391_v9 = vld [vmem:[%s11188_s1 + $0x4c] ss:$16 sps:$4 sm:$0xff]   ;;  %v7393_v10 = vld [vmem:[%s11188_s1 + $0x40] ss:$16 sps:$4 sm:$0xff]   ;;  %v7394_v11 = vld [vmem:[%s11188_s1 + $0x48] ss:$16 sps:$4 sm:$0xff]  }
   0x5   :  { %v7395_v12 = vld [vmem:[%s11188_s1 + $0x64] ss:$16 sps:$4 sm:$0xff]   ;;  %v7397_v13 = vld [vmem:[%s11188_s1 + $0x6c] ss:$16 sps:$4 sm:$0xff]   ;;  %v7399_v14 = vld [vmem:[%s11188_s1 + $0x60] ss:$16 sps:$4 sm:$0xff]  }
   0x6   :  { %v7400_v15 = vld [vmem:[%s11188_s1 + $0x68] ss:$16 sps:$4 sm:$0xff]   ;;  %v7401_v16 = vld [vmem:[%s11188_s1 + $0x84] ss:$16 sps:$4 sm:$0xff]   ;;  %v7403_v17 = vld [vmem:[%s11188_s1 + $0x8c] ss:$16 sps:$4 sm:$0xff]  }
   0x7   :  { %4905 = vmatpush1.bf16.msra.mxu0 %v7387_v6  ;;  %5464 = vmatpush1.bf16.msra.mxu1 %v7388_v7  ;;  %v7405_v18 = vld [vmem:[%s11188_s1 + $0x80] ss:$16 sps:$4 sm:$0xff]   ;;  %v7406_v19 = vld [vmem:[%s11188_s1 + $0x88] ss:$16 sps:$4 sm:$0xff]   ;;  %v7407_v20 = vld [vmem:[%s11188_s1 + $0xa4] ss:$16 sps:$4 sm:$0xff]  }
   0x8   :  { %4906 = vmatprep.subr.bf16.mxu0 %v7389_v8  ;;  %5465 = vmatprep.subr.bf16.mxu1 %v7391_v9  ;;  %v7409_v21 = vld [vmem:[%s11188_s1 + $0xac] ss:$16 sps:$4 sm:$0xff]   ;;  %v7411_v22 = vld [vmem:[%s11188_s1 + $0xa0] ss:$16 sps:$4 sm:$0xff]   ;;  %v7412_v23 = vld [vmem:[%s11188_s1 + $0xa8] ss:$16 sps:$4 sm:$0xff]  }
   0x9   :  { %v7413_v24 = vld [vmem:[%s11188_s1 + $0xc4] ss:$16 sps:$4 sm:$0xff]   ;;  %v7415_v25 = vld [vmem:[%s11188_s1 + $0xcc] ss:$16 sps:$4 sm:$0xff]   ;;  %v7417_v26 = vld [vmem:[%s11188_s1 + $0xc0] ss:$16 sps:$4 sm:$0xff]  }
   0xa   :  { %v7418_v27 = vld [vmem:[%s11188_s1 + $0xc8] ss:$16 sps:$4 sm:$0xff]   ;;  %v7419_v28 = vld [vmem:[%s11188_s1 + $0xe4] ss:$16 sps:$4 sm:$0xff]   ;;  %v7421_v29 = vld [vmem:[%s11188_s1 + $0xec] ss:$16 sps:$4 sm:$0xff]  }
   0xb   :  { %4907 = vmatpush1.bf16.msra.mxu0 %v7393_v10  ;;  %5466 = vmatpush1.bf16.msra.mxu1 %v7394_v11  ;;  %v7423_v30 = vld [vmem:[%s11188_s1 + $0xe0] ss:$16 sps:$4 sm:$0xff]   ;;  %v7424_v31 = vld [vmem:[%s11188_s1 + $0xe8] ss:$16 sps:$4 sm:$0xff]   ;;  %v7425_v32 = vld [vmem:[%s11188_s1 + $0x104] ss:$16 sps:$4 sm:$0xff]  }
   0xc   :  { %4908 = vmatprep.subr.bf16.mxu0 %v7395_v12  ;;  %5467 = vmatprep.subr.bf16.mxu1 %v7397_v13  ;;  %v7427_v33 = vld [vmem:[%s11188_s1 + $0x10c] ss:$16 sps:$4 sm:$0xff]   ;;  %v7429_v34 = vld [vmem:[%s11188_s1 + $0x100] ss:$16 sps:$4 sm:$0xff]   ;;  %v7430_v35 = vld [vmem:[%s11188_s1 + $0x108] ss:$16 sps:$4 sm:$0xff]  }
   0xd   :  { %v7431_v36 = vld [vmem:[%s11188_s1 + $0x124] ss:$16 sps:$4 sm:$0xff]   ;;  %v7433_v37 = vld [vmem:[%s11188_s1 + $0x12c] ss:$16 sps:$4 sm:$0xff]   ;;  %v7435_v38 = vld [vmem:[%s11188_s1 + $0x120] ss:$16 sps:$4 sm:$0xff]  }
   0xe   :  { %v7436_v39 = vld [vmem:[%s11188_s1 + $0x128] ss:$16 sps:$4 sm:$0xff]   ;;  %v7437_v40 = vld [vmem:[%s11188_s1 + $0x144] ss:$16 sps:$4 sm:$0xff]   ;;  %v7439_v41 = vld [vmem:[%s11188_s1 + $0x14c] ss:$16 sps:$4 sm:$0xff]  }
   0xf   :  { %4909 = vmatpush1.bf16.msra.mxu0 %v7399_v14  ;;  %5468 = vmatpush1.bf16.msra.mxu1 %v7400_v15  ;;  %v7441_v42 = vld [vmem:[%s11188_s1 + $0x140] ss:$16 sps:$4 sm:$0xff]   ;;  %v7442_v43 = vld [vmem:[%s11188_s1 + $0x148] ss:$16 sps:$4 sm:$0xff]   ;;  %v7443_v44 = vld [vmem:[%s11188_s1 + $0x164] ss:$16 sps:$4 sm:$0xff]  }
  0x10   :  { %4910 = vmatprep.subr.bf16.mxu0 %v7401_v16  ;;  %5469 = vmatprep.subr.bf16.mxu1 %v7403_v17  ;;  %v7445_v45 = vld [vmem:[%s11188_s1 + $0x16c] ss:$16 sps:$4 sm:$0xff]   ;;  %v7447_v46 = vld [vmem:[%s11188_s1 + $0x160] ss:$16 sps:$4 sm:$0xff]   ;;  %v7448_v47 = vld [vmem:[%s11188_s1 + $0x168] ss:$16 sps:$4 sm:$0xff]  }
  0x11   :  { %v7475_v48 = vld [vmem:[%s11189_s0 + $0x4] ss:$100 sps:$4 sm:$0xff]   ;;  %v7451_v50 = vld [vmem:[%s11188_s1 + $0x18c] ss:$16 sps:$4 sm:$0xff]   ;;  %v7453_v51 = vld [vmem:[%s11188_s1 + $0x180] ss:$16 sps:$4 sm:$0xff]  }
  0x12   :  { %v7449_v49 = vld [vmem:[%s11188_s1 + $0x184] ss:$16 sps:$4 sm:$0xff]   ;;  %4934 = vmatprep.mubr.bf16.mxu0 %v7475_v48  ;;  %5493 = vmatprep.mubr.bf16.mxu1 %v7475_v48  ;;  %v7454_v52 = vld [vmem:[%s11188_s1 + $0x188] ss:$16 sps:$4 sm:$0xff]   ;;  %v7457_v54 = vld [vmem:[%s11188_s1 + $0x1ac] ss:$16 sps:$4 sm:$0xff]  }
  0x13   :  { %4911 = vmatpush1.bf16.msra.mxu0 %v7405_v18  ;;  %5470 = vmatpush1.bf16.msra.mxu1 %v7406_v19  ;;  %v7455_v53 = vld [vmem:[%s11188_s1 + $0x1a4] ss:$16 sps:$4 sm:$0xff]   ;;  %v7459_v55 = vld [vmem:[%s11188_s1 + $0x1a0] ss:$16 sps:$4 sm:$0xff]   ;;  %v7460_v56 = vld [vmem:[%s11188_s1 + $0x1a8] ss:$16 sps:$4 sm:$0xff]  }
  0x14   :  { %4912 = vmatprep.subr.bf16.mxu0 %v7407_v20  ;;  %5471 = vmatprep.subr.bf16.mxu1 %v7409_v21  ;;  %v7461_v57 = vld [vmem:[%s11188_s1 + $0x1c4] ss:$16 sps:$4 sm:$0xff]   ;;  %v7463_v58 = vld [vmem:[%s11188_s1 + $0x1cc] ss:$16 sps:$4 sm:$0xff]   ;;  %v7465_v59 = vld [vmem:[%s11188_s1 + $0x1c0] ss:$16 sps:$4 sm:$0xff]  }
  0x15   :  { %v7466_v60 = vld [vmem:[%s11188_s1 + $0x1c8] ss:$16 sps:$4 sm:$0xff]   ;;  %v7467_v61 = vld [vmem:[%s11188_s1 + $0x1e4] ss:$16 sps:$4 sm:$0xff]   ;;  %v7469_v62 = vld [vmem:[%s11188_s1 + $0x1ec] ss:$16 sps:$4 sm:$0xff]  }
  0x16   :  { %v7471_v63 = vld [vmem:[%s11188_s1 + $0x1e0] ss:$16 sps:$4 sm:$0xff]   ;;  %v7472_v0 = vld [vmem:[%s11188_s1 + $0x1e8] ss:$16 sps:$4 sm:$0xff]   ;;  %v7478_v1 = vld [vmem:[%s11188_s1 + $0x204] ss:$16 sps:$4 sm:$0xff]  }
  0x17   :  { %4913 = vmatpush1.bf16.msra.mxu0 %v7411_v22  ;;  %5472 = vmatpush1.bf16.msra.mxu1 %v7412_v23  ;;  %v7481_v2 = vld [vmem:[%s11188_s1 + $0x20c] ss:$16 sps:$4 sm:$0xff]   ;;  %v7473_v3 = vld [vmem:[%s11189_s0] ss:$100 sps:$4 sm:$0xff]   ;;  %v7479_v5 = vld [vmem:[%s11188_s1 + $0x208] ss:$16 sps:$4 sm:$0xff]  }
  0x18   :  { %4914 = vmatprep.subr.bf16.mxu0 %v7413_v24  ;;  %5473 = vmatprep.subr.bf16.mxu1 %v7415_v25  ;;  %v7476_v4 = vld [vmem:[%s11188_s1 + $0x200] ss:$16 sps:$4 sm:$0xff]   ;;  %v7484_v6 = vld [vmem:[%s11188_s1 + $0x224] ss:$16 sps:$4 sm:$0xff]   ;;  %v7487_v7 = vld [vmem:[%s11188_s1 + $0x22c] ss:$16 sps:$4 sm:$0xff]  }
  0x19   :  { %v7482_v8 = vld [vmem:[%s11188_s1 + $0x220] ss:$16 sps:$4 sm:$0xff]   ;;  %v7485_v9 = vld [vmem:[%s11188_s1 + $0x228] ss:$16 sps:$4 sm:$0xff]   ;;  %v7490_v10 = vld [vmem:[%s11188_s1 + $0x244] ss:$16 sps:$4 sm:$0xff]  }
  0x1a   :  { %v7493_v11 = vld [vmem:[%s11188_s1 + $0x24c] ss:$16 sps:$4 sm:$0xff]   ;;  %v7488_v12 = vld [vmem:[%s11188_s1 + $0x240] ss:$16 sps:$4 sm:$0xff]   ;;  %v7491_v13 = vld [vmem:[%s11188_s1 + $0x248] ss:$16 sps:$4 sm:$0xff]  }
  0x1b   :  { %4915 = vmatpush1.bf16.msra.mxu0 %v7417_v26  ;;  %5474 = vmatpush1.bf16.msra.mxu1 %v7418_v27  ;;  %v7496_v14 = vld [vmem:[%s11188_s1 + $0x264] ss:$16 sps:$4 sm:$0xff]   ;;  %v7499_v15 = vld [vmem:[%s11188_s1 + $0x26c] ss:$16 sps:$4 sm:$0xff]   ;;  %v7494_v16 = vld [vmem:[%s11188_s1 + $0x260] ss:$16 sps:$4 sm:$0xff]  }
  0x1c   :  { %4916 = vmatprep.subr.bf16.mxu0 %v7419_v28  ;;  %5475 = vmatprep.subr.bf16.mxu1 %v7421_v29  ;;  %v7497_v17 = vld [vmem:[%s11188_s1 + $0x268] ss:$16 sps:$4 sm:$0xff]   ;;  %v7502_v18 = vld [vmem:[%s11188_s1 + $0x284] ss:$16 sps:$4 sm:$0xff]   ;;  %v7505_v19 = vld [vmem:[%s11188_s1 + $0x28c] ss:$16 sps:$4 sm:$0xff]  }
  0x1d   :  { %v7500_v20 = vld [vmem:[%s11188_s1 + $0x280] ss:$16 sps:$4 sm:$0xff]   ;;  %v7503_v21 = vld [vmem:[%s11188_s1 + $0x288] ss:$16 sps:$4 sm:$0xff]   ;;  %v7508_v22 = vld [vmem:[%s11188_s1 + $0x2a4] ss:$16 sps:$4 sm:$0xff]  }
  0x1e   :  { %v7511_v23 = vld [vmem:[%s11188_s1 + $0x2ac] ss:$16 sps:$4 sm:$0xff]   ;;  %v7506_v24 = vld [vmem:[%s11188_s1 + $0x2a0] ss:$16 sps:$4 sm:$0xff]   ;;  %v7509_v25 = vld [vmem:[%s11188_s1 + $0x2a8] ss:$16 sps:$4 sm:$0xff]  }
  0x1f   :  { %4917 = vmatpush1.bf16.msra.mxu0 %v7423_v30  ;;  %5476 = vmatpush1.bf16.msra.mxu1 %v7424_v31  ;;  %v7514_v26 = vld [vmem:[%s11188_s1 + $0x2c4] ss:$16 sps:$4 sm:$0xff]   ;;  %v7517_v27 = vld [vmem:[%s11188_s1 + $0x2cc] ss:$16 sps:$4 sm:$0xff]   ;;  %v7512_v28 = vld [vmem:[%s11188_s1 + $0x2c0] ss:$16 sps:$4 sm:$0xff]  }
  0x20   :  { %4918 = vmatprep.subr.bf16.mxu0 %v7425_v32  ;;  %5477 = vmatprep.subr.bf16.mxu1 %v7427_v33  ;;  %v7515_v29 = vld [vmem:[%s11188_s1 + $0x2c8] ss:$16 sps:$4 sm:$0xff]   ;;  %v7574_v30 = vld [vmem:[%s11189_s0 + $0xc] ss:$100 sps:$4 sm:$0xff]   ;;  %v7520_v31 = vld [vmem:[%s11188_s1 + $0x2e4] ss:$16 sps:$4 sm:$0xff]  }
  0x21   :  { %v7523_v32 = vld [vmem:[%s11188_s1 + $0x2ec] ss:$16 sps:$4 sm:$0xff]   ;;  %v7518_v33 = vld [vmem:[%s11188_s1 + $0x2e0] ss:$16 sps:$4 sm:$0xff]  }
  0x22   :  { %v7547_v48 = vld [vmem:[%s11188_s1 + $0x36c] ss:$16 sps:$4 sm:$0xff]  }
  0x23   :  { %4919 = vmatpush1.bf16.msra.mxu0 %v7429_v34  ;;  %5478 = vmatpush1.bf16.msra.mxu1 %v7430_v35  ;;  %v7521_v34 = vld [vmem:[%s11188_s1 + $0x2e8] ss:$16 sps:$4 sm:$0xff]   ;;  %v7526_v35 = vld [vmem:[%s11188_s1 + $0x304] ss:$16 sps:$4 sm:$0xff]  }
  0x24   :  { %4920 = vmatprep.subr.bf16.mxu0 %v7431_v36  ;;  %5479 = vmatprep.subr.bf16.mxu1 %v7433_v37  ;;  %v7529_v36 = vld [vmem:[%s11188_s1 + $0x30c] ss:$16 sps:$4 sm:$0xff]   ;;  %v7524_v37 = vld [vmem:[%s11188_s1 + $0x300] ss:$16 sps:$4 sm:$0xff]  }
  0x27   :  { %4921 = vmatpush1.bf16.msra.mxu0 %v7435_v38  ;;  %5480 = vmatpush1.bf16.msra.mxu1 %v7436_v39  ;;  %v7527_v38 = vld [vmem:[%s11188_s1 + $0x308] ss:$16 sps:$4 sm:$0xff]   ;;  %v7532_v39 = vld [vmem:[%s11188_s1 + $0x324] ss:$16 sps:$4 sm:$0xff]  }
  0x28   :  { %4922 = vmatprep.subr.bf16.mxu0 %v7437_v40  ;;  %5481 = vmatprep.subr.bf16.mxu1 %v7439_v41  ;;  %v7535_v40 = vld [vmem:[%s11188_s1 + $0x32c] ss:$16 sps:$4 sm:$0xff]   ;;  %v7530_v41 = vld [vmem:[%s11188_s1 + $0x320] ss:$16 sps:$4 sm:$0xff]  }
  0x2b   :  { %4923 = vmatpush1.bf16.msra.mxu0 %v7441_v42  ;;  %5482 = vmatpush1.bf16.msra.mxu1 %v7442_v43  ;;  %v7533_v42 = vld [vmem:[%s11188_s1 + $0x328] ss:$16 sps:$4 sm:$0xff]   ;;  %v7538_v43 = vld [vmem:[%s11188_s1 + $0x344] ss:$16 sps:$4 sm:$0xff]  }
  0x2c   :  { %4924 = vmatprep.subr.bf16.mxu0 %v7443_v44  ;;  %5483 = vmatprep.subr.bf16.mxu1 %v7445_v45  ;;  %v7541_v44 = vld [vmem:[%s11188_s1 + $0x34c] ss:$16 sps:$4 sm:$0xff]   ;;  %v7536_v45 = vld [vmem:[%s11188_s1 + $0x340] ss:$16 sps:$4 sm:$0xff]  }
  0x2f   :  { %4925 = vmatpush1.bf16.msra.mxu0 %v7447_v46  ;;  %5484 = vmatpush1.bf16.msra.mxu1 %v7448_v47  ;;  %v7539_v46 = vld [vmem:[%s11188_s1 + $0x348] ss:$16 sps:$4 sm:$0xff]   ;;  %v7544_v47 = vld [vmem:[%s11188_s1 + $0x364] ss:$16 sps:$4 sm:$0xff]  }
  0x30   :  { %4926 = vmatprep.subr.bf16.mxu0 %v7449_v49  ;;  %5485 = vmatprep.subr.bf16.mxu1 %v7451_v50  ;;  %v7542_v49 = vld [vmem:[%s11188_s1 + $0x360] ss:$16 sps:$4 sm:$0xff]   ;;  %v7545_v50 = vld [vmem:[%s11188_s1 + $0x368] ss:$16 sps:$4 sm:$0xff]  }
  0x33   :  { %4927 = vmatpush1.bf16.msra.mxu0 %v7453_v51  ;;  %5486 = vmatpush1.bf16.msra.mxu1 %v7454_v52  ;;  %v7550_v51 = vld [vmem:[%s11188_s1 + $0x384] ss:$16 sps:$4 sm:$0xff]   ;;  %v7553_v52 = vld [vmem:[%s11188_s1 + $0x38c] ss:$16 sps:$4 sm:$0xff]  }
  0x34   :  { %4928 = vmatprep.subr.bf16.mxu0 %v7455_v53  ;;  %5487 = vmatprep.subr.bf16.mxu1 %v7457_v54  ;;  %v7548_v53 = vld [vmem:[%s11188_s1 + $0x380] ss:$16 sps:$4 sm:$0xff]   ;;  %v7551_v54 = vld [vmem:[%s11188_s1 + $0x388] ss:$16 sps:$4 sm:$0xff]  }
  0x37   :  { %4929 = vmatpush1.bf16.msra.mxu0 %v7459_v55  ;;  %5488 = vmatpush1.bf16.msra.mxu1 %v7460_v56  ;;  %v7556_v55 = vld [vmem:[%s11188_s1 + $0x3a4] ss:$16 sps:$4 sm:$0xff]   ;;  %v7559_v56 = vld [vmem:[%s11188_s1 + $0x3ac] ss:$16 sps:$4 sm:$0xff]  }
  0x38   :  { %4930 = vmatprep.subr.bf16.mxu0 %v7461_v57  ;;  %5489 = vmatprep.subr.bf16.mxu1 %v7463_v58  ;;  %v7554_v57 = vld [vmem:[%s11188_s1 + $0x3a0] ss:$16 sps:$4 sm:$0xff]   ;;  %v7557_v58 = vld [vmem:[%s11188_s1 + $0x3a8] ss:$16 sps:$4 sm:$0xff]  }
  0x3b   :  { %4931 = vmatpush1.bf16.msra.mxu0 %v7465_v59  ;;  %5490 = vmatpush1.bf16.msra.mxu1 %v7466_v60  ;;  %v7562_v59 = vld [vmem:[%s11188_s1 + $0x3c4] ss:$16 sps:$4 sm:$0xff]   ;;  %v7565_v60 = vld [vmem:[%s11188_s1 + $0x3cc] ss:$16 sps:$4 sm:$0xff]  }
  0x3c   :  { %4932 = vmatprep.subr.bf16.mxu0 %v7467_v61  ;;  %5491 = vmatprep.subr.bf16.mxu1 %v7469_v62  ;;  %v7560_v61 = vld [vmem:[%s11188_s1 + $0x3c0] ss:$16 sps:$4 sm:$0xff]   ;;  %v7563_v62 = vld [vmem:[%s11188_s1 + $0x3c8] ss:$16 sps:$4 sm:$0xff]  }
  0x3f   :  { %4933 = vmatpush1.bf16.msra.mxu0 %v7471_v63  ;;  %5492 = vmatpush1.bf16.msra.mxu1 %v7472_v0  ;;  %v7568_v63 = vld [vmem:[%s11188_s1 + $0x3e4] ss:$16 sps:$4 sm:$0xff]   ;;  %v7571_v0 = vld [vmem:[%s11188_s1 + $0x3ec] ss:$16 sps:$4 sm:$0xff]  }
  0x40   :  { %4945 = vmatprep.subr.bf16.mxu0 %v7478_v1  ;;  %5504 = vmatprep.subr.bf16.mxu1 %v7481_v2  ;;  %v7566_v1 = vld [vmem:[%s11188_s1 + $0x3e0] ss:$16 sps:$4 sm:$0xff]   ;;  %v7569_v2 = vld [vmem:[%s11188_s1 + $0x3e8] ss:$16 sps:$4 sm:$0xff]  }
  0x42   :  { %4935 = vmatmul.mubr.bf16.vlgmr.msra.gmra.mrb[0].mxu0 %v7473_v3  ;;  %5494 = vmatmul.mubr.bf16.vlgmr.msra.gmra.mrb[0].mxu1 %v7473_v3  ;;  %v7577_v3 = vld [vmem:[%s11188_s1 + $0x404] ss:$16 sps:$4 sm:$0xff]  }
  0x43   :  { %4946 = vmatpush1.bf16.msra.mxu0 %v7476_v4  ;;  %5505 = vmatpush1.bf16.msra.mxu1 %v7479_v5  ;;  %v7580_v4 = vld [vmem:[%s11188_s1 + $0x40c] ss:$16 sps:$4 sm:$0xff]  }
  0x44   :  { %4947 = vmatprep.subr.bf16.mxu0 %v7484_v6  ;;  %5506 = vmatprep.subr.bf16.mxu1 %v7487_v7  ;;  %v7572_v5 = vld [vmem:[%s11189_s0 + $0x8] ss:$100 sps:$4 sm:$0xff]   ;;  %v7575_v6 = vld [vmem:[%s11188_s1 + $0x400] ss:$16 sps:$4 sm:$0xff]  }
  0x45   :  { %4977 = vmatprep.mubr.bf16.mxu0 %v7574_v30  ;;  %5536 = vmatprep.mubr.bf16.mxu1 %v7574_v30  ;;  %v7578_v7 = vld [vmem:[%s11188_s1 + $0x408] ss:$16 sps:$4 sm:$0xff]   ;;  %v7616_v30 = vld [vmem:[%s11188_s1 + $0x4cc] ss:$16 sps:$4 sm:$0xff]  }
  0x47   :  { %4948 = vmatpush1.bf16.msra.mxu0 %v7482_v8  ;;  %5507 = vmatpush1.bf16.msra.mxu1 %v7485_v9  ;;  %v7583_v8 = vld [vmem:[%s11188_s1 + $0x424] ss:$16 sps:$4 sm:$0xff]   ;;  %v7586_v9 = vld [vmem:[%s11188_s1 + $0x42c] ss:$16 sps:$4 sm:$0xff]  }
  0x48   :  { %4949 = vmatprep.subr.bf16.mxu0 %v7490_v10  ;;  %5508 = vmatprep.subr.bf16.mxu1 %v7493_v11  ;;  %v7581_v10 = vld [vmem:[%s11188_s1 + $0x420] ss:$16 sps:$4 sm:$0xff]   ;;  %v7584_v11 = vld [vmem:[%s11188_s1 + $0x428] ss:$16 sps:$4 sm:$0xff]  }
  0x4b   :  { %4950 = vmatpush1.bf16.msra.mxu0 %v7488_v12  ;;  %5509 = vmatpush1.bf16.msra.mxu1 %v7491_v13  ;;  %v7673_v12 = vld [vmem:[%s11189_s0 + $0x14] ss:$100 sps:$4 sm:$0xff]  }
  0x4c   :  { %4951 = vmatprep.subr.bf16.mxu0 %v7496_v14  ;;  %5510 = vmatprep.subr.bf16.mxu1 %v7499_v15  ;;  %v7589_v13 = vld [vmem:[%s11188_s1 + $0x444] ss:$16 sps:$4 sm:$0xff]   ;;  %v7592_v14 = vld [vmem:[%s11188_s1 + $0x44c] ss:$16 sps:$4 sm:$0xff]   ;;  %v7587_v15 = vld [vmem:[%s11188_s1 + $0x440] ss:$16 sps:$4 sm:$0xff]  }
  0x4f   :  { %4952 = vmatpush1.bf16.msra.mxu0 %v7494_v16  ;;  %5511 = vmatpush1.bf16.msra.mxu1 %v7497_v17  ;;  %v7590_v16 = vld [vmem:[%s11188_s1 + $0x448] ss:$16 sps:$4 sm:$0xff]   ;;  %v7595_v17 = vld [vmem:[%s11188_s1 + $0x464] ss:$16 sps:$4 sm:$0xff]  }
  0x50   :  { %4953 = vmatprep.subr.bf16.mxu0 %v7502_v18  ;;  %5512 = vmatprep.subr.bf16.mxu1 %v7505_v19  ;;  %v7598_v18 = vld [vmem:[%s11188_s1 + $0x46c] ss:$16 sps:$4 sm:$0xff]   ;;  %v7593_v19 = vld [vmem:[%s11188_s1 + $0x460] ss:$16 sps:$4 sm:$0xff]  }
  0x53   :  { %4954 = vmatpush1.bf16.msra.mxu0 %v7500_v20  ;;  %5513 = vmatpush1.bf16.msra.mxu1 %v7503_v21  ;;  %v7596_v20 = vld [vmem:[%s11188_s1 + $0x468] ss:$16 sps:$4 sm:$0xff]   ;;  %v7601_v21 = vld [vmem:[%s11188_s1 + $0x484] ss:$16 sps:$4 sm:$0xff]  }
  0x54   :  { %4955 = vmatprep.subr.bf16.mxu0 %v7508_v22  ;;  %5514 = vmatprep.subr.bf16.mxu1 %v7511_v23  ;;  %v7604_v22 = vld [vmem:[%s11188_s1 + $0x48c] ss:$16 sps:$4 sm:$0xff]   ;;  %v7599_v23 = vld [vmem:[%s11188_s1 + $0x480] ss:$16 sps:$4 sm:$0xff]  }
  0x57   :  { %4956 = vmatpush1.bf16.msra.mxu0 %v7506_v24  ;;  %5515 = vmatpush1.bf16.msra.mxu1 %v7509_v25  ;;  %v7602_v24 = vld [vmem:[%s11188_s1 + $0x488] ss:$16 sps:$4 sm:$0xff]   ;;  %v7607_v25 = vld [vmem:[%s11188_s1 + $0x4a4] ss:$16 sps:$4 sm:$0xff]  }
  0x58   :  { %4957 = vmatprep.subr.bf16.mxu0 %v7514_v26  ;;  %5516 = vmatprep.subr.bf16.mxu1 %v7517_v27  ;;  %v7610_v26 = vld [vmem:[%s11188_s1 + $0x4ac] ss:$16 sps:$4 sm:$0xff]   ;;  %v7605_v27 = vld [vmem:[%s11188_s1 + $0x4a0] ss:$16 sps:$4 sm:$0xff]  }
  0x5b   :  { %4958 = vmatpush1.bf16.msra.mxu0 %v7512_v28  ;;  %5517 = vmatpush1.bf16.msra.mxu1 %v7515_v29  ;;  %v7608_v28 = vld [vmem:[%s11188_s1 + $0x4a8] ss:$16 sps:$4 sm:$0xff]   ;;  %v7613_v29 = vld [vmem:[%s11188_s1 + $0x4c4] ss:$16 sps:$4 sm:$0xff]  }
  0x5c   :  { %4959 = vmatprep.subr.bf16.mxu0 %v7520_v31  ;;  %5518 = vmatprep.subr.bf16.mxu1 %v7523_v32  ;;  %v7611_v31 = vld [vmem:[%s11188_s1 + $0x4c0] ss:$16 sps:$4 sm:$0xff]   ;;  %v7614_v32 = vld [vmem:[%s11188_s1 + $0x4c8] ss:$16 sps:$4 sm:$0xff]  }
  0x5f   :  { %4960 = vmatpush1.bf16.msra.mxu0 %v7518_v33  ;;  %5519 = vmatpush1.bf16.msra.mxu1 %v7521_v34  ;;  %v7619_v33 = vld [vmem:[%s11188_s1 + $0x4e4] ss:$16 sps:$4 sm:$0xff]   ;;  %v7622_v34 = vld [vmem:[%s11188_s1 + $0x4ec] ss:$16 sps:$4 sm:$0xff]  }
  0x60   :  { %4961 = vmatprep.subr.bf16.mxu0 %v7526_v35  ;;  %5520 = vmatprep.subr.bf16.mxu1 %v7529_v36  ;;  %v7617_v35 = vld [vmem:[%s11188_s1 + $0x4e0] ss:$16 sps:$4 sm:$0xff]   ;;  %v7620_v36 = vld [vmem:[%s11188_s1 + $0x4e8] ss:$16 sps:$4 sm:$0xff]  }
  0x63   :  { %4962 = vmatpush1.bf16.msra.mxu0 %v7524_v37  ;;  %5521 = vmatpush1.bf16.msra.mxu1 %v7527_v38  ;;  %v7625_v37 = vld [vmem:[%s11188_s1 + $0x504] ss:$16 sps:$4 sm:$0xff]   ;;  %v7628_v38 = vld [vmem:[%s11188_s1 + $0x50c] ss:$16 sps:$4 sm:$0xff]  }
  0x64   :  { %4963 = vmatprep.subr.bf16.mxu0 %v7532_v39  ;;  %5522 = vmatprep.subr.bf16.mxu1 %v7535_v40  ;;  %v7623_v39 = vld [vmem:[%s11188_s1 + $0x500] ss:$16 sps:$4 sm:$0xff]   ;;  %v7626_v40 = vld [vmem:[%s11188_s1 + $0x508] ss:$16 sps:$4 sm:$0xff]  }
  0x67   :  { %4964 = vmatpush1.bf16.msra.mxu0 %v7530_v41  ;;  %5523 = vmatpush1.bf16.msra.mxu1 %v7533_v42  ;;  %v7631_v41 = vld [vmem:[%s11188_s1 + $0x524] ss:$16 sps:$4 sm:$0xff]   ;;  %v7634_v42 = vld [vmem:[%s11188_s1 + $0x52c] ss:$16 sps:$4 sm:$0xff]  }
  0x68   :  { %4965 = vmatprep.subr.bf16.mxu0 %v7538_v43  ;;  %5524 = vmatprep.subr.bf16.mxu1 %v7541_v44  ;;  %v7629_v43 = vld [vmem:[%s11188_s1 + $0x520] ss:$16 sps:$4 sm:$0xff]   ;;  %v7632_v44 = vld [vmem:[%s11188_s1 + $0x528] ss:$16 sps:$4 sm:$0xff]  }
  0x6b   :  { %4966 = vmatpush1.bf16.msra.mxu0 %v7536_v45  ;;  %5525 = vmatpush1.bf16.msra.mxu1 %v7539_v46  ;;  %v7637_v45 = vld [vmem:[%s11188_s1 + $0x544] ss:$16 sps:$4 sm:$0xff]   ;;  %v7640_v46 = vld [vmem:[%s11188_s1 + $0x54c] ss:$16 sps:$4 sm:$0xff]  }
  0x6c   :  { %4967 = vmatprep.subr.bf16.mxu0 %v7544_v47  ;;  %5526 = vmatprep.subr.bf16.mxu1 %v7547_v48  ;;  %v7635_v47 = vld [vmem:[%s11188_s1 + $0x540] ss:$16 sps:$4 sm:$0xff]   ;;  %v7638_v48 = vld [vmem:[%s11188_s1 + $0x548] ss:$16 sps:$4 sm:$0xff]  }
  0x6f   :  { %4968 = vmatpush1.bf16.msra.mxu0 %v7542_v49  ;;  %5527 = vmatpush1.bf16.msra.mxu1 %v7545_v50  ;;  %v7643_v49 = vld [vmem:[%s11188_s1 + $0x564] ss:$16 sps:$4 sm:$0xff]   ;;  %v7646_v50 = vld [vmem:[%s11188_s1 + $0x56c] ss:$16 sps:$4 sm:$0xff]  }
  0x70   :  { %4969 = vmatprep.subr.bf16.mxu0 %v7550_v51  ;;  %5528 = vmatprep.subr.bf16.mxu1 %v7553_v52  ;;  %v7641_v51 = vld [vmem:[%s11188_s1 + $0x560] ss:$16 sps:$4 sm:$0xff]   ;;  %v7644_v52 = vld [vmem:[%s11188_s1 + $0x568] ss:$16 sps:$4 sm:$0xff]  }
  0x73   :  { %4970 = vmatpush1.bf16.msra.mxu0 %v7548_v53  ;;  %5529 = vmatpush1.bf16.msra.mxu1 %v7551_v54  ;;  %v7649_v53 = vld [vmem:[%s11188_s1 + $0x584] ss:$16 sps:$4 sm:$0xff]   ;;  %v7652_v54 = vld [vmem:[%s11188_s1 + $0x58c] ss:$16 sps:$4 sm:$0xff]  }
  0x74   :  { %4971 = vmatprep.subr.bf16.mxu0 %v7556_v55  ;;  %5530 = vmatprep.subr.bf16.mxu1 %v7559_v56  ;;  %v7647_v55 = vld [vmem:[%s11188_s1 + $0x580] ss:$16 sps:$4 sm:$0xff]   ;;  %v7650_v56 = vld [vmem:[%s11188_s1 + $0x588] ss:$16 sps:$4 sm:$0xff]  }
  0x77   :  { %4972 = vmatpush1.bf16.msra.mxu0 %v7554_v57  ;;  %5531 = vmatpush1.bf16.msra.mxu1 %v7557_v58  ;;  %v7655_v57 = vld [vmem:[%s11188_s1 + $0x5a4] ss:$16 sps:$4 sm:$0xff]   ;;  %v7658_v58 = vld [vmem:[%s11188_s1 + $0x5ac] ss:$16 sps:$4 sm:$0xff]  }
  0x78   :  { %4973 = vmatprep.subr.bf16.mxu0 %v7562_v59  ;;  %5532 = vmatprep.subr.bf16.mxu1 %v7565_v60  ;;  %v7653_v59 = vld [vmem:[%s11188_s1 + $0x5a0] ss:$16 sps:$4 sm:$0xff]   ;;  %v7656_v60 = vld [vmem:[%s11188_s1 + $0x5a8] ss:$16 sps:$4 sm:$0xff]  }
  0x7b   :  { %4974 = vmatpush1.bf16.msra.mxu0 %v7560_v61  ;;  %5533 = vmatpush1.bf16.msra.mxu1 %v7563_v62  ;;  %v7661_v61 = vld [vmem:[%s11188_s1 + $0x5c4] ss:$16 sps:$4 sm:$0xff]   ;;  %v7664_v62 = vld [vmem:[%s11188_s1 + $0x5cc] ss:$16 sps:$4 sm:$0xff]  }
  0x7c   :  { %4975 = vmatprep.subr.bf16.mxu0 %v7568_v63  ;;  %5534 = vmatprep.subr.bf16.mxu1 %v7571_v0  ;;  %v7659_v63 = vld [vmem:[%s11188_s1 + $0x5c0] ss:$16 sps:$4 sm:$0xff]   ;;  %v7662_v0 = vld [vmem:[%s11188_s1 + $0x5c8] ss:$16 sps:$4 sm:$0xff]  }
  0x7f   :  { %4976 = vmatpush1.bf16.msra.mxu0 %v7566_v1  ;;  %5535 = vmatpush1.bf16.msra.mxu1 %v7569_v2  ;;  %v7667_v1 = vld [vmem:[%s11188_s1 + $0x5e4] ss:$16 sps:$4 sm:$0xff]   ;;  %v7670_v2 = vld [vmem:[%s11188_s1 + $0x5ec] ss:$16 sps:$4 sm:$0xff]  }
  0x80   :  { %4988 = vmatprep.subr.bf16.mxu0 %v7577_v3  ;;  %5547 = vmatprep.subr.bf16.mxu1 %v7580_v4  ;;  %v7665_v3 = vld [vmem:[%s11188_s1 + $0x5e0] ss:$16 sps:$4 sm:$0xff]   ;;  %v7668_v4 = vld [vmem:[%s11188_s1 + $0x5e8] ss:$16 sps:$4 sm:$0xff]  }
  0x82   :  { %4978 = vmatmul.mubr.bf16.vlgmr.msra.gmra.mrb[0].mxu0 %v7572_v5  ;;  %5537 = vmatmul.mubr.bf16.vlgmr.msra.gmra.mrb[0].mxu1 %v7572_v5  ;;  %v7676_v5 = vld [vmem:[%s11188_s1 + $0x604] ss:$16 sps:$4 sm:$0xff]  }
  0x83   :  { %4989 = vmatpush1.bf16.msra.mxu0 %v7575_v6  ;;  %5548 = vmatpush1.bf16.msra.mxu1 %v7578_v7  ;;  %v7679_v6 = vld [vmem:[%s11188_s1 + $0x60c] ss:$16 sps:$4 sm:$0xff]   ;;  %v7671_v7 = vld [vmem:[%s11189_s0 + $0x10] ss:$100 sps:$4 sm:$0xff]  }
  0x84   :  { %4990 = vmatprep.subr.bf16.mxu0 %v7583_v8  ;;  %5549 = vmatprep.subr.bf16.mxu1 %v7586_v9  ;;  %v7674_v8 = vld [vmem:[%s11188_s1 + $0x600] ss:$16 sps:$4 sm:$0xff]   ;;  %v7677_v9 = vld [vmem:[%s11188_s1 + $0x608] ss:$16 sps:$4 sm:$0xff]  }
  0x85   :  { %5020 = vmatprep.mubr.bf16.mxu0 %v7673_v12  ;;  %5579 = vmatprep.mubr.bf16.mxu1 %v7673_v12  ;;  %v7772_v12 = vld [vmem:[%s11189_s0 + $0x1c] ss:$100 sps:$4 sm:$0xff]  }
  0x87   :  { %4991 = vmatpush1.bf16.msra.mxu0 %v7581_v10  ;;  %5550 = vmatpush1.bf16.msra.mxu1 %v7584_v11  ;;  %v7682_v10 = vld [vmem:[%s11188_s1 + $0x624] ss:$16 sps:$4 sm:$0xff]   ;;  %v7685_v11 = vld [vmem:[%s11188_s1 + $0x62c] ss:$16 sps:$4 sm:$0xff]  }
  0x88   :  { %4992 = vmatprep.subr.bf16.mxu0 %v7589_v13  ;;  %5551 = vmatprep.subr.bf16.mxu1 %v7592_v14  ;;  %v7680_v13 = vld [vmem:[%s11188_s1 + $0x620] ss:$16 sps:$4 sm:$0xff]   ;;  %v7683_v14 = vld [vmem:[%s11188_s1 + $0x628] ss:$16 sps:$4 sm:$0xff]  }
  0x8b   :  { %4993 = vmatpush1.bf16.msra.mxu0 %v7587_v15  ;;  %5552 = vmatpush1.bf16.msra.mxu1 %v7590_v16  ;;  %v7688_v15 = vld [vmem:[%s11188_s1 + $0x644] ss:$16 sps:$4 sm:$0xff]   ;;  %v7691_v16 = vld [vmem:[%s11188_s1 + $0x64c] ss:$16 sps:$4 sm:$0xff]  }
  0x8c   :  { %4994 = vmatprep.subr.bf16.mxu0 %v7595_v17  ;;  %5553 = vmatprep.subr.bf16.mxu1 %v7598_v18  ;;  %v7686_v17 = vld [vmem:[%s11188_s1 + $0x640] ss:$16 sps:$4 sm:$0xff]   ;;  %v7689_v18 = vld [vmem:[%s11188_s1 + $0x648] ss:$16 sps:$4 sm:$0xff]  }
  0x8f   :  { %4995 = vmatpush1.bf16.msra.mxu0 %v7593_v19  ;;  %5554 = vmatpush1.bf16.msra.mxu1 %v7596_v20  ;;  %v7694_v19 = vld [vmem:[%s11188_s1 + $0x664] ss:$16 sps:$4 sm:$0xff]   ;;  %v7697_v20 = vld [vmem:[%s11188_s1 + $0x66c] ss:$16 sps:$4 sm:$0xff]  }
  0x90   :  { %4996 = vmatprep.subr.bf16.mxu0 %v7601_v21  ;;  %5555 = vmatprep.subr.bf16.mxu1 %v7604_v22  ;;  %v7692_v21 = vld [vmem:[%s11188_s1 + $0x660] ss:$16 sps:$4 sm:$0xff]   ;;  %v7695_v22 = vld [vmem:[%s11188_s1 + $0x668] ss:$16 sps:$4 sm:$0xff]  }
  0x93   :  { %4997 = vmatpush1.bf16.msra.mxu0 %v7599_v23  ;;  %5556 = vmatpush1.bf16.msra.mxu1 %v7602_v24  ;;  %v7700_v23 = vld [vmem:[%s11188_s1 + $0x684] ss:$16 sps:$4 sm:$0xff]   ;;  %v7703_v24 = vld [vmem:[%s11188_s1 + $0x68c] ss:$16 sps:$4 sm:$0xff]  }
  0x94   :  { %4998 = vmatprep.subr.bf16.mxu0 %v7607_v25  ;;  %5557 = vmatprep.subr.bf16.mxu1 %v7610_v26  ;;  %v7698_v25 = vld [vmem:[%s11188_s1 + $0x680] ss:$16 sps:$4 sm:$0xff]   ;;  %v7701_v26 = vld [vmem:[%s11188_s1 + $0x688] ss:$16 sps:$4 sm:$0xff]  }
  0x97   :  { %4999 = vmatpush1.bf16.msra.mxu0 %v7605_v27  ;;  %5558 = vmatpush1.bf16.msra.mxu1 %v7608_v28  ;;  %v7706_v27 = vld [vmem:[%s11188_s1 + $0x6a4] ss:$16 sps:$4 sm:$0xff]   ;;  %v7709_v28 = vld [vmem:[%s11188_s1 + $0x6ac] ss:$16 sps:$4 sm:$0xff]  }
  0x98   :  { %5000 = vmatprep.subr.bf16.mxu0 %v7613_v29  ;;  %5559 = vmatprep.subr.bf16.mxu1 %v7616_v30  ;;  %v7704_v29 = vld [vmem:[%s11188_s1 + $0x6a0] ss:$16 sps:$4 sm:$0xff]   ;;  %v7707_v30 = vld [vmem:[%s11188_s1 + $0x6a8] ss:$16 sps:$4 sm:$0xff]  }
  0x9b   :  { %5001 = vmatpush1.bf16.msra.mxu0 %v7611_v31  ;;  %5560 = vmatpush1.bf16.msra.mxu1 %v7614_v32  ;;  %v7712_v31 = vld [vmem:[%s11188_s1 + $0x6c4] ss:$16 sps:$4 sm:$0xff]   ;;  %v7715_v32 = vld [vmem:[%s11188_s1 + $0x6cc] ss:$16 sps:$4 sm:$0xff]  }
  0x9c   :  { %5002 = vmatprep.subr.bf16.mxu0 %v7619_v33  ;;  %5561 = vmatprep.subr.bf16.mxu1 %v7622_v34  ;;  %v7710_v33 = vld [vmem:[%s11188_s1 + $0x6c0] ss:$16 sps:$4 sm:$0xff]   ;;  %v7713_v34 = vld [vmem:[%s11188_s1 + $0x6c8] ss:$16 sps:$4 sm:$0xff]  }
  0x9f   :  { %5003 = vmatpush1.bf16.msra.mxu0 %v7617_v35  ;;  %5562 = vmatpush1.bf16.msra.mxu1 %v7620_v36  ;;  %v7718_v35 = vld [vmem:[%s11188_s1 + $0x6e4] ss:$16 sps:$4 sm:$0xff]   ;;  %v7721_v36 = vld [vmem:[%s11188_s1 + $0x6ec] ss:$16 sps:$4 sm:$0xff]  }
  0xa0   :  { %5004 = vmatprep.subr.bf16.mxu0 %v7625_v37  ;;  %5563 = vmatprep.subr.bf16.mxu1 %v7628_v38  ;;  %v7716_v37 = vld [vmem:[%s11188_s1 + $0x6e0] ss:$16 sps:$4 sm:$0xff]   ;;  %v7719_v38 = vld [vmem:[%s11188_s1 + $0x6e8] ss:$16 sps:$4 sm:$0xff]  }
  0xa3   :  { %5005 = vmatpush1.bf16.msra.mxu0 %v7623_v39  ;;  %5564 = vmatpush1.bf16.msra.mxu1 %v7626_v40  ;;  %v7724_v39 = vld [vmem:[%s11188_s1 + $0x704] ss:$16 sps:$4 sm:$0xff]   ;;  %v7727_v40 = vld [vmem:[%s11188_s1 + $0x70c] ss:$16 sps:$4 sm:$0xff]  }
  0xa4   :  { %5006 = vmatprep.subr.bf16.mxu0 %v7631_v41  ;;  %5565 = vmatprep.subr.bf16.mxu1 %v7634_v42  ;;  %v7722_v41 = vld [vmem:[%s11188_s1 + $0x700] ss:$16 sps:$4 sm:$0xff]   ;;  %v7725_v42 = vld [vmem:[%s11188_s1 + $0x708] ss:$16 sps:$4 sm:$0xff]  }
  0xa7   :  { %5007 = vmatpush1.bf16.msra.mxu0 %v7629_v43  ;;  %5566 = vmatpush1.bf16.msra.mxu1 %v7632_v44  ;;  %v7730_v43 = vld [vmem:[%s11188_s1 + $0x724] ss:$16 sps:$4 sm:$0xff]   ;;  %v7733_v44 = vld [vmem:[%s11188_s1 + $0x72c] ss:$16 sps:$4 sm:$0xff]  }
  0xa8   :  { %5008 = vmatprep.subr.bf16.mxu0 %v7637_v45  ;;  %5567 = vmatprep.subr.bf16.mxu1 %v7640_v46  ;;  %v7728_v45 = vld [vmem:[%s11188_s1 + $0x720] ss:$16 sps:$4 sm:$0xff]   ;;  %v7731_v46 = vld [vmem:[%s11188_s1 + $0x728] ss:$16 sps:$4 sm:$0xff]  }
  0xab   :  { %5009 = vmatpush1.bf16.msra.mxu0 %v7635_v47  ;;  %5568 = vmatpush1.bf16.msra.mxu1 %v7638_v48  ;;  %v7736_v47 = vld [vmem:[%s11188_s1 + $0x744] ss:$16 sps:$4 sm:$0xff]   ;;  %v7739_v48 = vld [vmem:[%s11188_s1 + $0x74c] ss:$16 sps:$4 sm:$0xff]  }
  0xac   :  { %5010 = vmatprep.subr.bf16.mxu0 %v7643_v49  ;;  %5569 = vmatprep.subr.bf16.mxu1 %v7646_v50  ;;  %v7734_v49 = vld [vmem:[%s11188_s1 + $0x740] ss:$16 sps:$4 sm:$0xff]   ;;  %v7737_v50 = vld [vmem:[%s11188_s1 + $0x748] ss:$16 sps:$4 sm:$0xff]  }
  0xaf   :  { %5011 = vmatpush1.bf16.msra.mxu0 %v7641_v51  ;;  %5570 = vmatpush1.bf16.msra.mxu1 %v7644_v52  ;;  %v7742_v51 = vld [vmem:[%s11188_s1 + $0x764] ss:$16 sps:$4 sm:$0xff]   ;;  %v7745_v52 = vld [vmem:[%s11188_s1 + $0x76c] ss:$16 sps:$4 sm:$0xff]  }
  0xb0   :  { %5012 = vmatprep.subr.bf16.mxu0 %v7649_v53  ;;  %5571 = vmatprep.subr.bf16.mxu1 %v7652_v54  ;;  %v7740_v53 = vld [vmem:[%s11188_s1 + $0x760] ss:$16 sps:$4 sm:$0xff]   ;;  %v7743_v54 = vld [vmem:[%s11188_s1 + $0x768] ss:$16 sps:$4 sm:$0xff]  }
  0xb3   :  { %5013 = vmatpush1.bf16.msra.mxu0 %v7647_v55  ;;  %5572 = vmatpush1.bf16.msra.mxu1 %v7650_v56  ;;  %v7748_v55 = vld [vmem:[%s11188_s1 + $0x784] ss:$16 sps:$4 sm:$0xff]   ;;  %v7751_v56 = vld [vmem:[%s11188_s1 + $0x78c] ss:$16 sps:$4 sm:$0xff]  }
  0xb4   :  { %5014 = vmatprep.subr.bf16.mxu0 %v7655_v57  ;;  %5573 = vmatprep.subr.bf16.mxu1 %v7658_v58  ;;  %v7746_v57 = vld [vmem:[%s11188_s1 + $0x780] ss:$16 sps:$4 sm:$0xff]   ;;  %v7749_v58 = vld [vmem:[%s11188_s1 + $0x788] ss:$16 sps:$4 sm:$0xff]  }
  0xb7   :  { %5015 = vmatpush1.bf16.msra.mxu0 %v7653_v59  ;;  %5574 = vmatpush1.bf16.msra.mxu1 %v7656_v60  ;;  %v7754_v59 = vld [vmem:[%s11188_s1 + $0x7a4] ss:$16 sps:$4 sm:$0xff]   ;;  %v7757_v60 = vld [vmem:[%s11188_s1 + $0x7ac] ss:$16 sps:$4 sm:$0xff]  }
  0xb8   :  { %5016 = vmatprep.subr.bf16.mxu0 %v7661_v61  ;;  %5575 = vmatprep.subr.bf16.mxu1 %v7664_v62  ;;  %v7752_v61 = vld [vmem:[%s11188_s1 + $0x7a0] ss:$16 sps:$4 sm:$0xff]   ;;  %v7755_v62 = vld [vmem:[%s11188_s1 + $0x7a8] ss:$16 sps:$4 sm:$0xff]  }
  0xbb   :  { %5017 = vmatpush1.bf16.msra.mxu0 %v7659_v63  ;;  %5576 = vmatpush1.bf16.msra.mxu1 %v7662_v0  ;;  %v7760_v63 = vld [vmem:[%s11188_s1 + $0x7c4] ss:$16 sps:$4 sm:$0xff]   ;;  %v7763_v0 = vld [vmem:[%s11188_s1 + $0x7cc] ss:$16 sps:$4 sm:$0xff]  }
  0xbc   :  { %5018 = vmatprep.subr.bf16.mxu0 %v7667_v1  ;;  %5577 = vmatprep.subr.bf16.mxu1 %v7670_v2  ;;  %v7758_v1 = vld [vmem:[%s11188_s1 + $0x7c0] ss:$16 sps:$4 sm:$0xff]   ;;  %v7761_v2 = vld [vmem:[%s11188_s1 + $0x7c8] ss:$16 sps:$4 sm:$0xff]  }
  0xbf   :  { %5019 = vmatpush1.bf16.msra.mxu0 %v7665_v3  ;;  %5578 = vmatpush1.bf16.msra.mxu1 %v7668_v4  ;;  %v7766_v3 = vld [vmem:[%s11188_s1 + $0x7e4] ss:$16 sps:$4 sm:$0xff]   ;;  %v7769_v4 = vld [vmem:[%s11188_s1 + $0x7ec] ss:$16 sps:$4 sm:$0xff]  }
  0xc0   :  { %5031 = vmatprep.subr.bf16.mxu0 %v7676_v5  ;;  %5590 = vmatprep.subr.bf16.mxu1 %v7679_v6  ;;  %v7764_v5 = vld [vmem:[%s11188_s1 + $0x7e0] ss:$16 sps:$4 sm:$0xff]   ;;  %v7767_v6 = vld [vmem:[%s11188_s1 + $0x7e8] ss:$16 sps:$4 sm:$0xff]  }
  0xc2   :  { %5021 = vmatmul.mubr.bf16.vlgmr.msra.gmra.mrb[0].mxu0 %v7671_v7  ;;  %5580 = vmatmul.mubr.bf16.vlgmr.msra.gmra.mrb[0].mxu1 %v7671_v7  ;;  %v7775_v7 = vld [vmem:[%s11188_s1 + $0x804] ss:$16 sps:$4 sm:$0xff]  }
  0xc3   :  { %5032 = vmatpush1.bf16.msra.mxu0 %v7674_v8  ;;  %5591 = vmatpush1.bf16.msra.mxu1 %v7677_v9  ;;  %v7778_v8 = vld [vmem:[%s11188_s1 + $0x80c] ss:$16 sps:$4 sm:$0xff]  }
  0xc4   :  { %5033 = vmatprep.subr.bf16.mxu0 %v7682_v10  ;;  %5592 = vmatprep.subr.bf16.mxu1 %v7685_v11  ;;  %v7770_v9 = vld [vmem:[%s11189_s0 + $0x18] ss:$100 sps:$4 sm:$0xff]   ;;  %v7773_v10 = vld [vmem:[%s11188_s1 + $0x800] ss:$16 sps:$4 sm:$0xff]  }
  0xc5   :  { %5063 = vmatprep.mubr.bf16.mxu0 %v7772_v12  ;;  %5622 = vmatprep.mubr.bf16.mxu1 %v7772_v12  ;;  %v7776_v11 = vld [vmem:[%s11188_s1 + $0x808] ss:$16 sps:$4 sm:$0xff]   ;;  %v7781_v12 = vld [vmem:[%s11188_s1 + $0x824] ss:$16 sps:$4 sm:$0xff]  }
  0xc7   :  { %5034 = vmatpush1.bf16.msra.mxu0 %v7680_v13  ;;  %5593 = vmatpush1.bf16.msra.mxu1 %v7683_v14  ;;  %v7784_v13 = vld [vmem:[%s11188_s1 + $0x82c] ss:$16 sps:$4 sm:$0xff]   ;;  %v7871_v14 = vld [vmem:[%s11189_s0 + $0x24] ss:$100 sps:$4 sm:$0xff]  }
  0xc8   :  { %5035 = vmatprep.subr.bf16.mxu0 %v7688_v15  ;;  %5594 = vmatprep.subr.bf16.mxu1 %v7691_v16  ;;  %v7779_v15 = vld [vmem:[%s11188_s1 + $0x820] ss:$16 sps:$4 sm:$0xff]   ;;  %v7782_v16 = vld [vmem:[%s11188_s1 + $0x828] ss:$16 sps:$4 sm:$0xff]  }
  0xcb   :  { %5036 = vmatpush1.bf16.msra.mxu0 %v7686_v17  ;;  %5595 = vmatpush1.bf16.msra.mxu1 %v7689_v18  ;;  %v7787_v17 = vld [vmem:[%s11188_s1 + $0x844] ss:$16 sps:$4 sm:$0xff]   ;;  %v7790_v18 = vld [vmem:[%s11188_s1 + $0x84c] ss:$16 sps:$4 sm:$0xff]  }
  0xcc   :  { %5037 = vmatprep.subr.bf16.mxu0 %v7694_v19  ;;  %5596 = vmatprep.subr.bf16.mxu1 %v7697_v20  ;;  %v7785_v19 = vld [vmem:[%s11188_s1 + $0x840] ss:$16 sps:$4 sm:$0xff]   ;;  %v7788_v20 = vld [vmem:[%s11188_s1 + $0x848] ss:$16 sps:$4 sm:$0xff]  }
  0xcf   :  { %5038 = vmatpush1.bf16.msra.mxu0 %v7692_v21  ;;  %5597 = vmatpush1.bf16.msra.mxu1 %v7695_v22  ;;  %v7793_v21 = vld [vmem:[%s11188_s1 + $0x864] ss:$16 sps:$4 sm:$0xff]   ;;  %v7796_v22 = vld [vmem:[%s11188_s1 + $0x86c] ss:$16 sps:$4 sm:$0xff]  }
  0xd0   :  { %5039 = vmatprep.subr.bf16.mxu0 %v7700_v23  ;;  %5598 = vmatprep.subr.bf16.mxu1 %v7703_v24  ;;  %v7791_v23 = vld [vmem:[%s11188_s1 + $0x860] ss:$16 sps:$4 sm:$0xff]   ;;  %v7794_v24 = vld [vmem:[%s11188_s1 + $0x868] ss:$16 sps:$4 sm:$0xff]  }
  0xd3   :  { %5040 = vmatpush1.bf16.msra.mxu0 %v7698_v25  ;;  %5599 = vmatpush1.bf16.msra.mxu1 %v7701_v26  ;;  %v7799_v25 = vld [vmem:[%s11188_s1 + $0x884] ss:$16 sps:$4 sm:$0xff]   ;;  %v7802_v26 = vld [vmem:[%s11188_s1 + $0x88c] ss:$16 sps:$4 sm:$0xff]  }
  0xd4   :  { %5041 = vmatprep.subr.bf16.mxu0 %v7706_v27  ;;  %5600 = vmatprep.subr.bf16.mxu1 %v7709_v28  ;;  %v7797_v27 = vld [vmem:[%s11188_s1 + $0x880] ss:$16 sps:$4 sm:$0xff]   ;;  %v7800_v28 = vld [vmem:[%s11188_s1 + $0x888] ss:$16 sps:$4 sm:$0xff]  }
  0xd7   :  { %5042 = vmatpush1.bf16.msra.mxu0 %v7704_v29  ;;  %5601 = vmatpush1.bf16.msra.mxu1 %v7707_v30  ;;  %v7805_v29 = vld [vmem:[%s11188_s1 + $0x8a4] ss:$16 sps:$4 sm:$0xff]   ;;  %v7808_v30 = vld [vmem:[%s11188_s1 + $0x8ac] ss:$16 sps:$4 sm:$0xff]  }
  0xd8   :  { %5043 = vmatprep.subr.bf16.mxu0 %v7712_v31  ;;  %5602 = vmatprep.subr.bf16.mxu1 %v7715_v32  ;;  %v7803_v31 = vld [vmem:[%s11188_s1 + $0x8a0] ss:$16 sps:$4 sm:$0xff]   ;;  %v7806_v32 = vld [vmem:[%s11188_s1 + $0x8a8] ss:$16 sps:$4 sm:$0xff]  }
  0xdb   :  { %5044 = vmatpush1.bf16.msra.mxu0 %v7710_v33  ;;  %5603 = vmatpush1.bf16.msra.mxu1 %v7713_v34  ;;  %v7811_v33 = vld [vmem:[%s11188_s1 + $0x8c4] ss:$16 sps:$4 sm:$0xff]   ;;  %v7814_v34 = vld [vmem:[%s11188_s1 + $0x8cc] ss:$16 sps:$4 sm:$0xff]  }
  0xdc   :  { %5045 = vmatprep.subr.bf16.mxu0 %v7718_v35  ;;  %5604 = vmatprep.subr.bf16.mxu1 %v7721_v36  ;;  %v7809_v35 = vld [vmem:[%s11188_s1 + $0x8c0] ss:$16 sps:$4 sm:$0xff]   ;;  %v7812_v36 = vld [vmem:[%s11188_s1 + $0x8c8] ss:$16 sps:$4 sm:$0xff]  }
  0xdf   :  { %5046 = vmatpush1.bf16.msra.mxu0 %v7716_v37  ;;  %5605 = vmatpush1.bf16.msra.mxu1 %v7719_v38  ;;  %v7817_v37 = vld [vmem:[%s11188_s1 + $0x8e4] ss:$16 sps:$4 sm:$0xff]   ;;  %v7820_v38 = vld [vmem:[%s11188_s1 + $0x8ec] ss:$16 sps:$4 sm:$0xff]  }
  0xe0   :  { %5047 = vmatprep.subr.bf16.mxu0 %v7724_v39  ;;  %5606 = vmatprep.subr.bf16.mxu1 %v7727_v40  ;;  %v7815_v39 = vld [vmem:[%s11188_s1 + $0x8e0] ss:$16 sps:$4 sm:$0xff]   ;;  %v7818_v40 = vld [vmem:[%s11188_s1 + $0x8e8] ss:$16 sps:$4 sm:$0xff]  }
  0xe3   :  { %5048 = vmatpush1.bf16.msra.mxu0 %v7722_v41  ;;  %5607 = vmatpush1.bf16.msra.mxu1 %v7725_v42  ;;  %v7823_v41 = vld [vmem:[%s11188_s1 + $0x904] ss:$16 sps:$4 sm:$0xff]   ;;  %v7826_v42 = vld [vmem:[%s11188_s1 + $0x90c] ss:$16 sps:$4 sm:$0xff]  }
  0xe4   :  { %5049 = vmatprep.subr.bf16.mxu0 %v7730_v43  ;;  %5608 = vmatprep.subr.bf16.mxu1 %v7733_v44  ;;  %v7821_v43 = vld [vmem:[%s11188_s1 + $0x900] ss:$16 sps:$4 sm:$0xff]   ;;  %v7824_v44 = vld [vmem:[%s11188_s1 + $0x908] ss:$16 sps:$4 sm:$0xff]  }
  0xe7   :  { %5050 = vmatpush1.bf16.msra.mxu0 %v7728_v45  ;;  %5609 = vmatpush1.bf16.msra.mxu1 %v7731_v46  ;;  %v7829_v45 = vld [vmem:[%s11188_s1 + $0x924] ss:$16 sps:$4 sm:$0xff]   ;;  %v7832_v46 = vld [vmem:[%s11188_s1 + $0x92c] ss:$16 sps:$4 sm:$0xff]  }
  0xe8   :  { %5051 = vmatprep.subr.bf16.mxu0 %v7736_v47  ;;  %5610 = vmatprep.subr.bf16.mxu1 %v7739_v48  ;;  %v7827_v47 = vld [vmem:[%s11188_s1 + $0x920] ss:$16 sps:$4 sm:$0xff]   ;;  %v7830_v48 = vld [vmem:[%s11188_s1 + $0x928] ss:$16 sps:$4 sm:$0xff]  }
  0xeb   :  { %5052 = vmatpush1.bf16.msra.mxu0 %v7734_v49  ;;  %5611 = vmatpush1.bf16.msra.mxu1 %v7737_v50  ;;  %v7835_v49 = vld [vmem:[%s11188_s1 + $0x944] ss:$16 sps:$4 sm:$0xff]   ;;  %v7838_v50 = vld [vmem:[%s11188_s1 + $0x94c] ss:$16 sps:$4 sm:$0xff]  }
  0xec   :  { %5053 = vmatprep.subr.bf16.mxu0 %v7742_v51  ;;  %5612 = vmatprep.subr.bf16.mxu1 %v7745_v52  ;;  %v7833_v51 = vld [vmem:[%s11188_s1 + $0x940] ss:$16 sps:$4 sm:$0xff]   ;;  %v7836_v52 = vld [vmem:[%s11188_s1 + $0x948] ss:$16 sps:$4 sm:$0xff]  }
  0xef   :  { %5054 = vmatpush1.bf16.msra.mxu0 %v7740_v53  ;;  %5613 = vmatpush1.bf16.msra.mxu1 %v7743_v54  ;;  %v7841_v53 = vld [vmem:[%s11188_s1 + $0x964] ss:$16 sps:$4 sm:$0xff]   ;;  %v7844_v54 = vld [vmem:[%s11188_s1 + $0x96c] ss:$16 sps:$4 sm:$0xff]  }
  0xf0   :  { %5055 = vmatprep.subr.bf16.mxu0 %v7748_v55  ;;  %5614 = vmatprep.subr.bf16.mxu1 %v7751_v56  ;;  %v7839_v55 = vld [vmem:[%s11188_s1 + $0x960] ss:$16 sps:$4 sm:$0xff]   ;;  %v7842_v56 = vld [vmem:[%s11188_s1 + $0x968] ss:$16 sps:$4 sm:$0xff]  }
  0xf3   :  { %5056 = vmatpush1.bf16.msra.mxu0 %v7746_v57  ;;  %5615 = vmatpush1.bf16.msra.mxu1 %v7749_v58  ;;  %v7847_v57 = vld [vmem:[%s11188_s1 + $0x984] ss:$16 sps:$4 sm:$0xff]   ;;  %v7850_v58 = vld [vmem:[%s11188_s1 + $0x98c] ss:$16 sps:$4 sm:$0xff]  }
  0xf4   :  { %5057 = vmatprep.subr.bf16.mxu0 %v7754_v59  ;;  %5616 = vmatprep.subr.bf16.mxu1 %v7757_v60  ;;  %v7845_v59 = vld [vmem:[%s11188_s1 + $0x980] ss:$16 sps:$4 sm:$0xff]   ;;  %v7848_v60 = vld [vmem:[%s11188_s1 + $0x988] ss:$16 sps:$4 sm:$0xff]  }
  0xf7   :  { %5058 = vmatpush1.bf16.msra.mxu0 %v7752_v61  ;;  %5617 = vmatpush1.bf16.msra.mxu1 %v7755_v62  ;;  %v7853_v61 = vld [vmem:[%s11188_s1 + $0x9a4] ss:$16 sps:$4 sm:$0xff]   ;;  %v7856_v62 = vld [vmem:[%s11188_s1 + $0x9ac] ss:$16 sps:$4 sm:$0xff]  }
  0xf8   :  { %5059 = vmatprep.subr.bf16.mxu0 %v7760_v63  ;;  %5618 = vmatprep.subr.bf16.mxu1 %v7763_v0  ;;  %v7851_v63 = vld [vmem:[%s11188_s1 + $0x9a0] ss:$16 sps:$4 sm:$0xff]   ;;  %v7854_v0 = vld [vmem:[%s11188_s1 + $0x9a8] ss:$16 sps:$4 sm:$0xff]  }
  0xfb   :  { %5060 = vmatpush1.bf16.msra.mxu0 %v7758_v1  ;;  %5619 = vmatpush1.bf16.msra.mxu1 %v7761_v2  ;;  %v7859_v1 = vld [vmem:[%s11188_s1 + $0x9c4] ss:$16 sps:$4 sm:$0xff]   ;;  %v7862_v2 = vld [vmem:[%s11188_s1 + $0x9cc] ss:$16 sps:$4 sm:$0xff]  }
  0xfc   :  { %5061 = vmatprep.subr.bf16.mxu0 %v7766_v3  ;;  %5620 = vmatprep.subr.bf16.mxu1 %v7769_v4  ;;  %v7857_v3 = vld [vmem:[%s11188_s1 + $0x9c0] ss:$16 sps:$4 sm:$0xff]   ;;  %v7860_v4 = vld [vmem:[%s11188_s1 + $0x9c8] ss:$16 sps:$4 sm:$0xff]  }
  0xff   :  { %5062 = vmatpush1.bf16.msra.mxu0 %v7764_v5  ;;  %5621 = vmatpush1.bf16.msra.mxu1 %v7767_v6  ;;  %v7865_v5 = vld [vmem:[%s11188_s1 + $0x9e4] ss:$16 sps:$4 sm:$0xff]   ;;  %v7868_v6 = vld [vmem:[%s11188_s1 + $0x9ec] ss:$16 sps:$4 sm:$0xff]  }
 0x100   :  { %5074 = vmatprep.subr.bf16.mxu0 %v7775_v7  ;;  %5633 = vmatprep.subr.bf16.mxu1 %v7778_v8  ;;  %v7863_v7 = vld [vmem:[%s11188_s1 + $0x9e0] ss:$16 sps:$4 sm:$0xff]   ;;  %v7866_v8 = vld [vmem:[%s11188_s1 + $0x9e8] ss:$16 sps:$4 sm:$0xff]  }
 0x102   :  { %5064 = vmatmul.mubr.bf16.vlgmr.msra.gmra.mrb[0].mxu0 %v7770_v9  ;;  %5623 = vmatmul.mubr.bf16.vlgmr.msra.gmra.mrb[0].mxu1 %v7770_v9  ;;  %v7869_v9 = vld [vmem:[%s11189_s0 + $0x20] ss:$100 sps:$4 sm:$0xff]  }
 0x103   :  { %5075 = vmatpush1.bf16.msra.mxu0 %v7773_v10  ;;  %5634 = vmatpush1.bf16.msra.mxu1 %v7776_v11  ;;  %v7874_v10 = vld [vmem:[%s11188_s1 + $0xa04] ss:$16 sps:$4 sm:$0xff]   ;;  %v7877_v11 = vld [vmem:[%s11188_s1 + $0xa0c] ss:$16 sps:$4 sm:$0xff]  }
 0x104   :  { %5076 = vmatprep.subr.bf16.mxu0 %v7781_v12  ;;  %5635 = vmatprep.subr.bf16.mxu1 %v7784_v13  ;;  %v7872_v12 = vld [vmem:[%s11188_s1 + $0xa00] ss:$16 sps:$4 sm:$0xff]   ;;  %v7875_v13 = vld [vmem:[%s11188_s1 + $0xa08] ss:$16 sps:$4 sm:$0xff]  }
 0x105   :  { %5106 = vmatprep.mubr.bf16.mxu0 %v7871_v14  ;;  %5665 = vmatprep.mubr.bf16.mxu1 %v7871_v14  ;;  %v7880_v14 = vld [vmem:[%s11188_s1 + $0xa24] ss:$16 sps:$4 sm:$0xff]  }
 0x107   :  { %5077 = vmatpush1.bf16.msra.mxu0 %v7779_v15  ;;  %5636 = vmatpush1.bf16.msra.mxu1 %v7782_v16  ;;  %v7883_v15 = vld [vmem:[%s11188_s1 + $0xa2c] ss:$16 sps:$4 sm:$0xff]  }
 0x108   :  { %5078 = vmatprep.subr.bf16.mxu0 %v7787_v17  ;;  %5637 = vmatprep.subr.bf16.mxu1 %v7790_v18  ;;  %v7970_v16 = vld [vmem:[%s11189_s0 + $0x2c] ss:$100 sps:$4 sm:$0xff]   ;;  %v7881_v18 = vld [vmem:[%s11188_s1 + $0xa28] ss:$16 sps:$4 sm:$0xff]  }
 0x109   :  { %v7878_v17 = vld [vmem:[%s11188_s1 + $0xa20] ss:$16 sps:$4 sm:$0xff]  }
 0x10b   :  { %5079 = vmatpush1.bf16.msra.mxu0 %v7785_v19  ;;  %5638 = vmatpush1.bf16.msra.mxu1 %v7788_v20  ;;  %v7886_v19 = vld [vmem:[%s11188_s1 + $0xa44] ss:$16 sps:$4 sm:$0xff]   ;;  %v7889_v20 = vld [vmem:[%s11188_s1 + $0xa4c] ss:$16 sps:$4 sm:$0xff]  }
 0x10c   :  { %5080 = vmatprep.subr.bf16.mxu0 %v7793_v21  ;;  %5639 = vmatprep.subr.bf16.mxu1 %v7796_v22  ;;  %v7884_v21 = vld [vmem:[%s11188_s1 + $0xa40] ss:$16 sps:$4 sm:$0xff]   ;;  %v7887_v22 = vld [vmem:[%s11188_s1 + $0xa48] ss:$16 sps:$4 sm:$0xff]  }
 0x10f   :  { %5081 = vmatpush1.bf16.msra.mxu0 %v7791_v23  ;;  %5640 = vmatpush1.bf16.msra.mxu1 %v7794_v24  ;;  %v7892_v23 = vld [vmem:[%s11188_s1 + $0xa64] ss:$16 sps:$4 sm:$0xff]   ;;  %v7895_v24 = vld [vmem:[%s11188_s1 + $0xa6c] ss:$16 sps:$4 sm:$0xff]  }
 0x110   :  { %5082 = vmatprep.subr.bf16.mxu0 %v7799_v25  ;;  %5641 = vmatprep.subr.bf16.mxu1 %v7802_v26  ;;  %v7890_v25 = vld [vmem:[%s11188_s1 + $0xa60] ss:$16 sps:$4 sm:$0xff]   ;;  %v7893_v26 = vld [vmem:[%s11188_s1 + $0xa68] ss:$16 sps:$4 sm:$0xff]  }
 0x113   :  { %5083 = vmatpush1.bf16.msra.mxu0 %v7797_v27  ;;  %5642 = vmatpush1.bf16.msra.mxu1 %v7800_v28  ;;  %v7898_v27 = vld [vmem:[%s11188_s1 + $0xa84] ss:$16 sps:$4 sm:$0xff]   ;;  %v7901_v28 = vld [vmem:[%s11188_s1 + $0xa8c] ss:$16 sps:$4 sm:$0xff]  }
 0x114   :  { %5084 = vmatprep.subr.bf16.mxu0 %v7805_v29  ;;  %5643 = vmatprep.subr.bf16.mxu1 %v7808_v30  ;;  %v7896_v29 = vld [vmem:[%s11188_s1 + $0xa80] ss:$16 sps:$4 sm:$0xff]   ;;  %v7899_v30 = vld [vmem:[%s11188_s1 + $0xa88] ss:$16 sps:$4 sm:$0xff]  }
 0x117   :  { %5085 = vmatpush1.bf16.msra.mxu0 %v7803_v31  ;;  %5644 = vmatpush1.bf16.msra.mxu1 %v7806_v32  ;;  %v7904_v31 = vld [vmem:[%s11188_s1 + $0xaa4] ss:$16 sps:$4 sm:$0xff]   ;;  %v7907_v32 = vld [vmem:[%s11188_s1 + $0xaac] ss:$16 sps:$4 sm:$0xff]  }
 0x118   :  { %5086 = vmatprep.subr.bf16.mxu0 %v7811_v33  ;;  %5645 = vmatprep.subr.bf16.mxu1 %v7814_v34  ;;  %v7902_v33 = vld [vmem:[%s11188_s1 + $0xaa0] ss:$16 sps:$4 sm:$0xff]   ;;  %v7905_v34 = vld [vmem:[%s11188_s1 + $0xaa8] ss:$16 sps:$4 sm:$0xff]  }
 0x11b   :  { %5087 = vmatpush1.bf16.msra.mxu0 %v7809_v35  ;;  %5646 = vmatpush1.bf16.msra.mxu1 %v7812_v36  ;;  %v7910_v35 = vld [vmem:[%s11188_s1 + $0xac4] ss:$16 sps:$4 sm:$0xff]   ;;  %v7913_v36 = vld [vmem:[%s11188_s1 + $0xacc] ss:$16 sps:$4 sm:$0xff]  }
 0x11c   :  { %5088 = vmatprep.subr.bf16.mxu0 %v7817_v37  ;;  %5647 = vmatprep.subr.bf16.mxu1 %v7820_v38  ;;  %v7908_v37 = vld [vmem:[%s11188_s1 + $0xac0] ss:$16 sps:$4 sm:$0xff]   ;;  %v7911_v38 = vld [vmem:[%s11188_s1 + $0xac8] ss:$16 sps:$4 sm:$0xff]  }
 0x11f   :  { %5089 = vmatpush1.bf16.msra.mxu0 %v7815_v39  ;;  %5648 = vmatpush1.bf16.msra.mxu1 %v7818_v40  ;;  %v7916_v39 = vld [vmem:[%s11188_s1 + $0xae4] ss:$16 sps:$4 sm:$0xff]   ;;  %v7919_v40 = vld [vmem:[%s11188_s1 + $0xaec] ss:$16 sps:$4 sm:$0xff]  }
 0x120   :  { %5090 = vmatprep.subr.bf16.mxu0 %v7823_v41  ;;  %5649 = vmatprep.subr.bf16.mxu1 %v7826_v42  ;;  %v7914_v41 = vld [vmem:[%s11188_s1 + $0xae0] ss:$16 sps:$4 sm:$0xff]   ;;  %v7917_v42 = vld [vmem:[%s11188_s1 + $0xae8] ss:$16 sps:$4 sm:$0xff]  }
 0x123   :  { %5091 = vmatpush1.bf16.msra.mxu0 %v7821_v43  ;;  %5650 = vmatpush1.bf16.msra.mxu1 %v7824_v44  ;;  %v7922_v43 = vld [vmem:[%s11188_s1 + $0xb04] ss:$16 sps:$4 sm:$0xff]   ;;  %v7925_v44 = vld [vmem:[%s11188_s1 + $0xb0c] ss:$16 sps:$4 sm:$0xff]  }
 0x124   :  { %5092 = vmatprep.subr.bf16.mxu0 %v7829_v45  ;;  %5651 = vmatprep.subr.bf16.mxu1 %v7832_v46  ;;  %v7920_v45 = vld [vmem:[%s11188_s1 + $0xb00] ss:$16 sps:$4 sm:$0xff]   ;;  %v7923_v46 = vld [vmem:[%s11188_s1 + $0xb08] ss:$16 sps:$4 sm:$0xff]  }
 0x127   :  { %5093 = vmatpush1.bf16.msra.mxu0 %v7827_v47  ;;  %5652 = vmatpush1.bf16.msra.mxu1 %v7830_v48  ;;  %v7928_v47 = vld [vmem:[%s11188_s1 + $0xb24] ss:$16 sps:$4 sm:$0xff]   ;;  %v7931_v48 = vld [vmem:[%s11188_s1 + $0xb2c] ss:$16 sps:$4 sm:$0xff]  }
 0x128   :  { %5094 = vmatprep.subr.bf16.mxu0 %v7835_v49  ;;  %5653 = vmatprep.subr.bf16.mxu1 %v7838_v50  ;;  %v7926_v49 = vld [vmem:[%s11188_s1 + $0xb20] ss:$16 sps:$4 sm:$0xff]   ;;  %v7929_v50 = vld [vmem:[%s11188_s1 + $0xb28] ss:$16 sps:$4 sm:$0xff]  }
 0x12b   :  { %5095 = vmatpush1.bf16.msra.mxu0 %v7833_v51  ;;  %5654 = vmatpush1.bf16.msra.mxu1 %v7836_v52  ;;  %v7934_v51 = vld [vmem:[%s11188_s1 + $0xb44] ss:$16 sps:$4 sm:$0xff]   ;;  %v7937_v52 = vld [vmem:[%s11188_s1 + $0xb4c] ss:$16 sps:$4 sm:$0xff]  }
 0x12c   :  { %5096 = vmatprep.subr.bf16.mxu0 %v7841_v53  ;;  %5655 = vmatprep.subr.bf16.mxu1 %v7844_v54  ;;  %v7932_v53 = vld [vmem:[%s11188_s1 + $0xb40] ss:$16 sps:$4 sm:$0xff]   ;;  %v7935_v54 = vld [vmem:[%s11188_s1 + $0xb48] ss:$16 sps:$4 sm:$0xff]  }
 0x12f   :  { %5097 = vmatpush1.bf16.msra.mxu0 %v7839_v55  ;;  %5656 = vmatpush1.bf16.msra.mxu1 %v7842_v56  ;;  %v7940_v55 = vld [vmem:[%s11188_s1 + $0xb64] ss:$16 sps:$4 sm:$0xff]   ;;  %v7943_v56 = vld [vmem:[%s11188_s1 + $0xb6c] ss:$16 sps:$4 sm:$0xff]  }
 0x130   :  { %5098 = vmatprep.subr.bf16.mxu0 %v7847_v57  ;;  %5657 = vmatprep.subr.bf16.mxu1 %v7850_v58  ;;  %v7938_v57 = vld [vmem:[%s11188_s1 + $0xb60] ss:$16 sps:$4 sm:$0xff]   ;;  %v7941_v58 = vld [vmem:[%s11188_s1 + $0xb68] ss:$16 sps:$4 sm:$0xff]  }
 0x133   :  { %5099 = vmatpush1.bf16.msra.mxu0 %v7845_v59  ;;  %5658 = vmatpush1.bf16.msra.mxu1 %v7848_v60  ;;  %v7946_v59 = vld [vmem:[%s11188_s1 + $0xb84] ss:$16 sps:$4 sm:$0xff]   ;;  %v7949_v60 = vld [vmem:[%s11188_s1 + $0xb8c] ss:$16 sps:$4 sm:$0xff]  }
 0x134   :  { %5100 = vmatprep.subr.bf16.mxu0 %v7853_v61  ;;  %5659 = vmatprep.subr.bf16.mxu1 %v7856_v62  ;;  %v7944_v61 = vld [vmem:[%s11188_s1 + $0xb80] ss:$16 sps:$4 sm:$0xff]   ;;  %v7947_v62 = vld [vmem:[%s11188_s1 + $0xb88] ss:$16 sps:$4 sm:$0xff]  }
 0x137   :  { %5101 = vmatpush1.bf16.msra.mxu0 %v7851_v63  ;;  %5660 = vmatpush1.bf16.msra.mxu1 %v7854_v0  ;;  %v7952_v63 = vld [vmem:[%s11188_s1 + $0xba4] ss:$16 sps:$4 sm:$0xff]   ;;  %v7955_v0 = vld [vmem:[%s11188_s1 + $0xbac] ss:$16 sps:$4 sm:$0xff]  }
 0x138   :  { %5102 = vmatprep.subr.bf16.mxu0 %v7859_v1  ;;  %5661 = vmatprep.subr.bf16.mxu1 %v7862_v2  ;;  %v7950_v1 = vld [vmem:[%s11188_s1 + $0xba0] ss:$16 sps:$4 sm:$0xff]   ;;  %v7953_v2 = vld [vmem:[%s11188_s1 + $0xba8] ss:$16 sps:$4 sm:$0xff]  }
 0x13b   :  { %5103 = vmatpush1.bf16.msra.mxu0 %v7857_v3  ;;  %5662 = vmatpush1.bf16.msra.mxu1 %v7860_v4  ;;  %v7958_v3 = vld [vmem:[%s11188_s1 + $0xbc4] ss:$16 sps:$4 sm:$0xff]   ;;  %v7961_v4 = vld [vmem:[%s11188_s1 + $0xbcc] ss:$16 sps:$4 sm:$0xff]  }
 0x13c   :  { %5104 = vmatprep.subr.bf16.mxu0 %v7865_v5  ;;  %5663 = vmatprep.subr.bf16.mxu1 %v7868_v6  ;;  %v7956_v5 = vld [vmem:[%s11188_s1 + $0xbc0] ss:$16 sps:$4 sm:$0xff]   ;;  %v7959_v6 = vld [vmem:[%s11188_s1 + $0xbc8] ss:$16 sps:$4 sm:$0xff]  }
 0x13f   :  { %5105 = vmatpush1.bf16.msra.mxu0 %v7863_v7  ;;  %5664 = vmatpush1.bf16.msra.mxu1 %v7866_v8  ;;  %v7964_v7 = vld [vmem:[%s11188_s1 + $0xbe4] ss:$16 sps:$4 sm:$0xff]   ;;  %v7967_v8 = vld [vmem:[%s11188_s1 + $0xbec] ss:$16 sps:$4 sm:$0xff]  }
 0x140   :  { %5117 = vmatprep.subr.bf16.mxu0 %v7874_v10  ;;  %5676 = vmatprep.subr.bf16.mxu1 %v7877_v11  ;;  %v7965_v10 = vld [vmem:[%s11188_s1 + $0xbe8] ss:$16 sps:$4 sm:$0xff]  }
 0x141   :  { %v7968_v11 = vld [vmem:[%s11189_s0 + $0x28] ss:$100 sps:$4 sm:$0xff]  }
 0x142   :  { %5107 = vmatmul.mubr.bf16.vlgmr.msra.gmra.mrb[0].mxu0 %v7869_v9  ;;  %5666 = vmatmul.mubr.bf16.vlgmr.msra.gmra.mrb[0].mxu1 %v7869_v9  ;;  %v7962_v9 = vld [vmem:[%s11188_s1 + $0xbe0] ss:$16 sps:$4 sm:$0xff]  }
 0x143   :  { %5118 = vmatpush1.bf16.msra.mxu0 %v7872_v12  ;;  %5677 = vmatpush1.bf16.msra.mxu1 %v7875_v13  ;;  %v7973_v12 = vld [vmem:[%s11188_s1 + $0xc04] ss:$16 sps:$4 sm:$0xff]   ;;  %v7976_v13 = vld [vmem:[%s11188_s1 + $0xc0c] ss:$16 sps:$4 sm:$0xff]  }
 0x144   :  { %5119 = vmatprep.subr.bf16.mxu0 %v7880_v14  ;;  %5678 = vmatprep.subr.bf16.mxu1 %v7883_v15  ;;  %v7971_v14 = vld [vmem:[%s11188_s1 + $0xc00] ss:$16 sps:$4 sm:$0xff]   ;;  %v7974_v15 = vld [vmem:[%s11188_s1 + $0xc08] ss:$16 sps:$4 sm:$0xff]  }
 0x145   :  { %5149 = vmatprep.mubr.bf16.mxu0 %v7970_v16  ;;  %5708 = vmatprep.mubr.bf16.mxu1 %v7970_v16  ;;  %v7979_v16 = vld [vmem:[%s11188_s1 + $0xc24] ss:$16 sps:$4 sm:$0xff]  }
 0x147   :  { %5120 = vmatpush1.bf16.msra.mxu0 %v7878_v17  ;;  %5679 = vmatpush1.bf16.msra.mxu1 %v7881_v18  ;;  %v7982_v17 = vld [vmem:[%s11188_s1 + $0xc2c] ss:$16 sps:$4 sm:$0xff]   ;;  %v8069_v18 = vld [vmem:[%s11189_s0 + $0x34] ss:$100 sps:$4 sm:$0xff]  }
 0x148   :  { %5121 = vmatprep.subr.bf16.mxu0 %v7886_v19  ;;  %5680 = vmatprep.subr.bf16.mxu1 %v7889_v20  ;;  %v7977_v19 = vld [vmem:[%s11188_s1 + $0xc20] ss:$16 sps:$4 sm:$0xff]   ;;  %v7980_v20 = vld [vmem:[%s11188_s1 + $0xc28] ss:$16 sps:$4 sm:$0xff]  }
 0x14b   :  { %5122 = vmatpush1.bf16.msra.mxu0 %v7884_v21  ;;  %5681 = vmatpush1.bf16.msra.mxu1 %v7887_v22  ;;  %v7985_v21 = vld [vmem:[%s11188_s1 + $0xc44] ss:$16 sps:$4 sm:$0xff]   ;;  %v7988_v22 = vld [vmem:[%s11188_s1 + $0xc4c] ss:$16 sps:$4 sm:$0xff]  }
 0x14c   :  { %5123 = vmatprep.subr.bf16.mxu0 %v7892_v23  ;;  %5682 = vmatprep.subr.bf16.mxu1 %v7895_v24  ;;  %v7983_v23 = vld [vmem:[%s11188_s1 + $0xc40] ss:$16 sps:$4 sm:$0xff]   ;;  %v7986_v24 = vld [vmem:[%s11188_s1 + $0xc48] ss:$16 sps:$4 sm:$0xff]  }
 0x14f   :  { %5124 = vmatpush1.bf16.msra.mxu0 %v7890_v25  ;;  %5683 = vmatpush1.bf16.msra.mxu1 %v7893_v26  ;;  %v7991_v25 = vld [vmem:[%s11188_s1 + $0xc64] ss:$16 sps:$4 sm:$0xff]   ;;  %v7994_v26 = vld [vmem:[%s11188_s1 + $0xc6c] ss:$16 sps:$4 sm:$0xff]  }
 0x150   :  { %5125 = vmatprep.subr.bf16.mxu0 %v7898_v27  ;;  %5684 = vmatprep.subr.bf16.mxu1 %v7901_v28  ;;  %v7989_v27 = vld [vmem:[%s11188_s1 + $0xc60] ss:$16 sps:$4 sm:$0xff]   ;;  %v7992_v28 = vld [vmem:[%s11188_s1 + $0xc68] ss:$16 sps:$4 sm:$0xff]  }
 0x153   :  { %5126 = vmatpush1.bf16.msra.mxu0 %v7896_v29  ;;  %5685 = vmatpush1.bf16.msra.mxu1 %v7899_v30  ;;  %v7997_v29 = vld [vmem:[%s11188_s1 + $0xc84] ss:$16 sps:$4 sm:$0xff]   ;;  %v8000_v30 = vld [vmem:[%s11188_s1 + $0xc8c] ss:$16 sps:$4 sm:$0xff]  }
 0x154   :  { %5127 = vmatprep.subr.bf16.mxu0 %v7904_v31  ;;  %5686 = vmatprep.subr.bf16.mxu1 %v7907_v32  ;;  %v7995_v31 = vld [vmem:[%s11188_s1 + $0xc80] ss:$16 sps:$4 sm:$0xff]   ;;  %v7998_v32 = vld [vmem:[%s11188_s1 + $0xc88] ss:$16 sps:$4 sm:$0xff]  }
 0x157   :  { %5128 = vmatpush1.bf16.msra.mxu0 %v7902_v33  ;;  %5687 = vmatpush1.bf16.msra.mxu1 %v7905_v34  ;;  %v8003_v33 = vld [vmem:[%s11188_s1 + $0xca4] ss:$16 sps:$4 sm:$0xff]   ;;  %v8006_v34 = vld [vmem:[%s11188_s1 + $0xcac] ss:$16 sps:$4 sm:$0xff]  }
 0x158   :  { %5129 = vmatprep.subr.bf16.mxu0 %v7910_v35  ;;  %5688 = vmatprep.subr.bf16.mxu1 %v7913_v36  ;;  %v8001_v35 = vld [vmem:[%s11188_s1 + $0xca0] ss:$16 sps:$4 sm:$0xff]   ;;  %v8004_v36 = vld [vmem:[%s11188_s1 + $0xca8] ss:$16 sps:$4 sm:$0xff]  }
 0x15b   :  { %5130 = vmatpush1.bf16.msra.mxu0 %v7908_v37  ;;  %5689 = vmatpush1.bf16.msra.mxu1 %v7911_v38  ;;  %v8009_v37 = vld [vmem:[%s11188_s1 + $0xcc4] ss:$16 sps:$4 sm:$0xff]   ;;  %v8012_v38 = vld [vmem:[%s11188_s1 + $0xccc] ss:$16 sps:$4 sm:$0xff]  }
 0x15c   :  { %5131 = vmatprep.subr.bf16.mxu0 %v7916_v39  ;;  %5690 = vmatprep.subr.bf16.mxu1 %v7919_v40  ;;  %v8007_v39 = vld [vmem:[%s11188_s1 + $0xcc0] ss:$16 sps:$4 sm:$0xff]   ;;  %v8010_v40 = vld [vmem:[%s11188_s1 + $0xcc8] ss:$16 sps:$4 sm:$0xff]  }
 0x15f   :  { %5132 = vmatpush1.bf16.msra.mxu0 %v7914_v41  ;;  %5691 = vmatpush1.bf16.msra.mxu1 %v7917_v42  ;;  %v8015_v41 = vld [vmem:[%s11188_s1 + $0xce4] ss:$16 sps:$4 sm:$0xff]   ;;  %v8018_v42 = vld [vmem:[%s11188_s1 + $0xcec] ss:$16 sps:$4 sm:$0xff]  }
 0x160   :  { %5133 = vmatprep.subr.bf16.mxu0 %v7922_v43  ;;  %5692 = vmatprep.subr.bf16.mxu1 %v7925_v44  ;;  %v8013_v43 = vld [vmem:[%s11188_s1 + $0xce0] ss:$16 sps:$4 sm:$0xff]   ;;  %v8016_v44 = vld [vmem:[%s11188_s1 + $0xce8] ss:$16 sps:$4 sm:$0xff]  }
 0x163   :  { %5134 = vmatpush1.bf16.msra.mxu0 %v7920_v45  ;;  %5693 = vmatpush1.bf16.msra.mxu1 %v7923_v46  ;;  %v8021_v45 = vld [vmem:[%s11188_s1 + $0xd04] ss:$16 sps:$4 sm:$0xff]   ;;  %v8024_v46 = vld [vmem:[%s11188_s1 + $0xd0c] ss:$16 sps:$4 sm:$0xff]  }
 0x164   :  { %5135 = vmatprep.subr.bf16.mxu0 %v7928_v47  ;;  %5694 = vmatprep.subr.bf16.mxu1 %v7931_v48  ;;  %v8019_v47 = vld [vmem:[%s11188_s1 + $0xd00] ss:$16 sps:$4 sm:$0xff]   ;;  %v8022_v48 = vld [vmem:[%s11188_s1 + $0xd08] ss:$16 sps:$4 sm:$0xff]  }
 0x167   :  { %5136 = vmatpush1.bf16.msra.mxu0 %v7926_v49  ;;  %5695 = vmatpush1.bf16.msra.mxu1 %v7929_v50  ;;  %v8027_v49 = vld [vmem:[%s11188_s1 + $0xd24] ss:$16 sps:$4 sm:$0xff]   ;;  %v8030_v50 = vld [vmem:[%s11188_s1 + $0xd2c] ss:$16 sps:$4 sm:$0xff]  }
 0x168   :  { %5137 = vmatprep.subr.bf16.mxu0 %v7934_v51  ;;  %5696 = vmatprep.subr.bf16.mxu1 %v7937_v52  ;;  %v8025_v51 = vld [vmem:[%s11188_s1 + $0xd20] ss:$16 sps:$4 sm:$0xff]   ;;  %v8028_v52 = vld [vmem:[%s11188_s1 + $0xd28] ss:$16 sps:$4 sm:$0xff]  }
 0x16b   :  { %5138 = vmatpush1.bf16.msra.mxu0 %v7932_v53  ;;  %5697 = vmatpush1.bf16.msra.mxu1 %v7935_v54  ;;  %v8033_v53 = vld [vmem:[%s11188_s1 + $0xd44] ss:$16 sps:$4 sm:$0xff]   ;;  %v8036_v54 = vld [vmem:[%s11188_s1 + $0xd4c] ss:$16 sps:$4 sm:$0xff]  }
 0x16c   :  { %5139 = vmatprep.subr.bf16.mxu0 %v7940_v55  ;;  %5698 = vmatprep.subr.bf16.mxu1 %v7943_v56  ;;  %v8031_v55 = vld [vmem:[%s11188_s1 + $0xd40] ss:$16 sps:$4 sm:$0xff]   ;;  %v8034_v56 = vld [vmem:[%s11188_s1 + $0xd48] ss:$16 sps:$4 sm:$0xff]  }
 0x16f   :  { %5140 = vmatpush1.bf16.msra.mxu0 %v7938_v57  ;;  %5699 = vmatpush1.bf16.msra.mxu1 %v7941_v58  ;;  %v8039_v57 = vld [vmem:[%s11188_s1 + $0xd64] ss:$16 sps:$4 sm:$0xff]   ;;  %v8042_v58 = vld [vmem:[%s11188_s1 + $0xd6c] ss:$16 sps:$4 sm:$0xff]  }
 0x170   :  { %5141 = vmatprep.subr.bf16.mxu0 %v7946_v59  ;;  %5700 = vmatprep.subr.bf16.mxu1 %v7949_v60  ;;  %v8037_v59 = vld [vmem:[%s11188_s1 + $0xd60] ss:$16 sps:$4 sm:$0xff]   ;;  %v8040_v60 = vld [vmem:[%s11188_s1 + $0xd68] ss:$16 sps:$4 sm:$0xff]  }
 0x173   :  { %5142 = vmatpush1.bf16.msra.mxu0 %v7944_v61  ;;  %5701 = vmatpush1.bf16.msra.mxu1 %v7947_v62  ;;  %v8045_v61 = vld [vmem:[%s11188_s1 + $0xd84] ss:$16 sps:$4 sm:$0xff]   ;;  %v8048_v62 = vld [vmem:[%s11188_s1 + $0xd8c] ss:$16 sps:$4 sm:$0xff]  }
 0x174   :  { %5143 = vmatprep.subr.bf16.mxu0 %v7952_v63  ;;  %5702 = vmatprep.subr.bf16.mxu1 %v7955_v0  ;;  %v8043_v63 = vld [vmem:[%s11188_s1 + $0xd80] ss:$16 sps:$4 sm:$0xff]   ;;  %v8046_v0 = vld [vmem:[%s11188_s1 + $0xd88] ss:$16 sps:$4 sm:$0xff]  }
 0x177   :  { %5144 = vmatpush1.bf16.msra.mxu0 %v7950_v1  ;;  %5703 = vmatpush1.bf16.msra.mxu1 %v7953_v2  ;;  %v8051_v1 = vld [vmem:[%s11188_s1 + $0xda4] ss:$16 sps:$4 sm:$0xff]   ;;  %v8054_v2 = vld [vmem:[%s11188_s1 + $0xdac] ss:$16 sps:$4 sm:$0xff]  }
 0x178   :  { %5145 = vmatprep.subr.bf16.mxu0 %v7958_v3  ;;  %5704 = vmatprep.subr.bf16.mxu1 %v7961_v4  ;;  %v8049_v3 = vld [vmem:[%s11188_s1 + $0xda0] ss:$16 sps:$4 sm:$0xff]   ;;  %v8052_v4 = vld [vmem:[%s11188_s1 + $0xda8] ss:$16 sps:$4 sm:$0xff]  }
 0x17b   :  { %5146 = vmatpush1.bf16.msra.mxu0 %v7956_v5  ;;  %5705 = vmatpush1.bf16.msra.mxu1 %v7959_v6  ;;  %v8057_v5 = vld [vmem:[%s11188_s1 + $0xdc4] ss:$16 sps:$4 sm:$0xff]   ;;  %v8060_v6 = vld [vmem:[%s11188_s1 + $0xdcc] ss:$16 sps:$4 sm:$0xff]  }
 0x17c   :  { %5147 = vmatprep.subr.bf16.mxu0 %v7964_v7  ;;  %5706 = vmatprep.subr.bf16.mxu1 %v7967_v8  ;;  %v8055_v7 = vld [vmem:[%s11188_s1 + $0xdc0] ss:$16 sps:$4 sm:$0xff]   ;;  %v8058_v8 = vld [vmem:[%s11188_s1 + $0xdc8] ss:$16 sps:$4 sm:$0xff]  }
 0x17f   :  { %5148 = vmatpush1.bf16.msra.mxu0 %v7962_v9  ;;  %5707 = vmatpush1.bf16.msra.mxu1 %v7965_v10  ;;  %v8063_v9 = vld [vmem:[%s11188_s1 + $0xde4] ss:$16 sps:$4 sm:$0xff]   ;;  %v8066_v10 = vld [vmem:[%s11188_s1 + $0xdec] ss:$16 sps:$4 sm:$0xff]  }
 0x180   :  { %5160 = vmatprep.subr.bf16.mxu0 %v7973_v12  ;;  %5719 = vmatprep.subr.bf16.mxu1 %v7976_v13  ;;  %v8064_v12 = vld [vmem:[%s11188_s1 + $0xde8] ss:$16 sps:$4 sm:$0xff]   ;;  %v8067_v13 = vld [vmem:[%s11189_s0 + $0x30] ss:$100 sps:$4 sm:$0xff]  }
 0x182   :  { %5150 = vmatmul.mubr.bf16.vlgmr.msra.gmra.mrb[0].mxu0 %v7968_v11  ;;  %5709 = vmatmul.mubr.bf16.vlgmr.msra.gmra.mrb[0].mxu1 %v7968_v11  ;;  %v8061_v11 = vld [vmem:[%s11188_s1 + $0xde0] ss:$16 sps:$4 sm:$0xff]  }
 0x183   :  { %5161 = vmatpush1.bf16.msra.mxu0 %v7971_v14  ;;  %5720 = vmatpush1.bf16.msra.mxu1 %v7974_v15  ;;  %v8072_v14 = vld [vmem:[%s11188_s1 + $0xe04] ss:$16 sps:$4 sm:$0xff]   ;;  %v8075_v15 = vld [vmem:[%s11188_s1 + $0xe0c] ss:$16 sps:$4 sm:$0xff]  }
 0x184   :  { %5162 = vmatprep.subr.bf16.mxu0 %v7979_v16  ;;  %5721 = vmatprep.subr.bf16.mxu1 %v7982_v17  ;;  %v8070_v16 = vld [vmem:[%s11188_s1 + $0xe00] ss:$16 sps:$4 sm:$0xff]   ;;  %v8073_v17 = vld [vmem:[%s11188_s1 + $0xe08] ss:$16 sps:$4 sm:$0xff]  }
 0x185   :  { %5192 = vmatprep.mubr.bf16.mxu0 %v8069_v18  ;;  %5751 = vmatprep.mubr.bf16.mxu1 %v8069_v18  ;;  %v8078_v18 = vld [vmem:[%s11188_s1 + $0xe24] ss:$16 sps:$4 sm:$0xff]  }
 0x187   :  { %5163 = vmatpush1.bf16.msra.mxu0 %v7977_v19  ;;  %5722 = vmatpush1.bf16.msra.mxu1 %v7980_v20  ;;  %v8081_v19 = vld [vmem:[%s11188_s1 + $0xe2c] ss:$16 sps:$4 sm:$0xff]  }
 0x188   :  { %5164 = vmatprep.subr.bf16.mxu0 %v7985_v21  ;;  %5723 = vmatprep.subr.bf16.mxu1 %v7988_v22  ;;  %v8168_v20 = vld [vmem:[%s11189_s0 + $0x3c] ss:$100 sps:$4 sm:$0xff]   ;;  %v8079_v22 = vld [vmem:[%s11188_s1 + $0xe28] ss:$16 sps:$4 sm:$0xff]  }
 0x189   :  { %v8076_v21 = vld [vmem:[%s11188_s1 + $0xe20] ss:$16 sps:$4 sm:$0xff]  }
 0x18b   :  { %5165 = vmatpush1.bf16.msra.mxu0 %v7983_v23  ;;  %5724 = vmatpush1.bf16.msra.mxu1 %v7986_v24  ;;  %v8084_v23 = vld [vmem:[%s11188_s1 + $0xe44] ss:$16 sps:$4 sm:$0xff]   ;;  %v8087_v24 = vld [vmem:[%s11188_s1 + $0xe4c] ss:$16 sps:$4 sm:$0xff]  }
 0x18c   :  { %5166 = vmatprep.subr.bf16.mxu0 %v7991_v25  ;;  %5725 = vmatprep.subr.bf16.mxu1 %v7994_v26  ;;  %v8082_v25 = vld [vmem:[%s11188_s1 + $0xe40] ss:$16 sps:$4 sm:$0xff]   ;;  %v8085_v26 = vld [vmem:[%s11188_s1 + $0xe48] ss:$16 sps:$4 sm:$0xff]  }
 0x18f   :  { %5167 = vmatpush1.bf16.msra.mxu0 %v7989_v27  ;;  %5726 = vmatpush1.bf16.msra.mxu1 %v7992_v28  ;;  %v8090_v27 = vld [vmem:[%s11188_s1 + $0xe64] ss:$16 sps:$4 sm:$0xff]   ;;  %v8093_v28 = vld [vmem:[%s11188_s1 + $0xe6c] ss:$16 sps:$4 sm:$0xff]  }
 0x190   :  { %5168 = vmatprep.subr.bf16.mxu0 %v7997_v29  ;;  %5727 = vmatprep.subr.bf16.mxu1 %v8000_v30  ;;  %v8088_v29 = vld [vmem:[%s11188_s1 + $0xe60] ss:$16 sps:$4 sm:$0xff]   ;;  %v8091_v30 = vld [vmem:[%s11188_s1 + $0xe68] ss:$16 sps:$4 sm:$0xff]  }
 0x193   :  { %5169 = vmatpush1.bf16.msra.mxu0 %v7995_v31  ;;  %5728 = vmatpush1.bf16.msra.mxu1 %v7998_v32  ;;  %v8096_v31 = vld [vmem:[%s11188_s1 + $0xe84] ss:$16 sps:$4 sm:$0xff]   ;;  %v8099_v32 = vld [vmem:[%s11188_s1 + $0xe8c] ss:$16 sps:$4 sm:$0xff]  }
 0x194   :  { %5170 = vmatprep.subr.bf16.mxu0 %v8003_v33  ;;  %5729 = vmatprep.subr.bf16.mxu1 %v8006_v34  ;;  %v8094_v33 = vld [vmem:[%s11188_s1 + $0xe80] ss:$16 sps:$4 sm:$0xff]   ;;  %v8097_v34 = vld [vmem:[%s11188_s1 + $0xe88] ss:$16 sps:$4 sm:$0xff]  }
 0x197   :  { %5171 = vmatpush1.bf16.msra.mxu0 %v8001_v35  ;;  %5730 = vmatpush1.bf16.msra.mxu1 %v8004_v36  ;;  %v8102_v35 = vld [vmem:[%s11188_s1 + $0xea4] ss:$16 sps:$4 sm:$0xff]   ;;  %v8105_v36 = vld [vmem:[%s11188_s1 + $0xeac] ss:$16 sps:$4 sm:$0xff]  }
 0x198   :  { %5172 = vmatprep.subr.bf16.mxu0 %v8009_v37  ;;  %5731 = vmatprep.subr.bf16.mxu1 %v8012_v38  ;;  %v8100_v37 = vld [vmem:[%s11188_s1 + $0xea0] ss:$16 sps:$4 sm:$0xff]   ;;  %v8103_v38 = vld [vmem:[%s11188_s1 + $0xea8] ss:$16 sps:$4 sm:$0xff]  }
 0x19b   :  { %5173 = vmatpush1.bf16.msra.mxu0 %v8007_v39  ;;  %5732 = vmatpush1.bf16.msra.mxu1 %v8010_v40  ;;  %v8108_v39 = vld [vmem:[%s11188_s1 + $0xec4] ss:$16 sps:$4 sm:$0xff]   ;;  %v8111_v40 = vld [vmem:[%s11188_s1 + $0xecc] ss:$16 sps:$4 sm:$0xff]  }
 0x19c   :  { %5174 = vmatprep.subr.bf16.mxu0 %v8015_v41  ;;  %5733 = vmatprep.subr.bf16.mxu1 %v8018_v42  ;;  %v8106_v41 = vld [vmem:[%s11188_s1 + $0xec0] ss:$16 sps:$4 sm:$0xff]   ;;  %v8109_v42 = vld [vmem:[%s11188_s1 + $0xec8] ss:$16 sps:$4 sm:$0xff]  }
 0x19f   :  { %5175 = vmatpush1.bf16.msra.mxu0 %v8013_v43  ;;  %5734 = vmatpush1.bf16.msra.mxu1 %v8016_v44  ;;  %v8114_v43 = vld [vmem:[%s11188_s1 + $0xee4] ss:$16 sps:$4 sm:$0xff]   ;;  %v8117_v44 = vld [vmem:[%s11188_s1 + $0xeec] ss:$16 sps:$4 sm:$0xff]  }
 0x1a0   :  { %5176 = vmatprep.subr.bf16.mxu0 %v8021_v45  ;;  %5735 = vmatprep.subr.bf16.mxu1 %v8024_v46  ;;  %v8112_v45 = vld [vmem:[%s11188_s1 + $0xee0] ss:$16 sps:$4 sm:$0xff]   ;;  %v8115_v46 = vld [vmem:[%s11188_s1 + $0xee8] ss:$16 sps:$4 sm:$0xff]  }
 0x1a3   :  { %5177 = vmatpush1.bf16.msra.mxu0 %v8019_v47  ;;  %5736 = vmatpush1.bf16.msra.mxu1 %v8022_v48  ;;  %v8120_v47 = vld [vmem:[%s11188_s1 + $0xf04] ss:$16 sps:$4 sm:$0xff]   ;;  %v8123_v48 = vld [vmem:[%s11188_s1 + $0xf0c] ss:$16 sps:$4 sm:$0xff]  }
 0x1a4   :  { %5178 = vmatprep.subr.bf16.mxu0 %v8027_v49  ;;  %5737 = vmatprep.subr.bf16.mxu1 %v8030_v50  ;;  %v8118_v49 = vld [vmem:[%s11188_s1 + $0xf00] ss:$16 sps:$4 sm:$0xff]   ;;  %v8121_v50 = vld [vmem:[%s11188_s1 + $0xf08] ss:$16 sps:$4 sm:$0xff]  }
 0x1a7   :  { %5179 = vmatpush1.bf16.msra.mxu0 %v8025_v51  ;;  %5738 = vmatpush1.bf16.msra.mxu1 %v8028_v52  ;;  %v8126_v51 = vld [vmem:[%s11188_s1 + $0xf24] ss:$16 sps:$4 sm:$0xff]   ;;  %v8129_v52 = vld [vmem:[%s11188_s1 + $0xf2c] ss:$16 sps:$4 sm:$0xff]  }
 0x1a8   :  { %5180 = vmatprep.subr.bf16.mxu0 %v8033_v53  ;;  %5739 = vmatprep.subr.bf16.mxu1 %v8036_v54  ;;  %v8124_v53 = vld [vmem:[%s11188_s1 + $0xf20] ss:$16 sps:$4 sm:$0xff]   ;;  %v8127_v54 = vld [vmem:[%s11188_s1 + $0xf28] ss:$16 sps:$4 sm:$0xff]  }
 0x1ab   :  { %5181 = vmatpush1.bf16.msra.mxu0 %v8031_v55  ;;  %5740 = vmatpush1.bf16.msra.mxu1 %v8034_v56  ;;  %v8132_v55 = vld [vmem:[%s11188_s1 + $0xf44] ss:$16 sps:$4 sm:$0xff]   ;;  %v8135_v56 = vld [vmem:[%s11188_s1 + $0xf4c] ss:$16 sps:$4 sm:$0xff]  }
 0x1ac   :  { %5182 = vmatprep.subr.bf16.mxu0 %v8039_v57  ;;  %5741 = vmatprep.subr.bf16.mxu1 %v8042_v58  ;;  %v8130_v57 = vld [vmem:[%s11188_s1 + $0xf40] ss:$16 sps:$4 sm:$0xff]   ;;  %v8133_v58 = vld [vmem:[%s11188_s1 + $0xf48] ss:$16 sps:$4 sm:$0xff]  }
 0x1af   :  { %5183 = vmatpush1.bf16.msra.mxu0 %v8037_v59  ;;  %5742 = vmatpush1.bf16.msra.mxu1 %v8040_v60  ;;  %v8138_v59 = vld [vmem:[%s11188_s1 + $0xf64] ss:$16 sps:$4 sm:$0xff]   ;;  %v8141_v60 = vld [vmem:[%s11188_s1 + $0xf6c] ss:$16 sps:$4 sm:$0xff]  }
 0x1b0   :  { %5184 = vmatprep.subr.bf16.mxu0 %v8045_v61  ;;  %5743 = vmatprep.subr.bf16.mxu1 %v8048_v62  ;;  %v8136_v61 = vld [vmem:[%s11188_s1 + $0xf60] ss:$16 sps:$4 sm:$0xff]   ;;  %v8139_v62 = vld [vmem:[%s11188_s1 + $0xf68] ss:$16 sps:$4 sm:$0xff]  }
 0x1b3   :  { %5185 = vmatpush1.bf16.msra.mxu0 %v8043_v63  ;;  %5744 = vmatpush1.bf16.msra.mxu1 %v8046_v0  ;;  %v8144_v63 = vld [vmem:[%s11188_s1 + $0xf84] ss:$16 sps:$4 sm:$0xff]   ;;  %v8147_v0 = vld [vmem:[%s11188_s1 + $0xf8c] ss:$16 sps:$4 sm:$0xff]  }
 0x1b4   :  { %5186 = vmatprep.subr.bf16.mxu0 %v8051_v1  ;;  %5745 = vmatprep.subr.bf16.mxu1 %v8054_v2  ;;  %v8142_v1 = vld [vmem:[%s11188_s1 + $0xf80] ss:$16 sps:$4 sm:$0xff]   ;;  %v8145_v2 = vld [vmem:[%s11188_s1 + $0xf88] ss:$16 sps:$4 sm:$0xff]  }
 0x1b7   :  { %5187 = vmatpush1.bf16.msra.mxu0 %v8049_v3  ;;  %5746 = vmatpush1.bf16.msra.mxu1 %v8052_v4  ;;  %v8150_v3 = vld [vmem:[%s11188_s1 + $0xfa4] ss:$16 sps:$4 sm:$0xff]   ;;  %v8153_v4 = vld [vmem:[%s11188_s1 + $0xfac] ss:$16 sps:$4 sm:$0xff]  }
 0x1b8   :  { %5188 = vmatprep.subr.bf16.mxu0 %v8057_v5  ;;  %5747 = vmatprep.subr.bf16.mxu1 %v8060_v6  ;;  %v8148_v5 = vld [vmem:[%s11188_s1 + $0xfa0] ss:$16 sps:$4 sm:$0xff]   ;;  %v8151_v6 = vld [vmem:[%s11188_s1 + $0xfa8] ss:$16 sps:$4 sm:$0xff]  }
 0x1bb   :  { %5189 = vmatpush1.bf16.msra.mxu0 %v8055_v7  ;;  %5748 = vmatpush1.bf16.msra.mxu1 %v8058_v8  ;;  %v8156_v7 = vld [vmem:[%s11188_s1 + $0xfc4] ss:$16 sps:$4 sm:$0xff]   ;;  %v8159_v8 = vld [vmem:[%s11188_s1 + $0xfcc] ss:$16 sps:$4 sm:$0xff]  }
 0x1bc   :  { %5190 = vmatprep.subr.bf16.mxu0 %v8063_v9  ;;  %5749 = vmatprep.subr.bf16.mxu1 %v8066_v10  ;;  %v8154_v9 = vld [vmem:[%s11188_s1 + $0xfc0] ss:$16 sps:$4 sm:$0xff]   ;;  %v8157_v10 = vld [vmem:[%s11188_s1 + $0xfc8] ss:$16 sps:$4 sm:$0xff]  }
 0x1bf   :  { %5191 = vmatpush1.bf16.msra.mxu0 %v8061_v11  ;;  %5750 = vmatpush1.bf16.msra.mxu1 %v8064_v12  ;;  %v8162_v11 = vld [vmem:[%s11188_s1 + $0xfe4] ss:$16 sps:$4 sm:$0xff]   ;;  %v8165_v12 = vld [vmem:[%s11188_s1 + $0xfec] ss:$16 sps:$4 sm:$0xff]  }
 0x1c0   :  { %5203 = vmatprep.subr.bf16.mxu0 %v8072_v14  ;;  %5762 = vmatprep.subr.bf16.mxu1 %v8075_v15  ;;  %v8163_v14 = vld [vmem:[%s11188_s1 + $0xfe8] ss:$16 sps:$4 sm:$0xff]   ;;  %v8171_v15 = vld [vmem:[%s11188_s1 + $0x1004] ss:$16 sps:$4 sm:$0xff]  }
 0x1c2   :  { %5193 = vmatmul.mubr.bf16.vlgmr.msra.gmra.mrb[0].mxu0 %v8067_v13  ;;  %5752 = vmatmul.mubr.bf16.vlgmr.msra.gmra.mrb[0].mxu1 %v8067_v13  ;;  %v8160_v13 = vld [vmem:[%s11188_s1 + $0xfe0] ss:$16 sps:$4 sm:$0xff]  }
 0x1c3   :  { %5204 = vmatpush1.bf16.msra.mxu0 %v8070_v16  ;;  %5763 = vmatpush1.bf16.msra.mxu1 %v8073_v17  ;;  %v8174_v16 = vld [vmem:[%s11188_s1 + $0x100c] ss:$16 sps:$4 sm:$0xff]  }
 0x1c4   :  { %5205 = vmatprep.subr.bf16.mxu0 %v8078_v18  ;;  %5764 = vmatprep.subr.bf16.mxu1 %v8081_v19  ;;  %v8166_v17 = vld [vmem:[%s11189_s0 + $0x38] ss:$100 sps:$4 sm:$0xff]   ;;  %v8169_v18 = vld [vmem:[%s11188_s1 + $0x1000] ss:$16 sps:$4 sm:$0xff]  }
 0x1c5   :  { %5235 = vmatprep.mubr.bf16.mxu0 %v8168_v20  ;;  %5794 = vmatprep.mubr.bf16.mxu1 %v8168_v20  ;;  %v8172_v19 = vld [vmem:[%s11188_s1 + $0x1008] ss:$16 sps:$4 sm:$0xff]   ;;  %v8177_v20 = vld [vmem:[%s11188_s1 + $0x1024] ss:$16 sps:$4 sm:$0xff]  }
 0x1c7   :  { %5206 = vmatpush1.bf16.msra.mxu0 %v8076_v21  ;;  %5765 = vmatpush1.bf16.msra.mxu1 %v8079_v22  ;;  %v8180_v21 = vld [vmem:[%s11188_s1 + $0x102c] ss:$16 sps:$4 sm:$0xff]   ;;  %v8267_v22 = vld [vmem:[%s11189_s0 + $0x44] ss:$100 sps:$4 sm:$0xff]  }
 0x1c8   :  { %5207 = vmatprep.subr.bf16.mxu0 %v8084_v23  ;;  %5766 = vmatprep.subr.bf16.mxu1 %v8087_v24  ;;  %v8175_v23 = vld [vmem:[%s11188_s1 + $0x1020] ss:$16 sps:$4 sm:$0xff]   ;;  %v8178_v24 = vld [vmem:[%s11188_s1 + $0x1028] ss:$16 sps:$4 sm:$0xff]  }
 0x1cb   :  { %5208 = vmatpush1.bf16.msra.mxu0 %v8082_v25  ;;  %5767 = vmatpush1.bf16.msra.mxu1 %v8085_v26  ;;  %v8183_v25 = vld [vmem:[%s11188_s1 + $0x1044] ss:$16 sps:$4 sm:$0xff]   ;;  %v8186_v26 = vld [vmem:[%s11188_s1 + $0x104c] ss:$16 sps:$4 sm:$0xff]  }
 0x1cc   :  { %5209 = vmatprep.subr.bf16.mxu0 %v8090_v27  ;;  %5768 = vmatprep.subr.bf16.mxu1 %v8093_v28  ;;  %v8181_v27 = vld [vmem:[%s11188_s1 + $0x1040] ss:$16 sps:$4 sm:$0xff]   ;;  %v8184_v28 = vld [vmem:[%s11188_s1 + $0x1048] ss:$16 sps:$4 sm:$0xff]  }
 0x1cf   :  { %5210 = vmatpush1.bf16.msra.mxu0 %v8088_v29  ;;  %5769 = vmatpush1.bf16.msra.mxu1 %v8091_v30  ;;  %v8189_v29 = vld [vmem:[%s11188_s1 + $0x1064] ss:$16 sps:$4 sm:$0xff]   ;;  %v8192_v30 = vld [vmem:[%s11188_s1 + $0x106c] ss:$16 sps:$4 sm:$0xff]  }
 0x1d0   :  { %5211 = vmatprep.subr.bf16.mxu0 %v8096_v31  ;;  %5770 = vmatprep.subr.bf16.mxu1 %v8099_v32  ;;  %v8187_v31 = vld [vmem:[%s11188_s1 + $0x1060] ss:$16 sps:$4 sm:$0xff]   ;;  %v8190_v32 = vld [vmem:[%s11188_s1 + $0x1068] ss:$16 sps:$4 sm:$0xff]  }
 0x1d3   :  { %5212 = vmatpush1.bf16.msra.mxu0 %v8094_v33  ;;  %5771 = vmatpush1.bf16.msra.mxu1 %v8097_v34  ;;  %v8195_v33 = vld [vmem:[%s11188_s1 + $0x1084] ss:$16 sps:$4 sm:$0xff]   ;;  %v8198_v34 = vld [vmem:[%s11188_s1 + $0x108c] ss:$16 sps:$4 sm:$0xff]  }
 0x1d4   :  { %5213 = vmatprep.subr.bf16.mxu0 %v8102_v35  ;;  %5772 = vmatprep.subr.bf16.mxu1 %v8105_v36  ;;  %v8193_v35 = vld [vmem:[%s11188_s1 + $0x1080] ss:$16 sps:$4 sm:$0xff]   ;;  %v8196_v36 = vld [vmem:[%s11188_s1 + $0x1088] ss:$16 sps:$4 sm:$0xff]  }
 0x1d7   :  { %5214 = vmatpush1.bf16.msra.mxu0 %v8100_v37  ;;  %5773 = vmatpush1.bf16.msra.mxu1 %v8103_v38  ;;  %v8201_v37 = vld [vmem:[%s11188_s1 + $0x10a4] ss:$16 sps:$4 sm:$0xff]   ;;  %v8204_v38 = vld [vmem:[%s11188_s1 + $0x10ac] ss:$16 sps:$4 sm:$0xff]  }
 0x1d8   :  { %5215 = vmatprep.subr.bf16.mxu0 %v8108_v39  ;;  %5774 = vmatprep.subr.bf16.mxu1 %v8111_v40  ;;  %v8199_v39 = vld [vmem:[%s11188_s1 + $0x10a0] ss:$16 sps:$4 sm:$0xff]   ;;  %v8202_v40 = vld [vmem:[%s11188_s1 + $0x10a8] ss:$16 sps:$4 sm:$0xff]  }
 0x1db   :  { %5216 = vmatpush1.bf16.msra.mxu0 %v8106_v41  ;;  %5775 = vmatpush1.bf16.msra.mxu1 %v8109_v42  ;;  %v8207_v41 = vld [vmem:[%s11188_s1 + $0x10c4] ss:$16 sps:$4 sm:$0xff]   ;;  %v8210_v42 = vld [vmem:[%s11188_s1 + $0x10cc] ss:$16 sps:$4 sm:$0xff]  }
 0x1dc   :  { %5217 = vmatprep.subr.bf16.mxu0 %v8114_v43  ;;  %5776 = vmatprep.subr.bf16.mxu1 %v8117_v44  ;;  %v8205_v43 = vld [vmem:[%s11188_s1 + $0x10c0] ss:$16 sps:$4 sm:$0xff]   ;;  %v8208_v44 = vld [vmem:[%s11188_s1 + $0x10c8] ss:$16 sps:$4 sm:$0xff]  }
 0x1df   :  { %5218 = vmatpush1.bf16.msra.mxu0 %v8112_v45  ;;  %5777 = vmatpush1.bf16.msra.mxu1 %v8115_v46  ;;  %v8213_v45 = vld [vmem:[%s11188_s1 + $0x10e4] ss:$16 sps:$4 sm:$0xff]   ;;  %v8216_v46 = vld [vmem:[%s11188_s1 + $0x10ec] ss:$16 sps:$4 sm:$0xff]  }
 0x1e0   :  { %5219 = vmatprep.subr.bf16.mxu0 %v8120_v47  ;;  %5778 = vmatprep.subr.bf16.mxu1 %v8123_v48  ;;  %v8211_v47 = vld [vmem:[%s11188_s1 + $0x10e0] ss:$16 sps:$4 sm:$0xff]   ;;  %v8214_v48 = vld [vmem:[%s11188_s1 + $0x10e8] ss:$16 sps:$4 sm:$0xff]  }
 0x1e3   :  { %5220 = vmatpush1.bf16.msra.mxu0 %v8118_v49  ;;  %5779 = vmatpush1.bf16.msra.mxu1 %v8121_v50  ;;  %v8219_v49 = vld [vmem:[%s11188_s1 + $0x1104] ss:$16 sps:$4 sm:$0xff]   ;;  %v8222_v50 = vld [vmem:[%s11188_s1 + $0x110c] ss:$16 sps:$4 sm:$0xff]  }
 0x1e4   :  { %5221 = vmatprep.subr.bf16.mxu0 %v8126_v51  ;;  %5780 = vmatprep.subr.bf16.mxu1 %v8129_v52  ;;  %v8217_v51 = vld [vmem:[%s11188_s1 + $0x1100] ss:$16 sps:$4 sm:$0xff]   ;;  %v8220_v52 = vld [vmem:[%s11188_s1 + $0x1108] ss:$16 sps:$4 sm:$0xff]  }
 0x1e7   :  { %5222 = vmatpush1.bf16.msra.mxu0 %v8124_v53  ;;  %5781 = vmatpush1.bf16.msra.mxu1 %v8127_v54  ;;  %v8225_v53 = vld [vmem:[%s11188_s1 + $0x1124] ss:$16 sps:$4 sm:$0xff]   ;;  %v8228_v54 = vld [vmem:[%s11188_s1 + $0x112c] ss:$16 sps:$4 sm:$0xff]  }
 0x1e8   :  { %5223 = vmatprep.subr.bf16.mxu0 %v8132_v55  ;;  %5782 = vmatprep.subr.bf16.mxu1 %v8135_v56  ;;  %v8223_v55 = vld [vmem:[%s11188_s1 + $0x1120] ss:$16 sps:$4 sm:$0xff]   ;;  %v8226_v56 = vld [vmem:[%s11188_s1 + $0x1128] ss:$16 sps:$4 sm:$0xff]  }
 0x1eb   :  { %5224 = vmatpush1.bf16.msra.mxu0 %v8130_v57  ;;  %5783 = vmatpush1.bf16.msra.mxu1 %v8133_v58  ;;  %v8231_v57 = vld [vmem:[%s11188_s1 + $0x1144] ss:$16 sps:$4 sm:$0xff]   ;;  %v8234_v58 = vld [vmem:[%s11188_s1 + $0x114c] ss:$16 sps:$4 sm:$0xff]  }
 0x1ec   :  { %5225 = vmatprep.subr.bf16.mxu0 %v8138_v59  ;;  %5784 = vmatprep.subr.bf16.mxu1 %v8141_v60  ;;  %v8229_v59 = vld [vmem:[%s11188_s1 + $0x1140] ss:$16 sps:$4 sm:$0xff]   ;;  %v8232_v60 = vld [vmem:[%s11188_s1 + $0x1148] ss:$16 sps:$4 sm:$0xff]  }
 0x1ef   :  { %5226 = vmatpush1.bf16.msra.mxu0 %v8136_v61  ;;  %5785 = vmatpush1.bf16.msra.mxu1 %v8139_v62  ;;  %v8237_v61 = vld [vmem:[%s11188_s1 + $0x1164] ss:$16 sps:$4 sm:$0xff]   ;;  %v8240_v62 = vld [vmem:[%s11188_s1 + $0x116c] ss:$16 sps:$4 sm:$0xff]  }
 0x1f0   :  { %5227 = vmatprep.subr.bf16.mxu0 %v8144_v63  ;;  %5786 = vmatprep.subr.bf16.mxu1 %v8147_v0  ;;  %v8235_v63 = vld [vmem:[%s11188_s1 + $0x1160] ss:$16 sps:$4 sm:$0xff]   ;;  %v8238_v0 = vld [vmem:[%s11188_s1 + $0x1168] ss:$16 sps:$4 sm:$0xff]  }
 0x1f3   :  { %5228 = vmatpush1.bf16.msra.mxu0 %v8142_v1  ;;  %5787 = vmatpush1.bf16.msra.mxu1 %v8145_v2  ;;  %v8243_v1 = vld [vmem:[%s11188_s1 + $0x1184] ss:$16 sps:$4 sm:$0xff]   ;;  %v8246_v2 = vld [vmem:[%s11188_s1 + $0x118c] ss:$16 sps:$4 sm:$0xff]  }
 0x1f4   :  { %5229 = vmatprep.subr.bf16.mxu0 %v8150_v3  ;;  %5788 = vmatprep.subr.bf16.mxu1 %v8153_v4  ;;  %v8241_v3 = vld [vmem:[%s11188_s1 + $0x1180] ss:$16 sps:$4 sm:$0xff]   ;;  %v8244_v4 = vld [vmem:[%s11188_s1 + $0x1188] ss:$16 sps:$4 sm:$0xff]  }
 0x1f7   :  { %5230 = vmatpush1.bf16.msra.mxu0 %v8148_v5  ;;  %5789 = vmatpush1.bf16.msra.mxu1 %v8151_v6  ;;  %v8249_v5 = vld [vmem:[%s11188_s1 + $0x11a4] ss:$16 sps:$4 sm:$0xff]   ;;  %v8252_v6 = vld [vmem:[%s11188_s1 + $0x11ac] ss:$16 sps:$4 sm:$0xff]  }
 0x1f8   :  { %5231 = vmatprep.subr.bf16.mxu0 %v8156_v7  ;;  %5790 = vmatprep.subr.bf16.mxu1 %v8159_v8  ;;  %v8247_v7 = vld [vmem:[%s11188_s1 + $0x11a0] ss:$16 sps:$4 sm:$0xff]   ;;  %v8250_v8 = vld [vmem:[%s11188_s1 + $0x11a8] ss:$16 sps:$4 sm:$0xff]  }
 0x1fb   :  { %5232 = vmatpush1.bf16.msra.mxu0 %v8154_v9  ;;  %5791 = vmatpush1.bf16.msra.mxu1 %v8157_v10  ;;  %v8255_v9 = vld [vmem:[%s11188_s1 + $0x11c4] ss:$16 sps:$4 sm:$0xff]   ;;  %v8258_v10 = vld [vmem:[%s11188_s1 + $0x11cc] ss:$16 sps:$4 sm:$0xff]  }
 0x1fc   :  { %5233 = vmatprep.subr.bf16.mxu0 %v8162_v11  ;;  %5792 = vmatprep.subr.bf16.mxu1 %v8165_v12  ;;  %v8253_v11 = vld [vmem:[%s11188_s1 + $0x11c0] ss:$16 sps:$4 sm:$0xff]   ;;  %v8256_v12 = vld [vmem:[%s11188_s1 + $0x11c8] ss:$16 sps:$4 sm:$0xff]  }
 0x1ff   :  { %5234 = vmatpush1.bf16.msra.mxu0 %v8160_v13  ;;  %5793 = vmatpush1.bf16.msra.mxu1 %v8163_v14  ;;  %v8261_v13 = vld [vmem:[%s11188_s1 + $0x11e4] ss:$16 sps:$4 sm:$0xff]   ;;  %v8264_v14 = vld [vmem:[%s11188_s1 + $0x11ec] ss:$16 sps:$4 sm:$0xff]  }
 0x200   :  { %5246 = vmatprep.subr.bf16.mxu0 %v8171_v15  ;;  %5805 = vmatprep.subr.bf16.mxu1 %v8174_v16  ;;  %v8259_v15 = vld [vmem:[%s11188_s1 + $0x11e0] ss:$16 sps:$4 sm:$0xff]   ;;  %v8262_v16 = vld [vmem:[%s11188_s1 + $0x11e8] ss:$16 sps:$4 sm:$0xff]  }
 0x202   :  { %5236 = vmatmul.mubr.bf16.vlgmr.msra.gmra.mrb[0].mxu0 %v8166_v17  ;;  %5795 = vmatmul.mubr.bf16.vlgmr.msra.gmra.mrb[0].mxu1 %v8166_v17  ;;  %v8270_v17 = vld [vmem:[%s11188_s1 + $0x1204] ss:$16 sps:$4 sm:$0xff]  }
 0x203   :  { %5247 = vmatpush1.bf16.msra.mxu0 %v8169_v18  ;;  %5806 = vmatpush1.bf16.msra.mxu1 %v8172_v19  ;;  %v8273_v18 = vld [vmem:[%s11188_s1 + $0x120c] ss:$16 sps:$4 sm:$0xff]   ;;  %v8265_v19 = vld [vmem:[%s11189_s0 + $0x40] ss:$100 sps:$4 sm:$0xff]  }
 0x204   :  { %5248 = vmatprep.subr.bf16.mxu0 %v8177_v20  ;;  %5807 = vmatprep.subr.bf16.mxu1 %v8180_v21  ;;  %v8268_v20 = vld [vmem:[%s11188_s1 + $0x1200] ss:$16 sps:$4 sm:$0xff]   ;;  %v8271_v21 = vld [vmem:[%s11188_s1 + $0x1208] ss:$16 sps:$4 sm:$0xff]  }
 0x205   :  { %5278 = vmatprep.mubr.bf16.mxu0 %v8267_v22  ;;  %5837 = vmatprep.mubr.bf16.mxu1 %v8267_v22  ;;  %v8276_v22 = vld [vmem:[%s11188_s1 + $0x1224] ss:$16 sps:$4 sm:$0xff]  }
 0x207   :  { %5249 = vmatpush1.bf16.msra.mxu0 %v8175_v23  ;;  %5808 = vmatpush1.bf16.msra.mxu1 %v8178_v24  ;;  %v8279_v23 = vld [vmem:[%s11188_s1 + $0x122c] ss:$16 sps:$4 sm:$0xff]  }
 0x208   :  { %5250 = vmatprep.subr.bf16.mxu0 %v8183_v25  ;;  %5809 = vmatprep.subr.bf16.mxu1 %v8186_v26  ;;  %v8366_v24 = vld [vmem:[%s11189_s0 + $0x4c] ss:$100 sps:$4 sm:$0xff]   ;;  %v8277_v26 = vld [vmem:[%s11188_s1 + $0x1228] ss:$16 sps:$4 sm:$0xff]  }
 0x209   :  { %v8274_v25 = vld [vmem:[%s11188_s1 + $0x1220] ss:$16 sps:$4 sm:$0xff]  }
 0x20b   :  { %5251 = vmatpush1.bf16.msra.mxu0 %v8181_v27  ;;  %5810 = vmatpush1.bf16.msra.mxu1 %v8184_v28  ;;  %v8282_v27 = vld [vmem:[%s11188_s1 + $0x1244] ss:$16 sps:$4 sm:$0xff]   ;;  %v8285_v28 = vld [vmem:[%s11188_s1 + $0x124c] ss:$16 sps:$4 sm:$0xff]  }
 0x20c   :  { %5252 = vmatprep.subr.bf16.mxu0 %v8189_v29  ;;  %5811 = vmatprep.subr.bf16.mxu1 %v8192_v30  ;;  %v8280_v29 = vld [vmem:[%s11188_s1 + $0x1240] ss:$16 sps:$4 sm:$0xff]   ;;  %v8283_v30 = vld [vmem:[%s11188_s1 + $0x1248] ss:$16 sps:$4 sm:$0xff]  }
 0x20f   :  { %5253 = vmatpush1.bf16.msra.mxu0 %v8187_v31  ;;  %5812 = vmatpush1.bf16.msra.mxu1 %v8190_v32  ;;  %v8288_v31 = vld [vmem:[%s11188_s1 + $0x1264] ss:$16 sps:$4 sm:$0xff]   ;;  %v8291_v32 = vld [vmem:[%s11188_s1 + $0x126c] ss:$16 sps:$4 sm:$0xff]  }
 0x210   :  { %5254 = vmatprep.subr.bf16.mxu0 %v8195_v33  ;;  %5813 = vmatprep.subr.bf16.mxu1 %v8198_v34  ;;  %v8286_v33 = vld [vmem:[%s11188_s1 + $0x1260] ss:$16 sps:$4 sm:$0xff]   ;;  %v8289_v34 = vld [vmem:[%s11188_s1 + $0x1268] ss:$16 sps:$4 sm:$0xff]  }
 0x213   :  { %5255 = vmatpush1.bf16.msra.mxu0 %v8193_v35  ;;  %5814 = vmatpush1.bf16.msra.mxu1 %v8196_v36  ;;  %v8294_v35 = vld [vmem:[%s11188_s1 + $0x1284] ss:$16 sps:$4 sm:$0xff]   ;;  %v8297_v36 = vld [vmem:[%s11188_s1 + $0x128c] ss:$16 sps:$4 sm:$0xff]  }
 0x214   :  { %5256 = vmatprep.subr.bf16.mxu0 %v8201_v37  ;;  %5815 = vmatprep.subr.bf16.mxu1 %v8204_v38  ;;  %v8292_v37 = vld [vmem:[%s11188_s1 + $0x1280] ss:$16 sps:$4 sm:$0xff]   ;;  %v8295_v38 = vld [vmem:[%s11188_s1 + $0x1288] ss:$16 sps:$4 sm:$0xff]  }
 0x217   :  { %5257 = vmatpush1.bf16.msra.mxu0 %v8199_v39  ;;  %5816 = vmatpush1.bf16.msra.mxu1 %v8202_v40  ;;  %v8300_v39 = vld [vmem:[%s11188_s1 + $0x12a4] ss:$16 sps:$4 sm:$0xff]   ;;  %v8303_v40 = vld [vmem:[%s11188_s1 + $0x12ac] ss:$16 sps:$4 sm:$0xff]  }
 0x218   :  { %5258 = vmatprep.subr.bf16.mxu0 %v8207_v41  ;;  %5817 = vmatprep.subr.bf16.mxu1 %v8210_v42  ;;  %v8298_v41 = vld [vmem:[%s11188_s1 + $0x12a0] ss:$16 sps:$4 sm:$0xff]   ;;  %v8301_v42 = vld [vmem:[%s11188_s1 + $0x12a8] ss:$16 sps:$4 sm:$0xff]  }
 0x21b   :  { %5259 = vmatpush1.bf16.msra.mxu0 %v8205_v43  ;;  %5818 = vmatpush1.bf16.msra.mxu1 %v8208_v44  ;;  %v8306_v43 = vld [vmem:[%s11188_s1 + $0x12c4] ss:$16 sps:$4 sm:$0xff]   ;;  %v8309_v44 = vld [vmem:[%s11188_s1 + $0x12cc] ss:$16 sps:$4 sm:$0xff]  }
 0x21c   :  { %5260 = vmatprep.subr.bf16.mxu0 %v8213_v45  ;;  %5819 = vmatprep.subr.bf16.mxu1 %v8216_v46  ;;  %v8304_v45 = vld [vmem:[%s11188_s1 + $0x12c0] ss:$16 sps:$4 sm:$0xff]   ;;  %v8307_v46 = vld [vmem:[%s11188_s1 + $0x12c8] ss:$16 sps:$4 sm:$0xff]  }
 0x21f   :  { %5261 = vmatpush1.bf16.msra.mxu0 %v8211_v47  ;;  %5820 = vmatpush1.bf16.msra.mxu1 %v8214_v48  ;;  %v8312_v47 = vld [vmem:[%s11188_s1 + $0x12e4] ss:$16 sps:$4 sm:$0xff]   ;;  %v8315_v48 = vld [vmem:[%s11188_s1 + $0x12ec] ss:$16 sps:$4 sm:$0xff]  }
 0x220   :  { %5262 = vmatprep.subr.bf16.mxu0 %v8219_v49  ;;  %5821 = vmatprep.subr.bf16.mxu1 %v8222_v50  ;;  %v8310_v49 = vld [vmem:[%s11188_s1 + $0x12e0] ss:$16 sps:$4 sm:$0xff]   ;;  %v8313_v50 = vld [vmem:[%s11188_s1 + $0x12e8] ss:$16 sps:$4 sm:$0xff]  }
 0x223   :  { %5263 = vmatpush1.bf16.msra.mxu0 %v8217_v51  ;;  %5822 = vmatpush1.bf16.msra.mxu1 %v8220_v52  ;;  %v8318_v51 = vld [vmem:[%s11188_s1 + $0x1304] ss:$16 sps:$4 sm:$0xff]   ;;  %v8321_v52 = vld [vmem:[%s11188_s1 + $0x130c] ss:$16 sps:$4 sm:$0xff]  }
 0x224   :  { %5264 = vmatprep.subr.bf16.mxu0 %v8225_v53  ;;  %5823 = vmatprep.subr.bf16.mxu1 %v8228_v54  ;;  %v8316_v53 = vld [vmem:[%s11188_s1 + $0x1300] ss:$16 sps:$4 sm:$0xff]   ;;  %v8319_v54 = vld [vmem:[%s11188_s1 + $0x1308] ss:$16 sps:$4 sm:$0xff]  }
 0x227   :  { %5265 = vmatpush1.bf16.msra.mxu0 %v8223_v55  ;;  %5824 = vmatpush1.bf16.msra.mxu1 %v8226_v56  ;;  %v8324_v55 = vld [vmem:[%s11188_s1 + $0x1324] ss:$16 sps:$4 sm:$0xff]   ;;  %v8327_v56 = vld [vmem:[%s11188_s1 + $0x132c] ss:$16 sps:$4 sm:$0xff]  }
 0x228   :  { %5266 = vmatprep.subr.bf16.mxu0 %v8231_v57  ;;  %5825 = vmatprep.subr.bf16.mxu1 %v8234_v58  ;;  %v8322_v57 = vld [vmem:[%s11188_s1 + $0x1320] ss:$16 sps:$4 sm:$0xff]   ;;  %v8325_v58 = vld [vmem:[%s11188_s1 + $0x1328] ss:$16 sps:$4 sm:$0xff]  }
 0x22b   :  { %5267 = vmatpush1.bf16.msra.mxu0 %v8229_v59  ;;  %5826 = vmatpush1.bf16.msra.mxu1 %v8232_v60  ;;  %v8330_v59 = vld [vmem:[%s11188_s1 + $0x1344] ss:$16 sps:$4 sm:$0xff]   ;;  %v8333_v60 = vld [vmem:[%s11188_s1 + $0x134c] ss:$16 sps:$4 sm:$0xff]  }
 0x22c   :  { %5268 = vmatprep.subr.bf16.mxu0 %v8237_v61  ;;  %5827 = vmatprep.subr.bf16.mxu1 %v8240_v62  ;;  %v8328_v61 = vld [vmem:[%s11188_s1 + $0x1340] ss:$16 sps:$4 sm:$0xff]   ;;  %v8331_v62 = vld [vmem:[%s11188_s1 + $0x1348] ss:$16 sps:$4 sm:$0xff]  }
 0x22f   :  { %5269 = vmatpush1.bf16.msra.mxu0 %v8235_v63  ;;  %5828 = vmatpush1.bf16.msra.mxu1 %v8238_v0  ;;  %v8336_v63 = vld [vmem:[%s11188_s1 + $0x1364] ss:$16 sps:$4 sm:$0xff]   ;;  %v8339_v0 = vld [vmem:[%s11188_s1 + $0x136c] ss:$16 sps:$4 sm:$0xff]  }
 0x230   :  { %5270 = vmatprep.subr.bf16.mxu0 %v8243_v1  ;;  %5829 = vmatprep.subr.bf16.mxu1 %v8246_v2  ;;  %v8334_v1 = vld [vmem:[%s11188_s1 + $0x1360] ss:$16 sps:$4 sm:$0xff]   ;;  %v8337_v2 = vld [vmem:[%s11188_s1 + $0x1368] ss:$16 sps:$4 sm:$0xff]  }
 0x233   :  { %5271 = vmatpush1.bf16.msra.mxu0 %v8241_v3  ;;  %5830 = vmatpush1.bf16.msra.mxu1 %v8244_v4  ;;  %v8342_v3 = vld [vmem:[%s11188_s1 + $0x1384] ss:$16 sps:$4 sm:$0xff]   ;;  %v8345_v4 = vld [vmem:[%s11188_s1 + $0x138c] ss:$16 sps:$4 sm:$0xff]  }
 0x234   :  { %5272 = vmatprep.subr.bf16.mxu0 %v8249_v5  ;;  %5831 = vmatprep.subr.bf16.mxu1 %v8252_v6  ;;  %v8340_v5 = vld [vmem:[%s11188_s1 + $0x1380] ss:$16 sps:$4 sm:$0xff]   ;;  %v8343_v6 = vld [vmem:[%s11188_s1 + $0x1388] ss:$16 sps:$4 sm:$0xff]  }
 0x237   :  { %5273 = vmatpush1.bf16.msra.mxu0 %v8247_v7  ;;  %5832 = vmatpush1.bf16.msra.mxu1 %v8250_v8  ;;  %v8348_v7 = vld [vmem:[%s11188_s1 + $0x13a4] ss:$16 sps:$4 sm:$0xff]   ;;  %v8351_v8 = vld [vmem:[%s11188_s1 + $0x13ac] ss:$16 sps:$4 sm:$0xff]  }
 0x238   :  { %5274 = vmatprep.subr.bf16.mxu0 %v8255_v9  ;;  %5833 = vmatprep.subr.bf16.mxu1 %v8258_v10  ;;  %v8346_v9 = vld [vmem:[%s11188_s1 + $0x13a0] ss:$16 sps:$4 sm:$0xff]   ;;  %v8349_v10 = vld [vmem:[%s11188_s1 + $0x13a8] ss:$16 sps:$4 sm:$0xff]  }
 0x23b   :  { %5275 = vmatpush1.bf16.msra.mxu0 %v8253_v11  ;;  %5834 = vmatpush1.bf16.msra.mxu1 %v8256_v12  ;;  %v8354_v11 = vld [vmem:[%s11188_s1 + $0x13c4] ss:$16 sps:$4 sm:$0xff]   ;;  %v8357_v12 = vld [vmem:[%s11188_s1 + $0x13cc] ss:$16 sps:$4 sm:$0xff]  }
 0x23c   :  { %5276 = vmatprep.subr.bf16.mxu0 %v8261_v13  ;;  %5835 = vmatprep.subr.bf16.mxu1 %v8264_v14  ;;  %v8352_v13 = vld [vmem:[%s11188_s1 + $0x13c0] ss:$16 sps:$4 sm:$0xff]   ;;  %v8355_v14 = vld [vmem:[%s11188_s1 + $0x13c8] ss:$16 sps:$4 sm:$0xff]  }
 0x23f   :  { %5277 = vmatpush1.bf16.msra.mxu0 %v8259_v15  ;;  %5836 = vmatpush1.bf16.msra.mxu1 %v8262_v16  ;;  %v8360_v15 = vld [vmem:[%s11188_s1 + $0x13e4] ss:$16 sps:$4 sm:$0xff]   ;;  %v8363_v16 = vld [vmem:[%s11188_s1 + $0x13ec] ss:$16 sps:$4 sm:$0xff]  }
 0x240   :  { %5289 = vmatprep.subr.bf16.mxu0 %v8270_v17  ;;  %5848 = vmatprep.subr.bf16.mxu1 %v8273_v18  ;;  %v8358_v17 = vld [vmem:[%s11188_s1 + $0x13e0] ss:$16 sps:$4 sm:$0xff]   ;;  %v8361_v18 = vld [vmem:[%s11188_s1 + $0x13e8] ss:$16 sps:$4 sm:$0xff]  }
 0x242   :  { %5279 = vmatmul.mubr.bf16.vlgmr.msra.gmra.mrb[0].mxu0 %v8265_v19  ;;  %5838 = vmatmul.mubr.bf16.vlgmr.msra.gmra.mrb[0].mxu1 %v8265_v19  ;;  %v8369_v19 = vld [vmem:[%s11188_s1 + $0x1404] ss:$16 sps:$4 sm:$0xff]  }
 0x243   :  { %5290 = vmatpush1.bf16.msra.mxu0 %v8268_v20  ;;  %5849 = vmatpush1.bf16.msra.mxu1 %v8271_v21  ;;  %v8372_v20 = vld [vmem:[%s11188_s1 + $0x140c] ss:$16 sps:$4 sm:$0xff]  }
 0x244   :  { %5291 = vmatprep.subr.bf16.mxu0 %v8276_v22  ;;  %5850 = vmatprep.subr.bf16.mxu1 %v8279_v23  ;;  %v8364_v21 = vld [vmem:[%s11189_s0 + $0x48] ss:$100 sps:$4 sm:$0xff]   ;;  %v8367_v22 = vld [vmem:[%s11188_s1 + $0x1400] ss:$16 sps:$4 sm:$0xff]  }
 0x245   :  { %5321 = vmatprep.mubr.bf16.mxu0 %v8366_v24  ;;  %5880 = vmatprep.mubr.bf16.mxu1 %v8366_v24  ;;  %v8370_v23 = vld [vmem:[%s11188_s1 + $0x1408] ss:$16 sps:$4 sm:$0xff]   ;;  %v8375_v24 = vld [vmem:[%s11188_s1 + $0x1424] ss:$16 sps:$4 sm:$0xff]  }
 0x247   :  { %5292 = vmatpush1.bf16.msra.mxu0 %v8274_v25  ;;  %5851 = vmatpush1.bf16.msra.mxu1 %v8277_v26  ;;  %v8378_v25 = vld [vmem:[%s11188_s1 + $0x142c] ss:$16 sps:$4 sm:$0xff]   ;;  %v8465_v26 = vld [vmem:[%s11189_s0 + $0x54] ss:$100 sps:$4 sm:$0xff]  }
 0x248   :  { %5293 = vmatprep.subr.bf16.mxu0 %v8282_v27  ;;  %5852 = vmatprep.subr.bf16.mxu1 %v8285_v28  ;;  %v8373_v27 = vld [vmem:[%s11188_s1 + $0x1420] ss:$16 sps:$4 sm:$0xff]   ;;  %v8376_v28 = vld [vmem:[%s11188_s1 + $0x1428] ss:$16 sps:$4 sm:$0xff]  }
 0x24b   :  { %5294 = vmatpush1.bf16.msra.mxu0 %v8280_v29  ;;  %5853 = vmatpush1.bf16.msra.mxu1 %v8283_v30  ;;  %v8381_v29 = vld [vmem:[%s11188_s1 + $0x1444] ss:$16 sps:$4 sm:$0xff]   ;;  %v8384_v30 = vld [vmem:[%s11188_s1 + $0x144c] ss:$16 sps:$4 sm:$0xff]  }
 0x24c   :  { %5295 = vmatprep.subr.bf16.mxu0 %v8288_v31  ;;  %5854 = vmatprep.subr.bf16.mxu1 %v8291_v32  ;;  %v8379_v31 = vld [vmem:[%s11188_s1 + $0x1440] ss:$16 sps:$4 sm:$0xff]   ;;  %v8382_v32 = vld [vmem:[%s11188_s1 + $0x1448] ss:$16 sps:$4 sm:$0xff]  }
 0x24f   :  { %5296 = vmatpush1.bf16.msra.mxu0 %v8286_v33  ;;  %5855 = vmatpush1.bf16.msra.mxu1 %v8289_v34  ;;  %v8387_v33 = vld [vmem:[%s11188_s1 + $0x1464] ss:$16 sps:$4 sm:$0xff]   ;;  %v8390_v34 = vld [vmem:[%s11188_s1 + $0x146c] ss:$16 sps:$4 sm:$0xff]  }
 0x250   :  { %5297 = vmatprep.subr.bf16.mxu0 %v8294_v35  ;;  %5856 = vmatprep.subr.bf16.mxu1 %v8297_v36  ;;  %v8385_v35 = vld [vmem:[%s11188_s1 + $0x1460] ss:$16 sps:$4 sm:$0xff]   ;;  %v8388_v36 = vld [vmem:[%s11188_s1 + $0x1468] ss:$16 sps:$4 sm:$0xff]  }
 0x253   :  { %5298 = vmatpush1.bf16.msra.mxu0 %v8292_v37  ;;  %5857 = vmatpush1.bf16.msra.mxu1 %v8295_v38  ;;  %v8393_v37 = vld [vmem:[%s11188_s1 + $0x1484] ss:$16 sps:$4 sm:$0xff]   ;;  %v8396_v38 = vld [vmem:[%s11188_s1 + $0x148c] ss:$16 sps:$4 sm:$0xff]  }
 0x254   :  { %5299 = vmatprep.subr.bf16.mxu0 %v8300_v39  ;;  %5858 = vmatprep.subr.bf16.mxu1 %v8303_v40  ;;  %v8391_v39 = vld [vmem:[%s11188_s1 + $0x1480] ss:$16 sps:$4 sm:$0xff]   ;;  %v8394_v40 = vld [vmem:[%s11188_s1 + $0x1488] ss:$16 sps:$4 sm:$0xff]  }
 0x257   :  { %5300 = vmatpush1.bf16.msra.mxu0 %v8298_v41  ;;  %5859 = vmatpush1.bf16.msra.mxu1 %v8301_v42  ;;  %v8399_v41 = vld [vmem:[%s11188_s1 + $0x14a4] ss:$16 sps:$4 sm:$0xff]   ;;  %v8402_v42 = vld [vmem:[%s11188_s1 + $0x14ac] ss:$16 sps:$4 sm:$0xff]  }
 0x258   :  { %5301 = vmatprep.subr.bf16.mxu0 %v8306_v43  ;;  %5860 = vmatprep.subr.bf16.mxu1 %v8309_v44  ;;  %v8397_v43 = vld [vmem:[%s11188_s1 + $0x14a0] ss:$16 sps:$4 sm:$0xff]   ;;  %v8400_v44 = vld [vmem:[%s11188_s1 + $0x14a8] ss:$16 sps:$4 sm:$0xff]  }
 0x25b   :  { %5302 = vmatpush1.bf16.msra.mxu0 %v8304_v45  ;;  %5861 = vmatpush1.bf16.msra.mxu1 %v8307_v46  ;;  %v8405_v45 = vld [vmem:[%s11188_s1 + $0x14c4] ss:$16 sps:$4 sm:$0xff]   ;;  %v8408_v46 = vld [vmem:[%s11188_s1 + $0x14cc] ss:$16 sps:$4 sm:$0xff]  }
 0x25c   :  { %5303 = vmatprep.subr.bf16.mxu0 %v8312_v47  ;;  %5862 = vmatprep.subr.bf16.mxu1 %v8315_v48  ;;  %v8403_v47 = vld [vmem:[%s11188_s1 + $0x14c0] ss:$16 sps:$4 sm:$0xff]   ;;  %v8406_v48 = vld [vmem:[%s11188_s1 + $0x14c8] ss:$16 sps:$4 sm:$0xff]  }
 0x25f   :  { %5304 = vmatpush1.bf16.msra.mxu0 %v8310_v49  ;;  %5863 = vmatpush1.bf16.msra.mxu1 %v8313_v50  ;;  %v8411_v49 = vld [vmem:[%s11188_s1 + $0x14e4] ss:$16 sps:$4 sm:$0xff]   ;;  %v8414_v50 = vld [vmem:[%s11188_s1 + $0x14ec] ss:$16 sps:$4 sm:$0xff]  }
 0x260   :  { %5305 = vmatprep.subr.bf16.mxu0 %v8318_v51  ;;  %5864 = vmatprep.subr.bf16.mxu1 %v8321_v52  ;;  %v8409_v51 = vld [vmem:[%s11188_s1 + $0x14e0] ss:$16 sps:$4 sm:$0xff]   ;;  %v8412_v52 = vld [vmem:[%s11188_s1 + $0x14e8] ss:$16 sps:$4 sm:$0xff]  }
 0x263   :  { %5306 = vmatpush1.bf16.msra.mxu0 %v8316_v53  ;;  %5865 = vmatpush1.bf16.msra.mxu1 %v8319_v54  ;;  %v8417_v53 = vld [vmem:[%s11188_s1 + $0x1504] ss:$16 sps:$4 sm:$0xff]   ;;  %v8420_v54 = vld [vmem:[%s11188_s1 + $0x150c] ss:$16 sps:$4 sm:$0xff]  }
 0x264   :  { %5307 = vmatprep.subr.bf16.mxu0 %v8324_v55  ;;  %5866 = vmatprep.subr.bf16.mxu1 %v8327_v56  ;;  %v8415_v55 = vld [vmem:[%s11188_s1 + $0x1500] ss:$16 sps:$4 sm:$0xff]   ;;  %v8418_v56 = vld [vmem:[%s11188_s1 + $0x1508] ss:$16 sps:$4 sm:$0xff]  }
 0x267   :  { %5308 = vmatpush1.bf16.msra.mxu0 %v8322_v57  ;;  %5867 = vmatpush1.bf16.msra.mxu1 %v8325_v58  ;;  %v8423_v57 = vld [vmem:[%s11188_s1 + $0x1524] ss:$16 sps:$4 sm:$0xff]   ;;  %v8426_v58 = vld [vmem:[%s11188_s1 + $0x152c] ss:$16 sps:$4 sm:$0xff]  }
 0x268   :  { %5309 = vmatprep.subr.bf16.mxu0 %v8330_v59  ;;  %5868 = vmatprep.subr.bf16.mxu1 %v8333_v60  ;;  %v8421_v59 = vld [vmem:[%s11188_s1 + $0x1520] ss:$16 sps:$4 sm:$0xff]   ;;  %v8424_v60 = vld [vmem:[%s11188_s1 + $0x1528] ss:$16 sps:$4 sm:$0xff]  }
 0x26b   :  { %5310 = vmatpush1.bf16.msra.mxu0 %v8328_v61  ;;  %5869 = vmatpush1.bf16.msra.mxu1 %v8331_v62  ;;  %v8429_v61 = vld [vmem:[%s11188_s1 + $0x1544] ss:$16 sps:$4 sm:$0xff]   ;;  %v8432_v62 = vld [vmem:[%s11188_s1 + $0x154c] ss:$16 sps:$4 sm:$0xff]  }
 0x26c   :  { %5311 = vmatprep.subr.bf16.mxu0 %v8336_v63  ;;  %5870 = vmatprep.subr.bf16.mxu1 %v8339_v0  ;;  %v8427_v63 = vld [vmem:[%s11188_s1 + $0x1540] ss:$16 sps:$4 sm:$0xff]   ;;  %v8430_v0 = vld [vmem:[%s11188_s1 + $0x1548] ss:$16 sps:$4 sm:$0xff]  }
 0x26f   :  { %5312 = vmatpush1.bf16.msra.mxu0 %v8334_v1  ;;  %5871 = vmatpush1.bf16.msra.mxu1 %v8337_v2  ;;  %v8435_v1 = vld [vmem:[%s11188_s1 + $0x1564] ss:$16 sps:$4 sm:$0xff]   ;;  %v8438_v2 = vld [vmem:[%s11188_s1 + $0x156c] ss:$16 sps:$4 sm:$0xff]  }
 0x270   :  { %5313 = vmatprep.subr.bf16.mxu0 %v8342_v3  ;;  %5872 = vmatprep.subr.bf16.mxu1 %v8345_v4  ;;  %v8433_v3 = vld [vmem:[%s11188_s1 + $0x1560] ss:$16 sps:$4 sm:$0xff]   ;;  %v8436_v4 = vld [vmem:[%s11188_s1 + $0x1568] ss:$16 sps:$4 sm:$0xff]  }
 0x273   :  { %5314 = vmatpush1.bf16.msra.mxu0 %v8340_v5  ;;  %5873 = vmatpush1.bf16.msra.mxu1 %v8343_v6  ;;  %v8441_v5 = vld [vmem:[%s11188_s1 + $0x1584] ss:$16 sps:$4 sm:$0xff]   ;;  %v8444_v6 = vld [vmem:[%s11188_s1 + $0x158c] ss:$16 sps:$4 sm:$0xff]  }
 0x274   :  { %5315 = vmatprep.subr.bf16.mxu0 %v8348_v7  ;;  %5874 = vmatprep.subr.bf16.mxu1 %v8351_v8  ;;  %v8439_v7 = vld [vmem:[%s11188_s1 + $0x1580] ss:$16 sps:$4 sm:$0xff]   ;;  %v8442_v8 = vld [vmem:[%s11188_s1 + $0x1588] ss:$16 sps:$4 sm:$0xff]  }
 0x277   :  { %5316 = vmatpush1.bf16.msra.mxu0 %v8346_v9  ;;  %5875 = vmatpush1.bf16.msra.mxu1 %v8349_v10  ;;  %v8447_v9 = vld [vmem:[%s11188_s1 + $0x15a4] ss:$16 sps:$4 sm:$0xff]   ;;  %v8450_v10 = vld [vmem:[%s11188_s1 + $0x15ac] ss:$16 sps:$4 sm:$0xff]  }
 0x278   :  { %5317 = vmatprep.subr.bf16.mxu0 %v8354_v11  ;;  %5876 = vmatprep.subr.bf16.mxu1 %v8357_v12  ;;  %v8445_v11 = vld [vmem:[%s11188_s1 + $0x15a0] ss:$16 sps:$4 sm:$0xff]   ;;  %v8448_v12 = vld [vmem:[%s11188_s1 + $0x15a8] ss:$16 sps:$4 sm:$0xff]  }
 0x27b   :  { %5318 = vmatpush1.bf16.msra.mxu0 %v8352_v13  ;;  %5877 = vmatpush1.bf16.msra.mxu1 %v8355_v14  ;;  %v8453_v13 = vld [vmem:[%s11188_s1 + $0x15c4] ss:$16 sps:$4 sm:$0xff]   ;;  %v8456_v14 = vld [vmem:[%s11188_s1 + $0x15cc] ss:$16 sps:$4 sm:$0xff]  }
 0x27c   :  { %5319 = vmatprep.subr.bf16.mxu0 %v8360_v15  ;;  %5878 = vmatprep.subr.bf16.mxu1 %v8363_v16  ;;  %v8451_v15 = vld [vmem:[%s11188_s1 + $0x15c0] ss:$16 sps:$4 sm:$0xff]   ;;  %v8454_v16 = vld [vmem:[%s11188_s1 + $0x15c8] ss:$16 sps:$4 sm:$0xff]  }
 0x27f   :  { %5320 = vmatpush1.bf16.msra.mxu0 %v8358_v17  ;;  %5879 = vmatpush1.bf16.msra.mxu1 %v8361_v18  ;;  %v8459_v17 = vld [vmem:[%s11188_s1 + $0x15e4] ss:$16 sps:$4 sm:$0xff]   ;;  %v8462_v18 = vld [vmem:[%s11188_s1 + $0x15ec] ss:$16 sps:$4 sm:$0xff]  }
 0x280   :  { %5332 = vmatprep.subr.bf16.mxu0 %v8369_v19  ;;  %5891 = vmatprep.subr.bf16.mxu1 %v8372_v20  ;;  %v8457_v19 = vld [vmem:[%s11188_s1 + $0x15e0] ss:$16 sps:$4 sm:$0xff]   ;;  %v8460_v20 = vld [vmem:[%s11188_s1 + $0x15e8] ss:$16 sps:$4 sm:$0xff]  }
 0x282   :  { %5322 = vmatmul.mubr.bf16.vlgmr.msra.gmra.mrb[0].mxu0 %v8364_v21  ;;  %5881 = vmatmul.mubr.bf16.vlgmr.msra.gmra.mrb[0].mxu1 %v8364_v21  ;;  %v8468_v21 = vld [vmem:[%s11188_s1 + $0x1604] ss:$16 sps:$4 sm:$0xff]  }
 0x283   :  { %5333 = vmatpush1.bf16.msra.mxu0 %v8367_v22  ;;  %5892 = vmatpush1.bf16.msra.mxu1 %v8370_v23  ;;  %v8471_v22 = vld [vmem:[%s11188_s1 + $0x160c] ss:$16 sps:$4 sm:$0xff]   ;;  %v8463_v23 = vld [vmem:[%s11189_s0 + $0x50] ss:$100 sps:$4 sm:$0xff]  }
 0x284   :  { %5334 = vmatprep.subr.bf16.mxu0 %v8375_v24  ;;  %5893 = vmatprep.subr.bf16.mxu1 %v8378_v25  ;;  %v8466_v24 = vld [vmem:[%s11188_s1 + $0x1600] ss:$16 sps:$4 sm:$0xff]   ;;  %v8469_v25 = vld [vmem:[%s11188_s1 + $0x1608] ss:$16 sps:$4 sm:$0xff]  }
 0x285   :  { %5364 = vmatprep.mubr.bf16.mxu0 %v8465_v26  ;;  %5923 = vmatprep.mubr.bf16.mxu1 %v8465_v26  ;;  %v8474_v26 = vld [vmem:[%s11188_s1 + $0x1624] ss:$16 sps:$4 sm:$0xff]  }
 0x287   :  { %5335 = vmatpush1.bf16.msra.mxu0 %v8373_v27  ;;  %5894 = vmatpush1.bf16.msra.mxu1 %v8376_v28  ;;  %v8477_v27 = vld [vmem:[%s11188_s1 + $0x162c] ss:$16 sps:$4 sm:$0xff]  }
 0x288   :  { %5336 = vmatprep.subr.bf16.mxu0 %v8381_v29  ;;  %5895 = vmatprep.subr.bf16.mxu1 %v8384_v30  ;;  %v8564_v28 = vld [vmem:[%s11189_s0 + $0x5c] ss:$100 sps:$4 sm:$0xff]   ;;  %v8475_v30 = vld [vmem:[%s11188_s1 + $0x1628] ss:$16 sps:$4 sm:$0xff]  }
 0x289   :  { %v8472_v29 = vld [vmem:[%s11188_s1 + $0x1620] ss:$16 sps:$4 sm:$0xff]  }
 0x28b   :  { %5337 = vmatpush1.bf16.msra.mxu0 %v8379_v31  ;;  %5896 = vmatpush1.bf16.msra.mxu1 %v8382_v32  ;;  %v8480_v31 = vld [vmem:[%s11188_s1 + $0x1644] ss:$16 sps:$4 sm:$0xff]   ;;  %v8483_v32 = vld [vmem:[%s11188_s1 + $0x164c] ss:$16 sps:$4 sm:$0xff]  }
 0x28c   :  { %5338 = vmatprep.subr.bf16.mxu0 %v8387_v33  ;;  %5897 = vmatprep.subr.bf16.mxu1 %v8390_v34  ;;  %v8478_v33 = vld [vmem:[%s11188_s1 + $0x1640] ss:$16 sps:$4 sm:$0xff]   ;;  %v8481_v34 = vld [vmem:[%s11188_s1 + $0x1648] ss:$16 sps:$4 sm:$0xff]  }
 0x28f   :  { %5339 = vmatpush1.bf16.msra.mxu0 %v8385_v35  ;;  %5898 = vmatpush1.bf16.msra.mxu1 %v8388_v36  ;;  %v8486_v35 = vld [vmem:[%s11188_s1 + $0x1664] ss:$16 sps:$4 sm:$0xff]   ;;  %v8489_v36 = vld [vmem:[%s11188_s1 + $0x166c] ss:$16 sps:$4 sm:$0xff]  }
 0x290   :  { %5340 = vmatprep.subr.bf16.mxu0 %v8393_v37  ;;  %5899 = vmatprep.subr.bf16.mxu1 %v8396_v38  ;;  %v8484_v37 = vld [vmem:[%s11188_s1 + $0x1660] ss:$16 sps:$4 sm:$0xff]   ;;  %v8487_v38 = vld [vmem:[%s11188_s1 + $0x1668] ss:$16 sps:$4 sm:$0xff]  }
 0x293   :  { %5341 = vmatpush1.bf16.msra.mxu0 %v8391_v39  ;;  %5900 = vmatpush1.bf16.msra.mxu1 %v8394_v40  ;;  %v8492_v39 = vld [vmem:[%s11188_s1 + $0x1684] ss:$16 sps:$4 sm:$0xff]   ;;  %v8495_v40 = vld [vmem:[%s11188_s1 + $0x168c] ss:$16 sps:$4 sm:$0xff]  }
 0x294   :  { %5342 = vmatprep.subr.bf16.mxu0 %v8399_v41  ;;  %5901 = vmatprep.subr.bf16.mxu1 %v8402_v42  ;;  %v8490_v41 = vld [vmem:[%s11188_s1 + $0x1680] ss:$16 sps:$4 sm:$0xff]   ;;  %v8493_v42 = vld [vmem:[%s11188_s1 + $0x1688] ss:$16 sps:$4 sm:$0xff]  }
 0x297   :  { %5343 = vmatpush1.bf16.msra.mxu0 %v8397_v43  ;;  %5902 = vmatpush1.bf16.msra.mxu1 %v8400_v44  ;;  %v8498_v43 = vld [vmem:[%s11188_s1 + $0x16a4] ss:$16 sps:$4 sm:$0xff]   ;;  %v8501_v44 = vld [vmem:[%s11188_s1 + $0x16ac] ss:$16 sps:$4 sm:$0xff]  }
 0x298   :  { %5344 = vmatprep.subr.bf16.mxu0 %v8405_v45  ;;  %5903 = vmatprep.subr.bf16.mxu1 %v8408_v46  ;;  %v8496_v45 = vld [vmem:[%s11188_s1 + $0x16a0] ss:$16 sps:$4 sm:$0xff]   ;;  %v8499_v46 = vld [vmem:[%s11188_s1 + $0x16a8] ss:$16 sps:$4 sm:$0xff]  }
 0x29b   :  { %5345 = vmatpush1.bf16.msra.mxu0 %v8403_v47  ;;  %5904 = vmatpush1.bf16.msra.mxu1 %v8406_v48  ;;  %v8504_v47 = vld [vmem:[%s11188_s1 + $0x16c4] ss:$16 sps:$4 sm:$0xff]   ;;  %v8507_v48 = vld [vmem:[%s11188_s1 + $0x16cc] ss:$16 sps:$4 sm:$0xff]  }
 0x29c   :  { %5346 = vmatprep.subr.bf16.mxu0 %v8411_v49  ;;  %5905 = vmatprep.subr.bf16.mxu1 %v8414_v50  ;;  %v8502_v49 = vld [vmem:[%s11188_s1 + $0x16c0] ss:$16 sps:$4 sm:$0xff]   ;;  %v8505_v50 = vld [vmem:[%s11188_s1 + $0x16c8] ss:$16 sps:$4 sm:$0xff]  }
 0x29f   :  { %5347 = vmatpush1.bf16.msra.mxu0 %v8409_v51  ;;  %5906 = vmatpush1.bf16.msra.mxu1 %v8412_v52  ;;  %v8510_v51 = vld [vmem:[%s11188_s1 + $0x16e4] ss:$16 sps:$4 sm:$0xff]   ;;  %v8513_v52 = vld [vmem:[%s11188_s1 + $0x16ec] ss:$16 sps:$4 sm:$0xff]  }
 0x2a0   :  { %5348 = vmatprep.subr.bf16.mxu0 %v8417_v53  ;;  %5907 = vmatprep.subr.bf16.mxu1 %v8420_v54  ;;  %v8508_v53 = vld [vmem:[%s11188_s1 + $0x16e0] ss:$16 sps:$4 sm:$0xff]   ;;  %v8511_v54 = vld [vmem:[%s11188_s1 + $0x16e8] ss:$16 sps:$4 sm:$0xff]  }
 0x2a3   :  { %5349 = vmatpush1.bf16.msra.mxu0 %v8415_v55  ;;  %5908 = vmatpush1.bf16.msra.mxu1 %v8418_v56  ;;  %v8516_v55 = vld [vmem:[%s11188_s1 + $0x1704] ss:$16 sps:$4 sm:$0xff]   ;;  %v8519_v56 = vld [vmem:[%s11188_s1 + $0x170c] ss:$16 sps:$4 sm:$0xff]  }
 0x2a4   :  { %5350 = vmatprep.subr.bf16.mxu0 %v8423_v57  ;;  %5909 = vmatprep.subr.bf16.mxu1 %v8426_v58  ;;  %v8514_v57 = vld [vmem:[%s11188_s1 + $0x1700] ss:$16 sps:$4 sm:$0xff]   ;;  %v8517_v58 = vld [vmem:[%s11188_s1 + $0x1708] ss:$16 sps:$4 sm:$0xff]  }
 0x2a7   :  { %5351 = vmatpush1.bf16.msra.mxu0 %v8421_v59  ;;  %5910 = vmatpush1.bf16.msra.mxu1 %v8424_v60  ;;  %v8522_v59 = vld [vmem:[%s11188_s1 + $0x1724] ss:$16 sps:$4 sm:$0xff]   ;;  %v8525_v60 = vld [vmem:[%s11188_s1 + $0x172c] ss:$16 sps:$4 sm:$0xff]  }
 0x2a8   :  { %5352 = vmatprep.subr.bf16.mxu0 %v8429_v61  ;;  %5911 = vmatprep.subr.bf16.mxu1 %v8432_v62  ;;  %v8520_v61 = vld [vmem:[%s11188_s1 + $0x1720] ss:$16 sps:$4 sm:$0xff]   ;;  %v8523_v62 = vld [vmem:[%s11188_s1 + $0x1728] ss:$16 sps:$4 sm:$0xff]  }
 0x2ab   :  { %5353 = vmatpush1.bf16.msra.mxu0 %v8427_v63  ;;  %5912 = vmatpush1.bf16.msra.mxu1 %v8430_v0  ;;  %v8528_v63 = vld [vmem:[%s11188_s1 + $0x1744] ss:$16 sps:$4 sm:$0xff]   ;;  %v8531_v0 = vld [vmem:[%s11188_s1 + $0x174c] ss:$16 sps:$4 sm:$0xff]  }
 0x2ac   :  { %5354 = vmatprep.subr.bf16.mxu0 %v8435_v1  ;;  %5913 = vmatprep.subr.bf16.mxu1 %v8438_v2  ;;  %v8526_v1 = vld [vmem:[%s11188_s1 + $0x1740] ss:$16 sps:$4 sm:$0xff]   ;;  %v8529_v2 = vld [vmem:[%s11188_s1 + $0x1748] ss:$16 sps:$4 sm:$0xff]  }
 0x2af   :  { %5355 = vmatpush1.bf16.msra.mxu0 %v8433_v3  ;;  %5914 = vmatpush1.bf16.msra.mxu1 %v8436_v4  ;;  %v8534_v3 = vld [vmem:[%s11188_s1 + $0x1764] ss:$16 sps:$4 sm:$0xff]   ;;  %v8537_v4 = vld [vmem:[%s11188_s1 + $0x176c] ss:$16 sps:$4 sm:$0xff]  }
 0x2b0   :  { %5356 = vmatprep.subr.bf16.mxu0 %v8441_v5  ;;  %5915 = vmatprep.subr.bf16.mxu1 %v8444_v6  ;;  %v8532_v5 = vld [vmem:[%s11188_s1 + $0x1760] ss:$16 sps:$4 sm:$0xff]   ;;  %v8535_v6 = vld [vmem:[%s11188_s1 + $0x1768] ss:$16 sps:$4 sm:$0xff]  }
 0x2b3   :  { %5357 = vmatpush1.bf16.msra.mxu0 %v8439_v7  ;;  %5916 = vmatpush1.bf16.msra.mxu1 %v8442_v8  ;;  %v8540_v7 = vld [vmem:[%s11188_s1 + $0x1784] ss:$16 sps:$4 sm:$0xff]   ;;  %v8543_v8 = vld [vmem:[%s11188_s1 + $0x178c] ss:$16 sps:$4 sm:$0xff]  }
 0x2b4   :  { %5358 = vmatprep.subr.bf16.mxu0 %v8447_v9  ;;  %5917 = vmatprep.subr.bf16.mxu1 %v8450_v10  ;;  %v8538_v9 = vld [vmem:[%s11188_s1 + $0x1780] ss:$16 sps:$4 sm:$0xff]   ;;  %v8541_v10 = vld [vmem:[%s11188_s1 + $0x1788] ss:$16 sps:$4 sm:$0xff]  }
 0x2b7   :  { %5359 = vmatpush1.bf16.msra.mxu0 %v8445_v11  ;;  %5918 = vmatpush1.bf16.msra.mxu1 %v8448_v12  ;;  %v8546_v11 = vld [vmem:[%s11188_s1 + $0x17a4] ss:$16 sps:$4 sm:$0xff]   ;;  %v8549_v12 = vld [vmem:[%s11188_s1 + $0x17ac] ss:$16 sps:$4 sm:$0xff]  }
 0x2b8   :  { %5360 = vmatprep.subr.bf16.mxu0 %v8453_v13  ;;  %5919 = vmatprep.subr.bf16.mxu1 %v8456_v14  ;;  %v8544_v13 = vld [vmem:[%s11188_s1 + $0x17a0] ss:$16 sps:$4 sm:$0xff]   ;;  %v8547_v14 = vld [vmem:[%s11188_s1 + $0x17a8] ss:$16 sps:$4 sm:$0xff]  }
 0x2bb   :  { %5361 = vmatpush1.bf16.msra.mxu0 %v8451_v15  ;;  %5920 = vmatpush1.bf16.msra.mxu1 %v8454_v16  ;;  %v8552_v15 = vld [vmem:[%s11188_s1 + $0x17c4] ss:$16 sps:$4 sm:$0xff]   ;;  %v8555_v16 = vld [vmem:[%s11188_s1 + $0x17cc] ss:$16 sps:$4 sm:$0xff]  }
 0x2bc   :  { %5362 = vmatprep.subr.bf16.mxu0 %v8459_v17  ;;  %5921 = vmatprep.subr.bf16.mxu1 %v8462_v18  ;;  %v8550_v17 = vld [vmem:[%s11188_s1 + $0x17c0] ss:$16 sps:$4 sm:$0xff]   ;;  %v8553_v18 = vld [vmem:[%s11188_s1 + $0x17c8] ss:$16 sps:$4 sm:$0xff]  }
 0x2bf   :  { %5363 = vmatpush1.bf16.msra.mxu0 %v8457_v19  ;;  %5922 = vmatpush1.bf16.msra.mxu1 %v8460_v20  ;;  %v8558_v19 = vld [vmem:[%s11188_s1 + $0x17e4] ss:$16 sps:$4 sm:$0xff]   ;;  %v8561_v20 = vld [vmem:[%s11188_s1 + $0x17ec] ss:$16 sps:$4 sm:$0xff]  }
 0x2c0   :  { %5375 = vmatprep.subr.bf16.mxu0 %v8468_v21  ;;  %5934 = vmatprep.subr.bf16.mxu1 %v8471_v22  ;;  %v8556_v21 = vld [vmem:[%s11188_s1 + $0x17e0] ss:$16 sps:$4 sm:$0xff]   ;;  %v8559_v22 = vld [vmem:[%s11188_s1 + $0x17e8] ss:$16 sps:$4 sm:$0xff]  }
 0x2c2   :  { %5365 = vmatmul.mubr.bf16.vlgmr.msra.gmra.mrb[0].mxu0 %v8463_v23  ;;  %5924 = vmatmul.mubr.bf16.vlgmr.msra.gmra.mrb[0].mxu1 %v8463_v23  ;;  %v8567_v23 = vld [vmem:[%s11188_s1 + $0x1804] ss:$16 sps:$4 sm:$0xff]  }
 0x2c3   :  { %5376 = vmatpush1.bf16.msra.mxu0 %v8466_v24  ;;  %5935 = vmatpush1.bf16.msra.mxu1 %v8469_v25  ;;  %v8570_v24 = vld [vmem:[%s11188_s1 + $0x180c] ss:$16 sps:$4 sm:$0xff]  }
 0x2c4   :  { %5377 = vmatprep.subr.bf16.mxu0 %v8474_v26  ;;  %5936 = vmatprep.subr.bf16.mxu1 %v8477_v27  ;;  %v8562_v25 = vld [vmem:[%s11189_s0 + $0x58] ss:$100 sps:$4 sm:$0xff]   ;;  %v8565_v26 = vld [vmem:[%s11188_s1 + $0x1800] ss:$16 sps:$4 sm:$0xff]  }
 0x2c5   :  { %5407 = vmatprep.mubr.bf16.mxu0 %v8564_v28  ;;  %5966 = vmatprep.mubr.bf16.mxu1 %v8564_v28  ;;  %v8568_v27 = vld [vmem:[%s11188_s1 + $0x1808] ss:$16 sps:$4 sm:$0xff]   ;;  %v8573_v28 = vld [vmem:[%s11188_s1 + $0x1824] ss:$16 sps:$4 sm:$0xff]  }
 0x2c7   :  { %5378 = vmatpush1.bf16.msra.mxu0 %v8472_v29  ;;  %5937 = vmatpush1.bf16.msra.mxu1 %v8475_v30  ;;  %v8576_v29 = vld [vmem:[%s11188_s1 + $0x182c] ss:$16 sps:$4 sm:$0xff]   ;;  %v8571_v30 = vld [vmem:[%s11188_s1 + $0x1820] ss:$16 sps:$4 sm:$0xff]  }
 0x2c8   :  { %5379 = vmatprep.subr.bf16.mxu0 %v8480_v31  ;;  %5938 = vmatprep.subr.bf16.mxu1 %v8483_v32  ;;  %v8574_v31 = vld [vmem:[%s11188_s1 + $0x1828] ss:$16 sps:$4 sm:$0xff]   ;;  %v8579_v32 = vld [vmem:[%s11188_s1 + $0x1844] ss:$16 sps:$4 sm:$0xff]  }
 0x2cb   :  { %5380 = vmatpush1.bf16.msra.mxu0 %v8478_v33  ;;  %5939 = vmatpush1.bf16.msra.mxu1 %v8481_v34  ;;  %v8582_v33 = vld [vmem:[%s11188_s1 + $0x184c] ss:$16 sps:$4 sm:$0xff]   ;;  %v8622_v34 = vmov 0  }
 0x2cc   :  { %5381 = vmatprep.subr.bf16.mxu0 %v8486_v35  ;;  %5940 = vmatprep.subr.bf16.mxu1 %v8489_v36  ;;  %v8577_v35 = vld [vmem:[%s11188_s1 + $0x1840] ss:$16 sps:$4 sm:$0xff]   ;;  %v8580_v36 = vld [vmem:[%s11188_s1 + $0x1848] ss:$16 sps:$4 sm:$0xff]  }
 0x2cf   :  { %5382 = vmatpush1.bf16.msra.mxu0 %v8484_v37  ;;  %5941 = vmatpush1.bf16.msra.mxu1 %v8487_v38  ;;  %v8585_v37 = vld [vmem:[%s11188_s1 + $0x1864] ss:$16 sps:$4 sm:$0xff]   ;;  %v8588_v38 = vld [vmem:[%s11188_s1 + $0x186c] ss:$16 sps:$4 sm:$0xff]  }
 0x2d0   :  { %5383 = vmatprep.subr.bf16.mxu0 %v8492_v39  ;;  %5942 = vmatprep.subr.bf16.mxu1 %v8495_v40  ;;  %v8583_v39 = vld [vmem:[%s11188_s1 + $0x1860] ss:$16 sps:$4 sm:$0xff]   ;;  %v8586_v40 = vld [vmem:[%s11188_s1 + $0x1868] ss:$16 sps:$4 sm:$0xff]  }
 0x2d3   :  { %5384 = vmatpush1.bf16.msra.mxu0 %v8490_v41  ;;  %5943 = vmatpush1.bf16.msra.mxu1 %v8493_v42  ;;  %v8590_v41 = vld [vmem:[%s11190_s3 + $0x40] sm:$0xff]  }
 0x2d4   :  { %5385 = vmatprep.subr.bf16.mxu0 %v8498_v43  ;;  %5944 = vmatprep.subr.bf16.mxu1 %v8501_v44  ;;  %v8591_v42 = vld [vmem:[%s11190_s3 + $0xc0] sm:$0xff]  }
 0x2d5   :  { %v8589_v43 = vld [vmem:[%s11189_s0 + $0x60] ss:$100 sps:$4 sm:$0xff]  }
 0x2d6   :  { %v8592_v44 = vld [vmem:[%s11190_s3] sm:$0xff]  }
 0x2d7   :  { %5386 = vmatpush1.bf16.msra.mxu0 %v8496_v45  ;;  %5945 = vmatpush1.bf16.msra.mxu1 %v8499_v46  ;;  %v8593_v45 = vld [vmem:[%s11190_s3 + $0x80] sm:$0xff]   ;;  %v8594_v46 = vld [vmem:[%s11190_s3 + $0x48] sm:$0xff]  }
 0x2d8   :  { %5387 = vmatprep.subr.bf16.mxu0 %v8504_v47  ;;  %5946 = vmatprep.subr.bf16.mxu1 %v8507_v48  ;;  %v8595_v47 = vld [vmem:[%s11190_s3 + $0xc8] sm:$0xff]  }
 0x2d9   :  { %v8596_v48 = vld [vmem:[%s11190_s3 + $0x8] sm:$0xff]  }
 0x2db   :  { %5388 = vmatpush1.bf16.msra.mxu0 %v8502_v49  ;;  %5947 = vmatpush1.bf16.msra.mxu1 %v8505_v50  ;;  %v8597_v49 = vld [vmem:[%s11190_s3 + $0x88] sm:$0xff]   ;;  %v8598_v50 = vld [vmem:[%s11190_s3 + $0x50] sm:$0xff]  }
 0x2dc   :  { %5389 = vmatprep.subr.bf16.mxu0 %v8510_v51  ;;  %5948 = vmatprep.subr.bf16.mxu1 %v8513_v52  ;;  %v8599_v51 = vld [vmem:[%s11190_s3 + $0xd0] sm:$0xff]  }
 0x2dd   :  { %v8600_v52 = vld [vmem:[%s11190_s3 + $0x10] sm:$0xff]  }
 0x2df   :  { %5390 = vmatpush1.bf16.msra.mxu0 %v8508_v53  ;;  %5949 = vmatpush1.bf16.msra.mxu1 %v8511_v54  ;;  %v8601_v53 = vld [vmem:[%s11190_s3 + $0x90] sm:$0xff]   ;;  %v8602_v54 = vld [vmem:[%s11190_s3 + $0x58] sm:$0xff]  }
 0x2e0   :  { %5391 = vmatprep.subr.bf16.mxu0 %v8516_v55  ;;  %5950 = vmatprep.subr.bf16.mxu1 %v8519_v56  ;;  %v8603_v55 = vld [vmem:[%s11190_s3 + $0xd8] sm:$0xff]  }
 0x2e1   :  { %v8604_v56 = vld [vmem:[%s11190_s3 + $0x18] sm:$0xff]  }
 0x2e3   :  { %5392 = vmatpush1.bf16.msra.mxu0 %v8514_v57  ;;  %5951 = vmatpush1.bf16.msra.mxu1 %v8517_v58  ;;  %v8605_v57 = vld [vmem:[%s11190_s3 + $0x98] sm:$0xff]   ;;  %v8606_v58 = vld [vmem:[%s11190_s3 + $0x60] sm:$0xff]  }
 0x2e4   :  { %5393 = vmatprep.subr.bf16.mxu0 %v8522_v59  ;;  %5952 = vmatprep.subr.bf16.mxu1 %v8525_v60  ;;  %v8607_v59 = vld [vmem:[%s11190_s3 + $0xe0] sm:$0xff]  }
 0x2e5   :  { %v8608_v60 = vld [vmem:[%s11190_s3 + $0x20] sm:$0xff]  }
 0x2e7   :  { %5394 = vmatpush1.bf16.msra.mxu0 %v8520_v61  ;;  %5953 = vmatpush1.bf16.msra.mxu1 %v8523_v62  ;;  %v8609_v61 = vld [vmem:[%s11190_s3 + $0xa0] sm:$0xff]   ;;  %v8610_v62 = vld [vmem:[%s11190_s3 + $0x68] sm:$0xff]  }
 0x2e8   :  { %5395 = vmatprep.subr.bf16.mxu0 %v8528_v63  ;;  %5954 = vmatprep.subr.bf16.mxu1 %v8531_v0  ;;  %v8611_v63 = vld [vmem:[%s11190_s3 + $0xe8] sm:$0xff]  }
 0x2e9   :  { %v8612_v0 = vld [vmem:[%s11190_s3 + $0x28] sm:$0xff]  }
 0x2eb   :  { %5396 = vmatpush1.bf16.msra.mxu0 %v8526_v1  ;;  %5955 = vmatpush1.bf16.msra.mxu1 %v8529_v2  ;;  %v8613_v1 = vld [vmem:[%s11190_s3 + $0xa8] sm:$0xff]   ;;  %v8614_v2 = vld [vmem:[%s11190_s3 + $0x70] sm:$0xff]  }
 0x2ec   :  { %5397 = vmatprep.subr.bf16.mxu0 %v8534_v3  ;;  %5956 = vmatprep.subr.bf16.mxu1 %v8537_v4  ;;  %v8615_v3 = vld [vmem:[%s11190_s3 + $0xf0] sm:$0xff]  }
 0x2ed   :  { %v8616_v4 = vld [vmem:[%s11190_s3 + $0x30] sm:$0xff]  }
 0x2ef   :  { %5398 = vmatpush1.bf16.msra.mxu0 %v8532_v5  ;;  %5957 = vmatpush1.bf16.msra.mxu1 %v8535_v6  ;;  %v8617_v5 = vld [vmem:[%s11190_s3 + $0xb0] sm:$0xff]   ;;  %v8618_v6 = vld [vmem:[%s11190_s3 + $0x78] sm:$0xff]  }
 0x2f0   :  { %5399 = vmatprep.subr.bf16.mxu0 %v8540_v7  ;;  %5958 = vmatprep.subr.bf16.mxu1 %v8543_v8  ;;  %v8619_v7 = vld [vmem:[%s11190_s3 + $0xf8] sm:$0xff]  }
 0x2f1   :  { %v8620_v8 = vld [vmem:[%s11190_s3 + $0x38] sm:$0xff]  }
 0x2f3   :  { %5400 = vmatpush1.bf16.msra.mxu0 %v8538_v9  ;;  %5959 = vmatpush1.bf16.msra.mxu1 %v8541_v10  ;;  %v8621_v9 = vld [vmem:[%s11190_s3 + $0xb8] sm:$0xff]   ;;  %v833_v10 = vlaneseq }
 0x2f4   :  { %5401 = vmatprep.subr.bf16.mxu0 %v8546_v11  ;;  %5960 = vmatprep.subr.bf16.mxu1 %v8549_v12 }
 0x2f5   :  { %v834_v11 = vshrl.u32 %v833_v10, 7 }
 0x2f7   :  { %5402 = vmatpush1.bf16.msra.mxu0 %v8544_v13  ;;  %5961 = vmatpush1.bf16.msra.mxu1 %v8547_v14  ;;  %v835_v12 = vsub.s32 0, %v834_v11  ;;  %v843_v13 = vsub.s32 2, %v834_v11  ;;  %v831_v14 = vld [vmem:[%s11191_s2] sm:$0xf] }
 0x2f8   :  { %5403 = vmatprep.subr.bf16.mxu0 %v8552_v15  ;;  %5962 = vmatprep.subr.bf16.mxu1 %v8555_v16  ;;  %v839_v15 = vsub.s32 1, %v834_v11  ;;  %v847_v16 = vsub.s32 3, %v834_v11 }
 0x2fb   :  { %5404 = vmatpush1.bf16.msra.mxu0 %v8550_v17  ;;  %5963 = vmatpush1.bf16.msra.mxu1 %v8553_v18  ;;  %v836_v17 = vrot.slane %v831_v14, %v835_v12  ;;  %v844_v18 = vrot.slane %v831_v14, %v843_v13 }
 0x2fc   :  { %5405 = vmatprep.subr.bf16.mxu0 %v8558_v19  ;;  %5964 = vmatprep.subr.bf16.mxu1 %v8561_v20  ;;  %v840_v19 = vrot.slane %v831_v14, %v839_v15  ;;  %v848_v20 = vrot.slane %v831_v14, %v847_v16 }
 0x2ff   :  { %5406 = vmatpush1.bf16.msra.mxu0 %v8556_v21  ;;  %5965 = vmatpush1.bf16.msra.mxu1 %v8559_v22 }
 0x300   :  { %5418 = vmatprep.subr.bf16.mxu0 %v8567_v23  ;;  %5977 = vmatprep.subr.bf16.mxu1 %v8570_v24 }
 0x302   :  { %5408 = vmatmul.mubr.bf16.vlgmr.msra.gmra.mrb[0].mxu0 %v8562_v25  ;;  %5967 = vmatmul.mubr.bf16.vlgmr.msra.gmra.mrb[0].mxu1 %v8562_v25 }
 0x303   :  { %5419 = vmatpush1.bf16.msra.mxu0 %v8565_v26  ;;  %5978 = vmatpush1.bf16.msra.mxu1 %v8568_v27 }
 0x304   :  { %5420 = vmatprep.subr.bf16.mxu0 %v8573_v28  ;;  %5979 = vmatprep.subr.bf16.mxu1 %v8576_v29 }
 0x305   :  { %5450 = vmatprep.mubr.bf16.mxu0 %v8622_v34  ;;  %6009 = vmatprep.mubr.bf16.mxu1 %v8622_v34 }
 0x307   :  { %5421 = vmatpush1.bf16.msra.mxu0 %v8571_v30  ;;  %5980 = vmatpush1.bf16.msra.mxu1 %v8574_v31 }
 0x308   :  { %5422 = vmatprep.subr.bf16.mxu0 %v8579_v32  ;;  %5981 = vmatprep.subr.bf16.mxu1 %v8582_v33 }
 0x30b   :  { %5423 = vmatpush1.bf16.msra.mxu0 %v8577_v35  ;;  %5982 = vmatpush1.bf16.msra.mxu1 %v8580_v36 }
 0x30c   :  { %5424 = vmatprep.subr.bf16.mxu0 %v8585_v37  ;;  %5983 = vmatprep.subr.bf16.mxu1 %v8588_v38 }
 0x30f   :  { %5425 = vmatpush1.bf16.msra.mxu0 %v8583_v39  ;;  %5984 = vmatpush1.bf16.msra.mxu1 %v8586_v40 }
 0x310   :  { %7228 = vmatprep.subr.bf16.mxu0 %v8590_v41  ;;  %7250 = vmatprep.subr.bf16.mxu1 %v8591_v42 }
 0x312   :  { %7193 = vmatmul.mubr.msk.bf16.vlgmr.msra.gmra.mrb[0].mxu0 %vm4898_vm0, %v8589_v43  ;;  %7194 = vmatmul.mubr.msk.bf16.vlgmr.msra.gmra.mrb[0].mxu1 %vm4898_vm0, %v8589_v43 }
 0x313   :  { %7229 = vmatpush3.bf16.msra.mxu0 %v8592_v44  ;;  %7251 = vmatpush3.bf16.msra.mxu1 %v8593_v45 }
 0x314   :  { %7230 = vmatprep.subr.bf16.mxu0 %v8594_v46  ;;  %7252 = vmatprep.subr.bf16.mxu1 %v8595_v47 }
 0x317   :  { %7231 = vmatpush3.bf16.msra.mxu0 %v8596_v48  ;;  %7253 = vmatpush3.bf16.msra.mxu1 %v8597_v49 }
 0x318   :  { %7232 = vmatprep.subr.bf16.mxu0 %v8598_v50  ;;  %7254 = vmatprep.subr.bf16.mxu1 %v8599_v51  ;;  %v7195_v51 = vld [vmem:[%s11192_s4] ss:$0 sm:$0xff] }
 0x31b   :  { %7233 = vmatpush3.bf16.msra.mxu0 %v8600_v52  ;;  %7255 = vmatpush3.bf16.msra.mxu1 %v8601_v53 }
 0x31c   :  { %7234 = vmatprep.subr.bf16.mxu0 %v8602_v54  ;;  %7256 = vmatprep.subr.bf16.mxu1 %v8603_v55 }
 0x31f   :  { %7235 = vmatpush3.bf16.msra.mxu0 %v8604_v56  ;;  %7257 = vmatpush3.bf16.msra.mxu1 %v8605_v57 }
 0x320   :  { %7236 = vmatprep.subr.bf16.mxu0 %v8606_v58  ;;  %7258 = vmatprep.subr.bf16.mxu1 %v8607_v59 }
 0x323   :  { %7237 = vmatpush3.bf16.msra.mxu0 %v8608_v60  ;;  %7259 = vmatpush3.bf16.msra.mxu1 %v8609_v61 }
 0x324   :  { %7238 = vmatprep.subr.bf16.mxu0 %v8610_v62  ;;  %7260 = vmatprep.subr.bf16.mxu1 %v8611_v63 }
 0x327   :  { %7239 = vmatpush3.bf16.msra.mxu0 %v8612_v0  ;;  %7261 = vmatpush3.bf16.msra.mxu1 %v8613_v1 }
 0x328   :  { %7240 = vmatprep.subr.bf16.mxu0 %v8614_v2  ;;  %7262 = vmatprep.subr.bf16.mxu1 %v8615_v3 }
 0x32b   :  { %7241 = vmatpush3.bf16.msra.mxu0 %v8616_v4  ;;  %7263 = vmatpush3.bf16.msra.mxu1 %v8617_v5 }
 0x32c   :  { %7242 = vmatprep.subr.bf16.mxu0 %v8618_v6  ;;  %7264 = vmatprep.subr.bf16.mxu1 %v8619_v7 }
 0x32f   :  { %7243 = vmatpush3.bf16.msra.mxu0 %v8620_v8  ;;  %7265 = vmatpush3.bf16.msra.mxu1 %v8621_v9 }
 0x3e5   :  { %v5452_v21 = vpop.f32.mrb[0].mxu0  ;;  %v6011_v22 = vpop.f32.mrb[0].mxu1 }
 0x3e6   :  { %v7272_v23 = vadd.f32 %v5452_v21, %v836_v17  ;;  %v7276_v24 = vadd.f32 %v6011_v22, %v844_v18  ;;  %v5454_v25 = vpop.f32.mrb[1].mxu0  ;;  %v6013_v26 = vpop.f32.mrb[1].mxu1 }
 0x3e7   :  { %v7273_v27 = vadd.f32 %v5454_v25, %v840_v19  ;;  %v7277_v28 = vadd.f32 %v6013_v26, %v848_v20  ;;  %v5456_v29 = vpop.f32.mrb[2].mxu0  ;;  %v6015_v30 = vpop.f32.mrb[2].mxu1 }
 0x3e8   :  { %v7274_v31 = vadd.f32 %v5456_v29, %v836_v17  ;;  %v7278_v32 = vadd.f32 %v6015_v30, %v844_v18  ;;  %v5458_v33 = vpop.f32.mrb[3].mxu0  ;;  %v6017_v34 = vpop.f32.mrb[3].mxu1  ;;  %v6020_v37 = vmax.f32 %v7272_v23, 0.0  ;;  %v6022_v38 = vmax.f32 %v7276_v24, 0.0 }
 0x3e9   :  { %v7275_v35 = vadd.f32 %v5458_v33, %v840_v19  ;;  %v7279_v36 = vadd.f32 %v6017_v34, %v848_v20  ;;  %v6021_v41 = vmax.f32 %v7273_v27, 0.0  ;;  %v6023_v42 = vmax.f32 %v7277_v28, 0.0 }
 0x3ea   :  { %v6024_v39 = vmax.f32 %v7274_v31, 0.0  ;;  %v6026_v40 = vmax.f32 %v7278_v32, 0.0 }
 0x3eb   :  { %v6025_v43 = vmax.f32 %v7275_v35, 0.0  ;;  %v6027_v44 = vmax.f32 %v7279_v36, 0.0 }
 0x3ec   :  { %v6028_v45 = vpack.c.bf16 %v6024_v39, %v6020_v37  ;;  %v6030_v46 = vpack.c.bf16 %v6026_v40, %v6022_v38 }
 0x3ed   :  { %v6029_v47 = vpack.c.bf16 %v6025_v43, %v6021_v41  ;;  %v6031_v48 = vpack.c.bf16 %v6027_v44, %v6023_v42 }
 0x3ef   :  { %6327 = vmatprep.mubr.bf16.mxu0 %v6029_v47  ;;  %6368 = vmatprep.mubr.bf16.mxu1 %v6031_v48 }
 0x3f0   :  { %6328 = vmatmul.mubr.bf16.vlgmr.msra.gmra.mrb[4].mxu0 %v6028_v45  ;;  %6369 = vmatmul.mubr.bf16.vlgmr.msra.gmra.mrb[4].mxu1 %v6030_v46 }
 0x4c3   :  { %v7244_v49 = vpop.f32.mrb[4].mxu0  ;;  %v7266_v50 = vpop.f32.mrb[4].mxu1 }
 0x4c4   :  { %v7245_v52 = vpop.f32.mrb[5].mxu0  ;;  %v7267_v53 = vpop.f32.mrb[5].mxu1 }
 0x4c5   :  { %v7246_v54 = vadd.f32 %v7245_v52, %v7244_v49  ;;  %v7268_v55 = vadd.f32 %v7267_v53, %v7266_v50  ;;  %v7247_v56 = vpop.f32.mrb[6].mxu0  ;;  %v7269_v57 = vpop.f32.mrb[6].mxu1 }
 0x4c6   :  { %v7248_v58 = vpop.f32.mrb[7].mxu0  ;;  %v7270_v59 = vpop.f32.mrb[7].mxu1 }
 0x4c7   :  { %v6330_v60 = vadd.f32 %v7246_v54, %v7195_v51  ;;  %v7249_v61 = vadd.f32 %v7248_v58, %v7247_v56  ;;  %v7271_v62 = vadd.f32 %v7270_v59, %v7269_v57 }
 0x4c9   :  { %v6371_v63 = vadd.f32 %v7268_v55, %v6330_v60  ;;  %v6333_v0 = vadd.f32 %v7249_v61, %v7195_v51 }
 0x4cb   :  { %6378 = vst.msk [vmem:[%s11193_s5] sm:$0xff] %vm6377_vm1, %v6371_v63  ;;  %v6374_v1 = vadd.f32 %v7271_v62, %v6333_v0 }
 0x4cd   :  { %6379 = vst.msk [vmem:[%s11193_s5 + $0x8] sm:$0xff] %vm6377_vm1, %v6374_v1 }

</bundles_post_ra>
